<compile_context>
chip_gen: v7x
topology: tpu7x:2x2x1
jax: 0.10.0
libtpu: 0.0.40
codegen_flags: <defaults>
</compile_context>

<pallas_src>
import functools

import jax
import jax.numpy as jnp
from jax import lax
from jax.experimental import pallas as pl
from jax.experimental.pallas import tpu as pltpu

LN_EPS = 1e-5  # torch nn.LayerNorm default


def _layernorm_f32(xf, gamma_f32, beta_f32):
    """Two-pass LayerNorm over the last (lane) axis, f32 math."""
    mean = jnp.mean(xf, axis=-1, keepdims=True)
    cen = xf - mean
    var = jnp.mean(cen * cen, axis=-1, keepdims=True)
    return cen * lax.rsqrt(var + LN_EPS) * gamma_f32 + beta_f32


def _choose_batch_block(B, N, target_rows=512):
    """Pick batch-block so b_blk*N ~ target_rows (MXU fill), keep >=2 grid
    steps for v7x megacore when that does not drop below the row target."""
    per = max(1, target_rows // max(N, 1))
    b_blk = min(B, per)
    if b_blk >= B and B >= 2 and (B // 2) * N >= target_rows:
        b_blk = (B + 1) // 2
    return max(1, b_blk)


def _const_spec(shape):
    """BlockSpec for an operand whose block never changes across the grid:
    single-buffered (no point double-buffering a constant window)."""
    nd = len(shape)
    index_map = lambda i, _nd=nd: (0,) * _nd
    try:
        return pl.BlockSpec(shape, index_map, pipeline_mode=pl.Buffered(1))
    except TypeError:  # older BlockSpec signature without pipeline_mode
        return pl.BlockSpec(shape, index_map)


# --------------------------------------------------------------------------
# Fused layer kernel: PreNorm+Attention+residual, then PreNorm+FF+residual,
# over a block of b_blk batch elements (b_blk*N rows) per grid step.
# --------------------------------------------------------------------------
def _layer_kernel(x_ref, g1_ref, bln1_ref, wqkv_ref, wo_ref, bo_ref,
                  g2_ref, bln2_ref, w1_ref, b1_ref, w2_ref, b2_ref, o_ref,
                  *, heads, dim_head, scale):
    blk_b, N, D = x_ref.shape
    inner = heads * dim_head
    rows = blk_b * N

    x = x_ref[...].reshape(rows, D)                     # input dtype
    xf = x.astype(jnp.float32)

    # ---- PreNorm(LN1) + Attention + residual --------------------------------
    y = _layernorm_f32(xf, g1_ref[...].astype(jnp.float32),
                       bln1_ref[...].astype(jnp.float32)).astype(x.dtype)

    # QKV projection over the whole (rows, D) slab: M = b_blk*N rows on the MXU.
    qkv = jnp.dot(y, wqkv_ref[...], preferred_element_type=jnp.float32)
    qkv = qkv.astype(x.dtype).reshape(blk_b, N, 3 * inner)

    proj = jnp.zeros((rows, D), jnp.float32)
    for h in range(heads):
        q_h = qkv[:, :, 0 * inner + h * dim_head: 0 * inner + (h + 1) * dim_head]
        k_h = qkv[:, :, 1 * inner + h * dim_head: 1 * inner + (h + 1) * dim_head]
        v_h = qkv[:, :, 2 * inner + h * dim_head: 2 * inner + (h + 1) * dim_head]

        # Fold 1/sqrt(dim_head) into q: O(rows*dim_head) instead of O(rows*N).
        q_h = q_h * jnp.asarray(scale, q_h.dtype)

        s = jnp.einsum("bnd,bmd->bnm", q_h, k_h,
                       preferred_element_type=jnp.float32)      # (b_blk, N, N)
        s = s - jnp.max(s, axis=-1, keepdims=True)
        e = jnp.exp(s)
        l = jnp.sum(e, axis=-1, keepdims=True)                  # (b_blk, N, 1)

        # Un-normalized P@V; normalize the small (rows, dim_head) result with
        # an EUP reciprocal instead of dividing the (N, N) probabilities.
        pv = jnp.einsum("bnm,bmd->bnd", e.astype(x.dtype), v_h,
                        preferred_element_type=jnp.float32)
        out_h = pv * pl.reciprocal(l, approx=True)
        out_h = out_h.reshape(rows, dim_head).astype(x.dtype)

        # Per-head slice of W_out; accumulating is equivalent to concat @ W_out
        # and keeps M = rows on this matmul as well.
        proj = proj + jnp.dot(out_h, wo_ref[h * dim_head:(h + 1) * dim_head, :],
                              preferred_element_type=jnp.float32)

    attn_out = proj + bo_ref[...].astype(jnp.float32) + xf      # fused residual
    # TODO(synk): nn.Dropout(dropout) skipped (dropout=0.0 / inference path).

    # ---- PreNorm(LN2) + FeedForward + residual ------------------------------
    y2 = _layernorm_f32(attn_out, g2_ref[...].astype(jnp.float32),
                        bln2_ref[...].astype(jnp.float32)).astype(x.dtype)
    hmid = jnp.dot(y2, w1_ref[...], preferred_element_type=jnp.float32)
    hmid = hmid + b1_ref[...].astype(jnp.float32)
    # TODO(synk): torch nn.GELU default is exact (erf); tanh approximation used here.
    hmid = jax.nn.gelu(hmid, approximate=True).astype(x.dtype)
    out = jnp.dot(hmid, w2_ref[...], preferred_element_type=jnp.float32)
    out = out + b2_ref[...].astype(jnp.float32) + attn_out      # fused residual

    o_ref[...] = out.reshape(blk_b, N, D).astype(o_ref.dtype)


def transformer_layer(x, p, *, heads, dim_head, batch_block=None):
    B, N, D = x.shape
    inner = heads * dim_head
    Hm = p["w1"].shape[1]
    scale = float(dim_head) ** -0.5

    b_blk = batch_block if batch_block is not None else _choose_batch_block(B, N)
    b_blk = min(b_blk, B)
    steps = (B + b_blk - 1) // b_blk
    B_pad = steps * b_blk
    if B_pad != B:
        # Zero-padded batches stay finite through LN/attention/FF; sliced off below.
        x = jnp.pad(x, ((0, B_pad - B), (0, 0), (0, 0)))

    itemsize = jnp.dtype(x.dtype).itemsize
    rows_total = B_pad * N

    weight_bytes = (D * 3 * inner + inner * D + D * Hm + Hm * D
                    + 2 * Hm + 6 * D) * itemsize
    cost = pl.CostEstimate(
        flops=int(rows_total * (2 * D * 3 * inner + 2 * inner * D
                                + 2 * D * Hm + 2 * Hm * D)
                  + B_pad * heads * 4 * N * N * dim_head),
        transcendentals=int(B_pad * heads * N * N + rows_total * Hm),
        bytes_accessed=int(2 * rows_total * D * itemsize + weight_bytes),
    )

    # VMEM budget: single-buffered weights + f32 intermediates of one block
    # + double-buffered x in/out blocks.  Clamp to [32 MiB, 64 MiB] (v7x has
    # 64 MiB physical per TensorCore).
    block_rows = b_blk * N
    act_bytes = 4 * block_rows * (2 * D + 3 * inner + Hm + dim_head) \
        + 4 * 2 * b_blk * N * N
    io_bytes = 2 * 2 * block_rows * D * itemsize
    vmem_limit = int(min(max(2 * (weight_bytes + act_bytes + io_bytes),
                             32 * 1024 * 1024), 64 * 1024 * 1024))

    kernel = functools.partial(_layer_kernel, heads=heads, dim_head=dim_head,
                               scale=scale)
    out = pl.pallas_call(
        kernel,
        out_shape=jax.ShapeDtypeStruct((B_pad, N, D), x.dtype),
        grid_spec=pltpu.PrefetchScalarGridSpec(
            num_scalar_prefetch=0,
            grid=(steps,),
            in_specs=[
                pl.BlockSpec((b_blk, N, D), lambda i: (i, 0, 0)),   # x block
                _const_spec((1, D)),                                # ln1 gamma
                _const_spec((1, D)),                                # ln1 beta
                _const_spec((D, 3 * inner)),                        # W_qkv
                _const_spec((inner, D)),                            # W_out
                _const_spec((1, D)),                                # b_out
                _const_spec((1, D)),                                # ln2 gamma
                _const_spec((1, D)),                                # ln2 beta
                _const_spec((D, Hm)),                               # W1
                _const_spec((1, Hm)),                               # b1
                _const_spec((Hm, D)),                               # W2
                _const_spec((1, D)),                                # b2
            ],
            out_specs=pl.BlockSpec((b_blk, N, D), lambda i: (i, 0, 0)),
        ),
        compiler_params=pltpu.CompilerParams(
            dimension_semantics=("parallel",),
            vmem_limit_bytes=vmem_limit),
        cost_estimate=cost,
        input_output_aliases={0: 0},     # reuse x's HBM buffer for the output
    )(x, p["ln1_g"].reshape(1, D), p["ln1_b"].reshape(1, D),
      p["wqkv"], p["wo"], p["bo"].reshape(1, D),
      p["ln2_g"].reshape(1, D), p["ln2_b"].reshape(1, D),
      p["w1"], p["b1"].reshape(1, Hm), p["w2"], p["b2"].reshape(1, D))

    return out[:B] if B_pad != B else out


# --------------------------------------------------------------------------
# Full Transformer forward: depth x fused (attn + ff) layer kernels.
# --------------------------------------------------------------------------
@functools.partial(jax.jit, static_argnames=("heads", "dim_head", "batch_block"))
def transformer_forward(x, params, *, heads, dim_head, batch_block=None):
    for p in params:
        x = transformer_layer(x, p, heads=heads, dim_head=dim_head,
                              batch_block=batch_block)
    return x


# --------------------------------------------------------------------------
# Pure-JAX reference (same math, same param layout) for correctness check.
# --------------------------------------------------------------------------
def _reference(x, params, *, heads, dim_head):
    def ln(v, g, b):
        vf = v.astype(jnp.float32)
        mean = jnp.mean(vf, axis=-1, keepdims=True)
        var = jnp.mean((vf - mean) ** 2, axis=-1, keepdims=True)
        return (vf - mean) * lax.rsqrt(var + LN_EPS) * g + b

    scale = float(dim_head) ** -0.5
    inner = heads * dim_head
    for p in params:
        B, N, _ = x.shape
        y = ln(x, p["ln1_g"], p["ln1_b"])
        qkv = y @ p["wqkv"].astype(jnp.float32)
        q, k, v = jnp.split(qkv, 3, axis=-1)
        to_h = lambda t: t.reshape(B, N, heads, dim_head).transpose(0, 2, 1, 3)
        q, k, v = map(to_h, (q, k, v))
        s = jnp.einsum("bhnd,bhmd->bhnm", q, k) * scale
        a = jax.nn.softmax(s, axis=-1)
        o = jnp.einsum("bhnm,bhmd->bhnd", a, v)
        o = o.transpose(0, 2, 1, 3).reshape(B, N, inner)
        o = o @ p["wo"].astype(jnp.float32) + p["bo"]
        x = (o + x.astype(jnp.float32)).astype(x.dtype)

        y = ln(x, p["ln2_g"], p["ln2_b"])
        h = y @ p["w1"].astype(jnp.float32) + p["b1"]
        h = jax.nn.gelu(h, approximate=True)
        o = h @ p["w2"].astype(jnp.float32) + p["b2"]
        x = (o + x.astype(jnp.float32)).astype(x.dtype)
    return x


if __name__ == "__main__":
    # Small but lane-friendly shapes: every last dim is a multiple of 128.
    B, N = 2, 16
    dim, depth, heads, dim_head, mlp_dim = 128, 2, 2, 128, 256
    inner = heads * dim_head

    key = jax.random.PRNGKey(0)
    kx, key = jax.random.split(key)
    x = jax.random.normal(kx, (B, N, dim), dtype=jnp.float32)

    # Deterministic synthetic parameters (not a checkpoint).
    params = []
    for _ in range(depth):
        ks = jax.random.split(key, 7)
        key = ks[0]
        params.append(dict(
            ln1_g=jnp.ones((dim,), jnp.float32),
            ln1_b=jnp.zeros((dim,), jnp.float32),
            wqkv=jax.random.normal(ks[1], (dim, 3 * inner), jnp.float32) / jnp.sqrt(dim),
            wo=jax.random.normal(ks[2], (inner, dim), jnp.float32) / jnp.sqrt(inner),
            bo=jax.random.normal(ks[3], (dim,), jnp.float32) * 0.01,
            ln2_g=jnp.ones((dim,), jnp.float32),
            ln2_b=jnp.zeros((dim,), jnp.float32),
            w1=jax.random.normal(ks[4], (dim, mlp_dim), jnp.float32) / jnp.sqrt(dim),
            b1=jax.random.normal(ks[5], (mlp_dim,), jnp.float32) * 0.01,
            w2=jax.random.normal(ks[6], (mlp_dim, dim), jnp.float32) / jnp.sqrt(mlp_dim),
            b2=jnp.zeros((dim,), jnp.float32),
        ))

    out = transformer_forward(x, params, heads=heads, dim_head=dim_head)
    jax.block_until_ready(out)

    ref = _reference(x, params, heads=heads, dim_head=dim_head)
    # Normalized tolerance: allows for the approximate EUP reciprocal in the
    # deferred softmax normalization while still catching real bugs.
    err = float(jnp.max(jnp.abs(out - ref) / (1.0 + jnp.abs(ref))))
    assert err < 5e-3, f"mismatch vs reference: max normalized err = {err}"

    print("KERNEL_OK")
</pallas_src>

<mosaic_0001>
module attributes {stable_mosaic.version = 11 : i64} {
  func.func @_layer_kernel(%arg0: i32, %arg1: memref<2x16x128xf32, #tpu.memory_space<vmem>>, %arg2: memref<1x128xf32, #tpu.memory_space<vmem>>, %arg3: memref<1x128xf32, #tpu.memory_space<vmem>>, %arg4: memref<128x768xf32, #tpu.memory_space<vmem>>, %arg5: memref<256x128xf32, #tpu.memory_space<vmem>>, %arg6: memref<1x128xf32, #tpu.memory_space<vmem>>, %arg7: memref<1x128xf32, #tpu.memory_space<vmem>>, %arg8: memref<1x128xf32, #tpu.memory_space<vmem>>, %arg9: memref<128x256xf32, #tpu.memory_space<vmem>>, %arg10: memref<1x256xf32, #tpu.memory_space<vmem>>, %arg11: memref<256x128xf32, #tpu.memory_space<vmem>>, %arg12: memref<1x128xf32, #tpu.memory_space<vmem>>, %arg13: memref<2x16x128xf32, #tpu.memory_space<vmem>>) attributes {dimension_semantics = [#tpu.dimension_semantics<parallel>], iteration_bounds = array<i64: 1>, scalar_prefetch = 0 : i64, scratch_operands = 0 : i64, tpu.core_type = #tpu.core_type<tc>, window_params = [{transform_indices = @transform_0, window_bounds = array<i64: 2, 16, 128>}, {pipeline_mode = #tpu.pipeline_mode<synchronous>, transform_indices = @transform_1, window_bounds = array<i64: 1, 128>}, {pipeline_mode = #tpu.pipeline_mode<synchronous>, transform_indices = @transform_2, window_bounds = array<i64: 1, 128>}, {pipeline_mode = #tpu.pipeline_mode<synchronous>, transform_indices = @transform_3, window_bounds = array<i64: 128, 768>}, {pipeline_mode = #tpu.pipeline_mode<synchronous>, transform_indices = @transform_4, window_bounds = array<i64: 256, 128>}, {pipeline_mode = #tpu.pipeline_mode<synchronous>, transform_indices = @transform_5, window_bounds = array<i64: 1, 128>}, {pipeline_mode = #tpu.pipeline_mode<synchronous>, transform_indices = @transform_6, window_bounds = array<i64: 1, 128>}, {pipeline_mode = #tpu.pipeline_mode<synchronous>, transform_indices = @transform_7, window_bounds = array<i64: 1, 128>}, {pipeline_mode = #tpu.pipeline_mode<synchronous>, transform_indices = @transform_8, window_bounds = array<i64: 128, 256>}, {pipeline_mode = #tpu.pipeline_mode<synchronous>, transform_indices = @transform_9, window_bounds = array<i64: 1, 256>}, {pipeline_mode = #tpu.pipeline_mode<synchronous>, transform_indices = @transform_10, window_bounds = array<i64: 256, 128>}, {pipeline_mode = #tpu.pipeline_mode<synchronous>, transform_indices = @transform_11, window_bounds = array<i64: 1, 128>}, {transform_indices = @transform_12, window_bounds = array<i64: 2, 16, 128>}]} {
    %c0 = arith.constant 0 : index
    %c0_0 = arith.constant 0 : index
    %c0_1 = arith.constant 0 : index
    %0 = vector.load %arg1[%c0, %c0_0, %c0_1] : memref<2x16x128xf32, #tpu.memory_space<vmem>>, vector<2x16x128xf32>
    %1 = vector.shape_cast %0 : vector<2x16x128xf32> to vector<32x128xf32>
    %c0_2 = arith.constant 0 : index
    %c0_3 = arith.constant 0 : index
    %2 = vector.load %arg2[%c0_2, %c0_3] : memref<1x128xf32, #tpu.memory_space<vmem>>, vector<1x128xf32>
    %c0_4 = arith.constant 0 : index
    %c0_5 = arith.constant 0 : index
    %3 = vector.load %arg3[%c0_4, %c0_5] : memref<1x128xf32, #tpu.memory_space<vmem>>, vector<1x128xf32>
    %cst = arith.constant dense<0.000000e+00> : vector<32xf32>
    %4 = vector.multi_reduction <add>, %1, %cst [1] : vector<32x128xf32> to vector<32xf32>
    %5 = vector.shape_cast %4 : vector<32xf32> to vector<32x1xf32>
    %cst_6 = arith.constant 1.280000e+02 : f32
    %6 = vector.broadcast %cst_6 : f32 to vector<32x1xf32>
    %7 = arith.divf %5, %6 : vector<32x1xf32>
    %8 = vector.broadcast %7 : vector<32x1xf32> to vector<32x128xf32>
    %9 = arith.subf %1, %8 : vector<32x128xf32>
    %10 = arith.mulf %9, %9 : vector<32x128xf32>
    %cst_7 = arith.constant dense<0.000000e+00> : vector<32xf32>
    %11 = vector.multi_reduction <add>, %10, %cst_7 [1] : vector<32x128xf32> to vector<32xf32>
    %12 = vector.shape_cast %11 : vector<32xf32> to vector<32x1xf32>
    %cst_8 = arith.constant 1.280000e+02 : f32
    %13 = vector.broadcast %cst_8 : f32 to vector<32x1xf32>
    %14 = arith.divf %12, %13 : vector<32x1xf32>
    %cst_9 = arith.constant 9.99999974E-6 : f32
    %15 = vector.broadcast %cst_9 : f32 to vector<32x1xf32>
    %16 = arith.addf %14, %15 : vector<32x1xf32>
    %17 = math.rsqrt %16 : vector<32x1xf32>
    %18 = vector.broadcast %17 : vector<32x1xf32> to vector<32x128xf32>
    %19 = arith.mulf %9, %18 : vector<32x128xf32>
    %20 = vector.broadcast %2 : vector<1x128xf32> to vector<32x128xf32>
    %21 = arith.mulf %19, %20 : vector<32x128xf32>
    %22 = vector.broadcast %3 : vector<1x128xf32> to vector<32x128xf32>
    %23 = arith.addf %21, %22 : vector<32x128xf32>
    %c0_10 = arith.constant 0 : index
    %c0_11 = arith.constant 0 : index
    %24 = vector.load %arg4[%c0_10, %c0_11] : memref<128x768xf32, #tpu.memory_space<vmem>>, vector<128x768xf32>
    %cst_12 = arith.constant dense<0.000000e+00> : vector<32x768xf32>
    %25 = tpu.matmul %23, %24, %cst_12 {dimension_numbers = #tpu.dot_dimension_numbers<[1], [0], [0], [1], [0, 0, 1, 1], [], []>} : vector<32x128xf32>, vector<128x768xf32>, vector<32x768xf32> -> vector<32x768xf32>
    %26 = vector.shape_cast %25 : vector<32x768xf32> to vector<2x16x768xf32>
    %cst_13 = arith.constant 0.000000e+00 : f32
    %27 = vector.broadcast %cst_13 : f32 to vector<32x128xf32>
    %28 = vector.extract_strided_slice %26 {offsets = [0, 0, 0], sizes = [2, 16, 128], strides = [1, 1, 1]} : vector<2x16x768xf32> to vector<2x16x128xf32>
    %29 = vector.extract_strided_slice %26 {offsets = [0, 0, 256], sizes = [2, 16, 128], strides = [1, 1, 1]} : vector<2x16x768xf32> to vector<2x16x128xf32>
    %30 = vector.extract_strided_slice %26 {offsets = [0, 0, 512], sizes = [2, 16, 128], strides = [1, 1, 1]} : vector<2x16x768xf32> to vector<2x16x128xf32>
    %cst_14 = arith.constant 0.0883883461 : f32
    %31 = vector.broadcast %cst_14 : f32 to vector<2x16x128xf32>
    %32 = arith.mulf %28, %31 : vector<2x16x128xf32>
    "tpu.trace_start"() <{level = 10 : i32, message = "bnd,bmd->bnm"}> : () -> ()
    %cst_15 = arith.constant dense<0.000000e+00> : vector<2x16x16xf32>
    %33 = tpu.matmul %32, %29, %cst_15 {dimension_numbers = #tpu.dot_dimension_numbers<[2], [2], [1], [1], [0, 0, 0, 1, 1, 1], [0], [0]>} : vector<2x16x128xf32>, vector<2x16x128xf32>, vector<2x16x16xf32> -> vector<2x16x16xf32>
    "tpu.trace_stop"() : () -> ()
    %cst_16 = arith.constant dense<0xFF800000> : vector<2x16xf32>
    %34 = vector.multi_reduction <maximumf>, %33, %cst_16 [2] : vector<2x16x16xf32> to vector<2x16xf32>
    %35 = vector.shape_cast %34 : vector<2x16xf32> to vector<2x16x1xf32>
    %36 = vector.broadcast %35 : vector<2x16x1xf32> to vector<2x16x16xf32>
    %37 = arith.subf %33, %36 : vector<2x16x16xf32>
    %38 = math.exp %37 : vector<2x16x16xf32>
    %cst_17 = arith.constant dense<0.000000e+00> : vector<2x16xf32>
    %39 = vector.multi_reduction <add>, %38, %cst_17 [2] : vector<2x16x16xf32> to vector<2x16xf32>
    %40 = vector.shape_cast %39 : vector<2x16xf32> to vector<2x16x1xf32>
    "tpu.trace_start"() <{level = 10 : i32, message = "bnm,bmd->bnd"}> : () -> ()
    %cst_18 = arith.constant dense<0.000000e+00> : vector<2x16x128xf32>
    %41 = tpu.matmul %38, %30, %cst_18 {dimension_numbers = #tpu.dot_dimension_numbers<[2], [1], [1], [2], [0, 0, 0, 1, 1, 2], [0], [0]>} : vector<2x16x16xf32>, vector<2x16x128xf32>, vector<2x16x128xf32> -> vector<2x16x128xf32>
    "tpu.trace_stop"() : () -> ()
    %42 = tpu.reciprocal %40 {approx = true} : vector<2x16x1xf32> -> vector<2x16x1xf32>
    %43 = vector.broadcast %42 : vector<2x16x1xf32> to vector<2x16x128xf32>
    %44 = arith.mulf %41, %43 : vector<2x16x128xf32>
    %45 = vector.shape_cast %44 : vector<2x16x128xf32> to vector<32x128xf32>
    %c0_19 = arith.constant 0 : index
    %c0_20 = arith.constant 0 : index
    %46 = vector.load %arg5[%c0_19, %c0_20] : memref<256x128xf32, #tpu.memory_space<vmem>>, vector<128x128xf32>
    %cst_21 = arith.constant dense<0.000000e+00> : vector<32x128xf32>
    %47 = tpu.matmul %45, %46, %cst_21 {dimension_numbers = #tpu.dot_dimension_numbers<[1], [0], [0], [1], [0, 0, 1, 1], [], []>} : vector<32x128xf32>, vector<128x128xf32>, vector<32x128xf32> -> vector<32x128xf32>
    %48 = arith.addf %27, %47 : vector<32x128xf32>
    %49 = vector.extract_strided_slice %26 {offsets = [0, 0, 128], sizes = [2, 16, 128], strides = [1, 1, 1]} : vector<2x16x768xf32> to vector<2x16x128xf32>
    %50 = vector.extract_strided_slice %26 {offsets = [0, 0, 384], sizes = [2, 16, 128], strides = [1, 1, 1]} : vector<2x16x768xf32> to vector<2x16x128xf32>
    %51 = vector.extract_strided_slice %26 {offsets = [0, 0, 640], sizes = [2, 16, 128], strides = [1, 1, 1]} : vector<2x16x768xf32> to vector<2x16x128xf32>
    %cst_22 = arith.constant 0.0883883461 : f32
    %52 = vector.broadcast %cst_22 : f32 to vector<2x16x128xf32>
    %53 = arith.mulf %49, %52 : vector<2x16x128xf32>
    "tpu.trace_start"() <{level = 10 : i32, message = "bnd,bmd->bnm"}> : () -> ()
    %cst_23 = arith.constant dense<0.000000e+00> : vector<2x16x16xf32>
    %54 = tpu.matmul %53, %50, %cst_23 {dimension_numbers = #tpu.dot_dimension_numbers<[2], [2], [1], [1], [0, 0, 0, 1, 1, 1], [0], [0]>} : vector<2x16x128xf32>, vector<2x16x128xf32>, vector<2x16x16xf32> -> vector<2x16x16xf32>
    "tpu.trace_stop"() : () -> ()
    %cst_24 = arith.constant dense<0xFF800000> : vector<2x16xf32>
    %55 = vector.multi_reduction <maximumf>, %54, %cst_24 [2] : vector<2x16x16xf32> to vector<2x16xf32>
    %56 = vector.shape_cast %55 : vector<2x16xf32> to vector<2x16x1xf32>
    %57 = vector.broadcast %56 : vector<2x16x1xf32> to vector<2x16x16xf32>
    %58 = arith.subf %54, %57 : vector<2x16x16xf32>
    %59 = math.exp %58 : vector<2x16x16xf32>
    %cst_25 = arith.constant dense<0.000000e+00> : vector<2x16xf32>
    %60 = vector.multi_reduction <add>, %59, %cst_25 [2] : vector<2x16x16xf32> to vector<2x16xf32>
    %61 = vector.shape_cast %60 : vector<2x16xf32> to vector<2x16x1xf32>
    "tpu.trace_start"() <{level = 10 : i32, message = "bnm,bmd->bnd"}> : () -> ()
    %cst_26 = arith.constant dense<0.000000e+00> : vector<2x16x128xf32>
    %62 = tpu.matmul %59, %51, %cst_26 {dimension_numbers = #tpu.dot_dimension_numbers<[2], [1], [1], [2], [0, 0, 0, 1, 1, 2], [0], [0]>} : vector<2x16x16xf32>, vector<2x16x128xf32>, vector<2x16x128xf32> -> vector<2x16x128xf32>
    "tpu.trace_stop"() : () -> ()
    %63 = tpu.reciprocal %61 {approx = true} : vector<2x16x1xf32> -> vector<2x16x1xf32>
    %64 = vector.broadcast %63 : vector<2x16x1xf32> to vector<2x16x128xf32>
    %65 = arith.mulf %62, %64 : vector<2x16x128xf32>
    %66 = vector.shape_cast %65 : vector<2x16x128xf32> to vector<32x128xf32>
    %c128 = arith.constant 128 : index
    %c0_27 = arith.constant 0 : index
    %67 = vector.load %arg5[%c128, %c0_27] : memref<256x128xf32, #tpu.memory_space<vmem>>, vector<128x128xf32>
    %cst_28 = arith.constant dense<0.000000e+00> : vector<32x128xf32>
    %68 = tpu.matmul %66, %67, %cst_28 {dimension_numbers = #tpu.dot_dimension_numbers<[1], [0], [0], [1], [0, 0, 1, 1], [], []>} : vector<32x128xf32>, vector<128x128xf32>, vector<32x128xf32> -> vector<32x128xf32>
    %69 = arith.addf %48, %68 : vector<32x128xf32>
    %c0_29 = arith.constant 0 : index
    %c0_30 = arith.constant 0 : index
    %70 = vector.load %arg6[%c0_29, %c0_30] : memref<1x128xf32, #tpu.memory_space<vmem>>, vector<1x128xf32>
    %71 = vector.broadcast %70 : vector<1x128xf32> to vector<32x128xf32>
    %72 = arith.addf %69, %71 : vector<32x128xf32>
    %73 = arith.addf %72, %1 : vector<32x128xf32>
    %c0_31 = arith.constant 0 : index
    %c0_32 = arith.constant 0 : index
    %74 = vector.load %arg7[%c0_31, %c0_32] : memref<1x128xf32, #tpu.memory_space<vmem>>, vector<1x128xf32>
    %c0_33 = arith.constant 0 : index
    %c0_34 = arith.constant 0 : index
    %75 = vector.load %arg8[%c0_33, %c0_34] : memref<1x128xf32, #tpu.memory_space<vmem>>, vector<1x128xf32>
    %cst_35 = arith.constant dense<0.000000e+00> : vector<32xf32>
    %76 = vector.multi_reduction <add>, %73, %cst_35 [1] : vector<32x128xf32> to vector<32xf32>
    %77 = vector.shape_cast %76 : vector<32xf32> to vector<32x1xf32>
    %cst_36 = arith.constant 1.280000e+02 : f32
    %78 = vector.broadcast %cst_36 : f32 to vector<32x1xf32>
    %79 = arith.divf %77, %78 : vector<32x1xf32>
    %80 = vector.broadcast %79 : vector<32x1xf32> to vector<32x128xf32>
    %81 = arith.subf %73, %80 : vector<32x128xf32>
    %82 = arith.mulf %81, %81 : vector<32x128xf32>
    %cst_37 = arith.constant dense<0.000000e+00> : vector<32xf32>
    %83 = vector.multi_reduction <add>, %82, %cst_37 [1] : vector<32x128xf32> to vector<32xf32>
    %84 = vector.shape_cast %83 : vector<32xf32> to vector<32x1xf32>
    %cst_38 = arith.constant 1.280000e+02 : f32
    %85 = vector.broadcast %cst_38 : f32 to vector<32x1xf32>
    %86 = arith.divf %84, %85 : vector<32x1xf32>
    %cst_39 = arith.constant 9.99999974E-6 : f32
    %87 = vector.broadcast %cst_39 : f32 to vector<32x1xf32>
    %88 = arith.addf %86, %87 : vector<32x1xf32>
    %89 = math.rsqrt %88 : vector<32x1xf32>
    %90 = vector.broadcast %89 : vector<32x1xf32> to vector<32x128xf32>
    %91 = arith.mulf %81, %90 : vector<32x128xf32>
    %92 = vector.broadcast %74 : vector<1x128xf32> to vector<32x128xf32>
    %93 = arith.mulf %91, %92 : vector<32x128xf32>
    %94 = vector.broadcast %75 : vector<1x128xf32> to vector<32x128xf32>
    %95 = arith.addf %93, %94 : vector<32x128xf32>
    %c0_40 = arith.constant 0 : index
    %c0_41 = arith.constant 0 : index
    %96 = vector.load %arg9[%c0_40, %c0_41] : memref<128x256xf32, #tpu.memory_space<vmem>>, vector<128x256xf32>
    %cst_42 = arith.constant dense<0.000000e+00> : vector<32x256xf32>
    %97 = tpu.matmul %95, %96, %cst_42 {dimension_numbers = #tpu.dot_dimension_numbers<[1], [0], [0], [1], [0, 0, 1, 1], [], []>} : vector<32x128xf32>, vector<128x256xf32>, vector<32x256xf32> -> vector<32x256xf32>
    %c0_43 = arith.constant 0 : index
    %c0_44 = arith.constant 0 : index
    %98 = vector.load %arg10[%c0_43, %c0_44] : memref<1x256xf32, #tpu.memory_space<vmem>>, vector<1x256xf32>
    %99 = vector.broadcast %98 : vector<1x256xf32> to vector<32x256xf32>
    %100 = arith.addf %97, %99 : vector<32x256xf32>
    %101 = arith.mulf %100, %100 : vector<32x256xf32>
    %102 = arith.mulf %100, %101 : vector<32x256xf32>
    %cst_45 = arith.constant 4.471500e-02 : f32
    %103 = vector.broadcast %cst_45 : f32 to vector<32x256xf32>
    %104 = arith.mulf %103, %102 : vector<32x256xf32>
    %105 = arith.addf %100, %104 : vector<32x256xf32>
    %cst_46 = arith.constant 0.797884583 : f32
    %106 = vector.broadcast %cst_46 : f32 to vector<32x256xf32>
    %107 = arith.mulf %106, %105 : vector<32x256xf32>
    %108 = math.tanh %107 : vector<32x256xf32>
    %cst_47 = arith.constant 1.000000e+00 : f32
    %109 = vector.broadcast %cst_47 : f32 to vector<32x256xf32>
    %110 = arith.addf %109, %108 : vector<32x256xf32>
    %cst_48 = arith.constant 5.000000e-01 : f32
    %111 = vector.broadcast %cst_48 : f32 to vector<32x256xf32>
    %112 = arith.mulf %111, %110 : vector<32x256xf32>
    %113 = arith.mulf %100, %112 : vector<32x256xf32>
    %c0_49 = arith.constant 0 : index
    %c0_50 = arith.constant 0 : index
    %114 = vector.load %arg11[%c0_49, %c0_50] : memref<256x128xf32, #tpu.memory_space<vmem>>, vector<256x128xf32>
    %cst_51 = arith.constant dense<0.000000e+00> : vector<32x128xf32>
    %115 = tpu.matmul %113, %114, %cst_51 {dimension_numbers = #tpu.dot_dimension_numbers<[1], [0], [0], [1], [0, 0, 1, 1], [], []>} : vector<32x256xf32>, vector<256x128xf32>, vector<32x128xf32> -> vector<32x128xf32>
    %c0_52 = arith.constant 0 : index
    %c0_53 = arith.constant 0 : index
    %116 = vector.load %arg12[%c0_52, %c0_53] : memref<1x128xf32, #tpu.memory_space<vmem>>, vector<1x128xf32>
    %117 = vector.broadcast %116 : vector<1x128xf32> to vector<32x128xf32>
    %118 = arith.addf %115, %117 : vector<32x128xf32>
    %119 = arith.addf %118, %73 : vector<32x128xf32>
    %120 = vector.shape_cast %119 : vector<32x128xf32> to vector<2x16x128xf32>
    %c0_54 = arith.constant 0 : index
    %c0_55 = arith.constant 0 : index
    %c0_56 = arith.constant 0 : index
    %121 = vector.load %arg13[%c0_54, %c0_55, %c0_56] : memref<2x16x128xf32, #tpu.memory_space<vmem>>, vector<2x16x128xf32>
    tpu.vector_store %arg13[%c0_54, %c0_55, %c0_56], %120 {strides = array<i32>} : memref<2x16x128xf32, #tpu.memory_space<vmem>>, vector<2x16x128xf32>,
    return
  }
  func.func @transform_0(%arg0: i32) -> (i32, i32, i32) {
    %c0_i32 = arith.constant 0 : i32
    %c0_i32_0 = arith.constant 0 : i32
    %c0_i32_1 = arith.constant 0 : i32
    return %arg0, %c0_i32, %c0_i32_0 : i32, i32, i32
  }
  func.func @transform_1(%arg0: i32) -> (i32, i32) {
    %c0_i32 = arith.constant 0 : i32
    %c0_i32_0 = arith.constant 0 : i32
    %c0_i32_1 = arith.constant 0 : i32
    return %c0_i32, %c0_i32_0 : i32, i32
  }
  func.func @transform_2(%arg0: i32) -> (i32, i32) {
    %c0_i32 = arith.constant 0 : i32
    %c0_i32_0 = arith.constant 0 : i32
    %c0_i32_1 = arith.constant 0 : i32
    return %c0_i32, %c0_i32_0 : i32, i32
  }
  func.func @transform_3(%arg0: i32) -> (i32, i32) {
    %c0_i32 = arith.constant 0 : i32
    %c0_i32_0 = arith.constant 0 : i32
    %c0_i32_1 = arith.constant 0 : i32
    return %c0_i32, %c0_i32_0 : i32, i32
  }
  func.func @transform_4(%arg0: i32) -> (i32, i32) {
    %c0_i32 = arith.constant 0 : i32
    %c0_i32_0 = arith.constant 0 : i32
    %c0_i32_1 = arith.constant 0 : i32
    return %c0_i32, %c0_i32_0 : i32, i32
  }
  func.func @transform_5(%arg0: i32) -> (i32, i32) {
    %c0_i32 = arith.constant 0 : i32
    %c0_i32_0 = arith.constant 0 : i32
    %c0_i32_1 = arith.constant 0 : i32
    return %c0_i32, %c0_i32_0 : i32, i32
  }
  func.func @transform_6(%arg0: i32) -> (i32, i32) {
    %c0_i32 = arith.constant 0 : i32
    %c0_i32_0 = arith.constant 0 : i32
    %c0_i32_1 = arith.constant 0 : i32
    return %c0_i32, %c0_i32_0 : i32, i32
  }
  func.func @transform_7(%arg0: i32) -> (i32, i32) {
    %c0_i32 = arith.constant 0 : i32
    %c0_i32_0 = arith.constant 0 : i32
    %c0_i32_1 = arith.constant 0 : i32
    return %c0_i32, %c0_i32_0 : i32, i32
  }
  func.func @transform_8(%arg0: i32) -> (i32, i32) {
    %c0_i32 = arith.constant 0 : i32
    %c0_i32_0 = arith.constant 0 : i32
    %c0_i32_1 = arith.constant 0 : i32
    return %c0_i32, %c0_i32_0 : i32, i32
  }
  func.func @transform_9(%arg0: i32) -> (i32, i32) {
    %c0_i32 = arith.constant 0 : i32
    %c0_i32_0 = arith.constant 0 : i32
    %c0_i32_1 = arith.constant 0 : i32
    return %c0_i32, %c0_i32_0 : i32, i32
  }
  func.func @transform_10(%arg0: i32) -> (i32, i32) {
    %c0_i32 = arith.constant 0 : i32
    %c0_i32_0 = arith.constant 0 : i32
    %c0_i32_1 = arith.constant 0 : i32
    return %c0_i32, %c0_i32_0 : i32, i32
  }
  func.func @transform_11(%arg0: i32) -> (i32, i32) {
    %c0_i32 = arith.constant 0 : i32
    %c0_i32_0 = arith.constant 0 : i32
    %c0_i32_1 = arith.constant 0 : i32
    return %c0_i32, %c0_i32_0 : i32, i32
  }
  func.func @transform_12(%arg0: i32) -> (i32, i32, i32) {
    %c0_i32 = arith.constant 0 : i32
    %c0_i32_0 = arith.constant 0 : i32
    %c0_i32_1 = arith.constant 0 : i32
    return %arg0, %c0_i32, %c0_i32_0 : i32, i32, i32
  }
}

module attributes {stable_mosaic.version = 11 : i64} {
  func.func @_layer_kernel(%arg0: i32, %arg1: memref<2x16x128xf32, #tpu.memory_space<vmem>>, %arg2: memref<1x128xf32, #tpu.memory_space<vmem>>, %arg3: memref<1x128xf32, #tpu.memory_space<vmem>>, %arg4: memref<128x768xf32, #tpu.memory_space<vmem>>, %arg5: memref<256x128xf32, #tpu.memory_space<vmem>>, %arg6: memref<1x128xf32, #tpu.memory_space<vmem>>, %arg7: memref<1x128xf32, #tpu.memory_space<vmem>>, %arg8: memref<1x128xf32, #tpu.memory_space<vmem>>, %arg9: memref<128x256xf32, #tpu.memory_space<vmem>>, %arg10: memref<1x256xf32, #tpu.memory_space<vmem>>, %arg11: memref<256x128xf32, #tpu.memory_space<vmem>>, %arg12: memref<1x128xf32, #tpu.memory_space<vmem>>, %arg13: memref<2x16x128xf32, #tpu.memory_space<vmem>>) attributes {dimension_semantics = [#tpu.dimension_semantics<parallel>], iteration_bounds = array<i64: 1>, scalar_prefetch = 0 : i64, scratch_operands = 0 : i64, tpu.core_type = #tpu.core_type<tc>, window_params = [{transform_indices = @transform_0, window_bounds = array<i64: 2, 16, 128>}, {pipeline_mode = #tpu.pipeline_mode<synchronous>, transform_indices = @transform_1, window_bounds = array<i64: 1, 128>}, {pipeline_mode = #tpu.pipeline_mode<synchronous>, transform_indices = @transform_2, window_bounds = array<i64: 1, 128>}, {pipeline_mode = #tpu.pipeline_mode<synchronous>, transform_indices = @transform_3, window_bounds = array<i64: 128, 768>}, {pipeline_mode = #tpu.pipeline_mode<synchronous>, transform_indices = @transform_4, window_bounds = array<i64: 256, 128>}, {pipeline_mode = #tpu.pipeline_mode<synchronous>, transform_indices = @transform_5, window_bounds = array<i64: 1, 128>}, {pipeline_mode = #tpu.pipeline_mode<synchronous>, transform_indices = @transform_6, window_bounds = array<i64: 1, 128>}, {pipeline_mode = #tpu.pipeline_mode<synchronous>, transform_indices = @transform_7, window_bounds = array<i64: 1, 128>}, {pipeline_mode = #tpu.pipeline_mode<synchronous>, transform_indices = @transform_8, window_bounds = array<i64: 128, 256>}, {pipeline_mode = #tpu.pipeline_mode<synchronous>, transform_indices = @transform_9, window_bounds = array<i64: 1, 256>}, {pipeline_mode = #tpu.pipeline_mode<synchronous>, transform_indices = @transform_10, window_bounds = array<i64: 256, 128>}, {pipeline_mode = #tpu.pipeline_mode<synchronous>, transform_indices = @transform_11, window_bounds = array<i64: 1, 128>}, {transform_indices = @transform_12, window_bounds = array<i64: 2, 16, 128>}]} {
    %c0 = arith.constant 0 : index
    %c0_0 = arith.constant 0 : index
    %c0_1 = arith.constant 0 : index
    %0 = vector.load %arg1[%c0, %c0_0, %c0_1] : memref<2x16x128xf32, #tpu.memory_space<vmem>>, vector<2x16x128xf32>
    %1 = vector.shape_cast %0 : vector<2x16x128xf32> to vector<32x128xf32>
    %c0_2 = arith.constant 0 : index
    %c0_3 = arith.constant 0 : index
    %2 = vector.load %arg2[%c0_2, %c0_3] : memref<1x128xf32, #tpu.memory_space<vmem>>, vector<1x128xf32>
    %c0_4 = arith.constant 0 : index
    %c0_5 = arith.constant 0 : index
    %3 = vector.load %arg3[%c0_4, %c0_5] : memref<1x128xf32, #tpu.memory_space<vmem>>, vector<1x128xf32>
    %cst = arith.constant dense<0.000000e+00> : vector<32xf32>
    %4 = vector.multi_reduction <add>, %1, %cst [1] : vector<32x128xf32> to vector<32xf32>
    %5 = vector.shape_cast %4 : vector<32xf32> to vector<32x1xf32>
    %cst_6 = arith.constant 1.280000e+02 : f32
    %6 = vector.broadcast %cst_6 : f32 to vector<32x1xf32>
    %7 = arith.divf %5, %6 : vector<32x1xf32>
    %8 = vector.broadcast %7 : vector<32x1xf32> to vector<32x128xf32>
    %9 = arith.subf %1, %8 : vector<32x128xf32>
    %10 = arith.mulf %9, %9 : vector<32x128xf32>
    %cst_7 = arith.constant dense<0.000000e+00> : vector<32xf32>
    %11 = vector.multi_reduction <add>, %10, %cst_7 [1] : vector<32x128xf32> to vector<32xf32>
    %12 = vector.shape_cast %11 : vector<32xf32> to vector<32x1xf32>
    %cst_8 = arith.constant 1.280000e+02 : f32
    %13 = vector.broadcast %cst_8 : f32 to vector<32x1xf32>
    %14 = arith.divf %12, %13 : vector<32x1xf32>
    %cst_9 = arith.constant 9.99999974E-6 : f32
    %15 = vector.broadcast %cst_9 : f32 to vector<32x1xf32>
    %16 = arith.addf %14, %15 : vector<32x1xf32>
    %17 = math.rsqrt %16 : vector<32x1xf32>
    %18 = vector.broadcast %17 : vector<32x1xf32> to vector<32x128xf32>
    %19 = arith.mulf %9, %18 : vector<32x128xf32>
    %20 = vector.broadcast %2 : vector<1x128xf32> to vector<32x128xf32>
    %21 = arith.mulf %19, %20 : vector<32x128xf32>
    %22 = vector.broadcast %3 : vector<1x128xf32> to vector<32x128xf32>
    %23 = arith.addf %21, %22 : vector<32x128xf32>
    %c0_10 = arith.constant 0 : index
    %c0_11 = arith.constant 0 : index
    %24 = vector.load %arg4[%c0_10, %c0_11] : memref<128x768xf32, #tpu.memory_space<vmem>>, vector<128x768xf32>
    %cst_12 = arith.constant dense<0.000000e+00> : vector<32x768xf32>
    %25 = tpu.matmul %23, %24, %cst_12 {dimension_numbers = #tpu.dot_dimension_numbers<[1], [0], [0], [1], [0, 0, 1, 1], [], []>} : vector<32x128xf32>, vector<128x768xf32>, vector<32x768xf32> -> vector<32x768xf32>
    %26 = vector.shape_cast %25 : vector<32x768xf32> to vector<2x16x768xf32>
    %cst_13 = arith.constant 0.000000e+00 : f32
    %27 = vector.broadcast %cst_13 : f32 to vector<32x128xf32>
    %28 = vector.extract_strided_slice %26 {offsets = [0, 0, 0], sizes = [2, 16, 128], strides = [1, 1, 1]} : vector<2x16x768xf32> to vector<2x16x128xf32>
    %29 = vector.extract_strided_slice %26 {offsets = [0, 0, 256], sizes = [2, 16, 128], strides = [1, 1, 1]} : vector<2x16x768xf32> to vector<2x16x128xf32>
    %30 = vector.extract_strided_slice %26 {offsets = [0, 0, 512], sizes = [2, 16, 128], strides = [1, 1, 1]} : vector<2x16x768xf32> to vector<2x16x128xf32>
    %cst_14 = arith.constant 0.0883883461 : f32
    %31 = vector.broadcast %cst_14 : f32 to vector<2x16x128xf32>
    %32 = arith.mulf %28, %31 : vector<2x16x128xf32>
    "tpu.trace_start"() <{level = 10 : i32, message = "bnd,bmd->bnm"}> : () -> ()
    %cst_15 = arith.constant dense<0.000000e+00> : vector<2x16x16xf32>
    %33 = tpu.matmul %32, %29, %cst_15 {dimension_numbers = #tpu.dot_dimension_numbers<[2], [2], [1], [1], [0, 0, 0, 1, 1, 1], [0], [0]>} : vector<2x16x128xf32>, vector<2x16x128xf32>, vector<2x16x16xf32> -> vector<2x16x16xf32>
    "tpu.trace_stop"() : () -> ()
    %cst_16 = arith.constant dense<0xFF800000> : vector<2x16xf32>
    %34 = vector.multi_reduction <maximumf>, %33, %cst_16 [2] : vector<2x16x16xf32> to vector<2x16xf32>
    %35 = vector.shape_cast %34 : vector<2x16xf32> to vector<2x16x1xf32>
    %36 = vector.broadcast %35 : vector<2x16x1xf32> to vector<2x16x16xf32>
    %37 = arith.subf %33, %36 : vector<2x16x16xf32>
    %38 = math.exp %37 : vector<2x16x16xf32>
    %cst_17 = arith.constant dense<0.000000e+00> : vector<2x16xf32>
    %39 = vector.multi_reduction <add>, %38, %cst_17 [2] : vector<2x16x16xf32> to vector<2x16xf32>
    %40 = vector.shape_cast %39 : vector<2x16xf32> to vector<2x16x1xf32>
    "tpu.trace_start"() <{level = 10 : i32, message = "bnm,bmd->bnd"}> : () -> ()
    %cst_18 = arith.constant dense<0.000000e+00> : vector<2x16x128xf32>
    %41 = tpu.matmul %38, %30, %cst_18 {dimension_numbers = #tpu.dot_dimension_numbers<[2], [1], [1], [2], [0, 0, 0, 1, 1, 2], [0], [0]>} : vector<2x16x16xf32>, vector<2x16x128xf32>, vector<2x16x128xf32> -> vector<2x16x128xf32>
    "tpu.trace_stop"() : () -> ()
    %42 = tpu.reciprocal %40 {approx = true} : vector<2x16x1xf32> -> vector<2x16x1xf32>
    %43 = vector.broadcast %42 : vector<2x16x1xf32> to vector<2x16x128xf32>
    %44 = arith.mulf %41, %43 : vector<2x16x128xf32>
    %45 = vector.shape_cast %44 : vector<2x16x128xf32> to vector<32x128xf32>
    %c0_19 = arith.constant 0 : index
    %c0_20 = arith.constant 0 : index
    %46 = vector.load %arg5[%c0_19, %c0_20] : memref<256x128xf32, #tpu.memory_space<vmem>>, vector<128x128xf32>
    %cst_21 = arith.constant dense<0.000000e+00> : vector<32x128xf32>
    %47 = tpu.matmul %45, %46, %cst_21 {dimension_numbers = #tpu.dot_dimension_numbers<[1], [0], [0], [1], [0, 0, 1, 1], [], []>} : vector<32x128xf32>, vector<128x128xf32>, vector<32x128xf32> -> vector<32x128xf32>
    %48 = arith.addf %27, %47 : vector<32x128xf32>
    %49 = vector.extract_strided_slice %26 {offsets = [0, 0, 128], sizes = [2, 16, 128], strides = [1, 1, 1]} : vector<2x16x768xf32> to vector<2x16x128xf32>
    %50 = vector.extract_strided_slice %26 {offsets = [0, 0, 384], sizes = [2, 16, 128], strides = [1, 1, 1]} : vector<2x16x768xf32> to vector<2x16x128xf32>
    %51 = vector.extract_strided_slice %26 {offsets = [0, 0, 640], sizes = [2, 16, 128], strides = [1, 1, 1]} : vector<2x16x768xf32> to vector<2x16x128xf32>
    %cst_22 = arith.constant 0.0883883461 : f32
    %52 = vector.broadcast %cst_22 : f32 to vector<2x16x128xf32>
    %53 = arith.mulf %49, %52 : vector<2x16x128xf32>
    "tpu.trace_start"() <{level = 10 : i32, message = "bnd,bmd->bnm"}> : () -> ()
    %cst_23 = arith.constant dense<0.000000e+00> : vector<2x16x16xf32>
    %54 = tpu.matmul %53, %50, %cst_23 {dimension_numbers = #tpu.dot_dimension_numbers<[2], [2], [1], [1], [0, 0, 0, 1, 1, 1], [0], [0]>} : vector<2x16x128xf32>, vector<2x16x128xf32>, vector<2x16x16xf32> -> vector<2x16x16xf32>
    "tpu.trace_stop"() : () -> ()
    %cst_24 = arith.constant dense<0xFF800000> : vector<2x16xf32>
    %55 = vector.multi_reduction <maximumf>, %54, %cst_24 [2] : vector<2x16x16xf32> to vector<2x16xf32>
    %56 = vector.shape_cast %55 : vector<2x16xf32> to vector<2x16x1xf32>
    %57 = vector.broadcast %56 : vector<2x16x1xf32> to vector<2x16x16xf32>
    %58 = arith.subf %54, %57 : vector<2x16x16xf32>
    %59 = math.exp %58 : vector<2x16x16xf32>
    %cst_25 = arith.constant dense<0.000000e+00> : vector<2x16xf32>
    %60 = vector.multi_reduction <add>, %59, %cst_25 [2] : vector<2x16x16xf32> to vector<2x16xf32>
    %61 = vector.shape_cast %60 : vector<2x16xf32> to vector<2x16x1xf32>
    "tpu.trace_start"() <{level = 10 : i32, message = "bnm,bmd->bnd"}> : () -> ()
    %cst_26 = arith.constant dense<0.000000e+00> : vector<2x16x128xf32>
    %62 = tpu.matmul %59, %51, %cst_26 {dimension_numbers = #tpu.dot_dimension_numbers<[2], [1], [1], [2], [0, 0, 0, 1, 1, 2], [0], [0]>} : vector<2x16x16xf32>, vector<2x16x128xf32>, vector<2x16x128xf32> -> vector<2x16x128xf32>
    "tpu.trace_stop"() : () -> ()
    %63 = tpu.reciprocal %61 {approx = true} : vector<2x16x1xf32> -> vector<2x16x1xf32>
    %64 = vector.broadcast %63 : vector<2x16x1xf32> to vector<2x16x128xf32>
    %65 = arith.mulf %62, %64 : vector<2x16x128xf32>
    %66 = vector.shape_cast %65 : vector<2x16x128xf32> to vector<32x128xf32>
    %c128 = arith.constant 128 : index
    %c0_27 = arith.constant 0 : index
    %67 = vector.load %arg5[%c128, %c0_27] : memref<256x128xf32, #tpu.memory_space<vmem>>, vector<128x128xf32>
    %cst_28 = arith.constant dense<0.000000e+00> : vector<32x128xf32>
    %68 = tpu.matmul %66, %67, %cst_28 {dimension_numbers = #tpu.dot_dimension_numbers<[1], [0], [0], [1], [0, 0, 1, 1], [], []>} : vector<32x128xf32>, vector<128x128xf32>, vector<32x128xf32> -> vector<32x128xf32>
    %69 = arith.addf %48, %68 : vector<32x128xf32>
    %c0_29 = arith.constant 0 : index
    %c0_30 = arith.constant 0 : index
    %70 = vector.load %arg6[%c0_29, %c0_30] : memref<1x128xf32, #tpu.memory_space<vmem>>, vector<1x128xf32>
    %71 = vector.broadcast %70 : vector<1x128xf32> to vector<32x128xf32>
    %72 = arith.addf %69, %71 : vector<32x128xf32>
    %73 = arith.addf %72, %1 : vector<32x128xf32>
    %c0_31 = arith.constant 0 : index
    %c0_32 = arith.constant 0 : index
    %74 = vector.load %arg7[%c0_31, %c0_32] : memref<1x128xf32, #tpu.memory_space<vmem>>, vector<1x128xf32>
    %c0_33 = arith.constant 0 : index
    %c0_34 = arith.constant 0 : index
    %75 = vector.load %arg8[%c0_33, %c0_34] : memref<1x128xf32, #tpu.memory_space<vmem>>, vector<1x128xf32>
    %cst_35 = arith.constant dense<0.000000e+00> : vector<32xf32>
    %76 = vector.multi_reduction <add>, %73, %cst_35 [1] : vector<32x128xf32> to vector<32xf32>
    %77 = vector.shape_cast %76 : vector<32xf32> to vector<32x1xf32>
    %cst_36 = arith.constant 1.280000e+02 : f32
    %78 = vector.broadcast %cst_36 : f32 to vector<32x1xf32>
    %79 = arith.divf %77, %78 : vector<32x1xf32>
    %80 = vector.broadcast %79 : vector<32x1xf32> to vector<32x128xf32>
    %81 = arith.subf %73, %80 : vector<32x128xf32>
    %82 = arith.mulf %81, %81 : vector<32x128xf32>
    %cst_37 = arith.constant dense<0.000000e+00> : vector<32xf32>
    %83 = vector.multi_reduction <add>, %82, %cst_37 [1] : vector<32x128xf32> to vector<32xf32>
    %84 = vector.shape_cast %83 : vector<32xf32> to vector<32x1xf32>
    %cst_38 = arith.constant 1.280000e+02 : f32
    %85 = vector.broadcast %cst_38 : f32 to vector<32x1xf32>
    %86 = arith.divf %84, %85 : vector<32x1xf32>
    %cst_39 = arith.constant 9.99999974E-6 : f32
    %87 = vector.broadcast %cst_39 : f32 to vector<32x1xf32>
    %88 = arith.addf %86, %87 : vector<32x1xf32>
    %89 = math.rsqrt %88 : vector<32x1xf32>
    %90 = vector.broadcast %89 : vector<32x1xf32> to vector<32x128xf32>
    %91 = arith.mulf %81, %90 : vector<32x128xf32>
    %92 = vector.broadcast %74 : vector<1x128xf32> to vector<32x128xf32>
    %93 = arith.mulf %91, %92 : vector<32x128xf32>
    %94 = vector.broadcast %75 : vector<1x128xf32> to vector<32x128xf32>
    %95 = arith.addf %93, %94 : vector<32x128xf32>
    %c0_40 = arith.constant 0 : index
    %c0_41 = arith.constant 0 : index
    %96 = vector.load %arg9[%c0_40, %c0_41] : memref<128x256xf32, #tpu.memory_space<vmem>>, vector<128x256xf32>
    %cst_42 = arith.constant dense<0.000000e+00> : vector<32x256xf32>
    %97 = tpu.matmul %95, %96, %cst_42 {dimension_numbers = #tpu.dot_dimension_numbers<[1], [0], [0], [1], [0, 0, 1, 1], [], []>} : vector<32x128xf32>, vector<128x256xf32>, vector<32x256xf32> -> vector<32x256xf32>
    %c0_43 = arith.constant 0 : index
    %c0_44 = arith.constant 0 : index
    %98 = vector.load %arg10[%c0_43, %c0_44] : memref<1x256xf32, #tpu.memory_space<vmem>>, vector<1x256xf32>
    %99 = vector.broadcast %98 : vector<1x256xf32> to vector<32x256xf32>
    %100 = arith.addf %97, %99 : vector<32x256xf32>
    %101 = arith.mulf %100, %100 : vector<32x256xf32>
    %102 = arith.mulf %100, %101 : vector<32x256xf32>
    %cst_45 = arith.constant 4.471500e-02 : f32
    %103 = vector.broadcast %cst_45 : f32 to vector<32x256xf32>
    %104 = arith.mulf %103, %102 : vector<32x256xf32>
    %105 = arith.addf %100, %104 : vector<32x256xf32>
    %cst_46 = arith.constant 0.797884583 : f32
    %106 = vector.broadcast %cst_46 : f32 to vector<32x256xf32>
    %107 = arith.mulf %106, %105 : vector<32x256xf32>
    %108 = math.tanh %107 : vector<32x256xf32>
    %cst_47 = arith.constant 1.000000e+00 : f32
    %109 = vector.broadcast %cst_47 : f32 to vector<32x256xf32>
    %110 = arith.addf %109, %108 : vector<32x256xf32>
    %cst_48 = arith.constant 5.000000e-01 : f32
    %111 = vector.broadcast %cst_48 : f32 to vector<32x256xf32>
    %112 = arith.mulf %111, %110 : vector<32x256xf32>
    %113 = arith.mulf %100, %112 : vector<32x256xf32>
    %c0_49 = arith.constant 0 : index
    %c0_50 = arith.constant 0 : index
    %114 = vector.load %arg11[%c0_49, %c0_50] : memref<256x128xf32, #tpu.memory_space<vmem>>, vector<256x128xf32>
    %cst_51 = arith.constant dense<0.000000e+00> : vector<32x128xf32>
    %115 = tpu.matmul %113, %114, %cst_51 {dimension_numbers = #tpu.dot_dimension_numbers<[1], [0], [0], [1], [0, 0, 1, 1], [], []>} : vector<32x256xf32>, vector<256x128xf32>, vector<32x128xf32> -> vector<32x128xf32>
    %c0_52 = arith.constant 0 : index
    %c0_53 = arith.constant 0 : index
    %116 = vector.load %arg12[%c0_52, %c0_53] : memref<1x128xf32, #tpu.memory_space<vmem>>, vector<1x128xf32>
    %117 = vector.broadcast %116 : vector<1x128xf32> to vector<32x128xf32>
    %118 = arith.addf %115, %117 : vector<32x128xf32>
    %119 = arith.addf %118, %73 : vector<32x128xf32>
    %120 = vector.shape_cast %119 : vector<32x128xf32> to vector<2x16x128xf32>
    %c0_54 = arith.constant 0 : index
    %c0_55 = arith.constant 0 : index
    %c0_56 = arith.constant 0 : index
    %121 = vector.load %arg13[%c0_54, %c0_55, %c0_56] : memref<2x16x128xf32, #tpu.memory_space<vmem>>, vector<2x16x128xf32>
    tpu.vector_store %arg13[%c0_54, %c0_55, %c0_56], %120 {strides = array<i32>} : memref<2x16x128xf32, #tpu.memory_space<vmem>>, vector<2x16x128xf32>,
    return
  }
  func.func @transform_0(%arg0: i32) -> (i32, i32, i32) {
    %c0_i32 = arith.constant 0 : i32
    %c0_i32_0 = arith.constant 0 : i32
    %c0_i32_1 = arith.constant 0 : i32
    return %arg0, %c0_i32, %c0_i32_0 : i32, i32, i32
  }
  func.func @transform_1(%arg0: i32) -> (i32, i32) {
    %c0_i32 = arith.constant 0 : i32
    %c0_i32_0 = arith.constant 0 : i32
    %c0_i32_1 = arith.constant 0 : i32
    return %c0_i32, %c0_i32_0 : i32, i32
  }
  func.func @transform_2(%arg0: i32) -> (i32, i32) {
    %c0_i32 = arith.constant 0 : i32
    %c0_i32_0 = arith.constant 0 : i32
    %c0_i32_1 = arith.constant 0 : i32
    return %c0_i32, %c0_i32_0 : i32, i32
  }
  func.func @transform_3(%arg0: i32) -> (i32, i32) {
    %c0_i32 = arith.constant 0 : i32
    %c0_i32_0 = arith.constant 0 : i32
    %c0_i32_1 = arith.constant 0 : i32
    return %c0_i32, %c0_i32_0 : i32, i32
  }
  func.func @transform_4(%arg0: i32) -> (i32, i32) {
    %c0_i32 = arith.constant 0 : i32
    %c0_i32_0 = arith.constant 0 : i32
    %c0_i32_1 = arith.constant 0 : i32
    return %c0_i32, %c0_i32_0 : i32, i32
  }
  func.func @transform_5(%arg0: i32) -> (i32, i32) {
    %c0_i32 = arith.constant 0 : i32
    %c0_i32_0 = arith.constant 0 : i32
    %c0_i32_1 = arith.constant 0 : i32
    return %c0_i32, %c0_i32_0 : i32, i32
  }
  func.func @transform_6(%arg0: i32) -> (i32, i32) {
    %c0_i32 = arith.constant 0 : i32
    %c0_i32_0 = arith.constant 0 : i32
    %c0_i32_1 = arith.constant 0 : i32
    return %c0_i32, %c0_i32_0 : i32, i32
  }
  func.func @transform_7(%arg0: i32) -> (i32, i32) {
    %c0_i32 = arith.constant 0 : i32
    %c0_i32_0 = arith.constant 0 : i32
    %c0_i32_1 = arith.constant 0 : i32
    return %c0_i32, %c0_i32_0 : i32, i32
  }
  func.func @transform_8(%arg0: i32) -> (i32, i32) {
    %c0_i32 = arith.constant 0 : i32
    %c0_i32_0 = arith.constant 0 : i32
    %c0_i32_1 = arith.constant 0 : i32
    return %c0_i32, %c0_i32_0 : i32, i32
  }
  func.func @transform_9(%arg0: i32) -> (i32, i32) {
    %c0_i32 = arith.constant 0 : i32
    %c0_i32_0 = arith.constant 0 : i32
    %c0_i32_1 = arith.constant 0 : i32
    return %c0_i32, %c0_i32_0 : i32, i32
  }
  func.func @transform_10(%arg0: i32) -> (i32, i32) {
    %c0_i32 = arith.constant 0 : i32
    %c0_i32_0 = arith.constant 0 : i32
    %c0_i32_1 = arith.constant 0 : i32
    return %c0_i32, %c0_i32_0 : i32, i32
  }
  func.func @transform_11(%arg0: i32) -> (i32, i32) {
    %c0_i32 = arith.constant 0 : i32
    %c0_i32_0 = arith.constant 0 : i32
    %c0_i32_1 = arith.constant 0 : i32
    return %c0_i32, %c0_i32_0 : i32, i32
  }
  func.func @transform_12(%arg0: i32) -> (i32, i32, i32) {
    %c0_i32 = arith.constant 0 : i32
    %c0_i32_0 = arith.constant 0 : i32
    %c0_i32_1 = arith.constant 0 : i32
    return %arg0, %c0_i32, %c0_i32_0 : i32, i32, i32
  }
}

</mosaic_0001>

<bundles_post_ra>
// kernel: transformer_forward.3
= control target key start
LH: loop header
LB: loop body
LE: loop exit
PB: predicated region body
PF: predicated region fallthrough
CT: control target
= control target key end

     0   :  { %17 = vsyncpa [#allocation3], 0  ;;  %s3393_s0 = inlined_call_operand.hbm [shape: f32[2,16,128], index: 0, kind: input, shape index: {}, may-alias: {0,12}]   ;;  %s3394_s1 = inlined_call_operand.vmem [shape: f32[1,128], index: 1, kind: input, shape index: {}]   ;;  %s3395_s2 = inlined_call_operand.vmem [shape: f32[1,128], index: 2, kind: input, shape index: {}]   ;;  %s3396_s3 = inlined_call_operand.vmem [shape: f32[128,768], index: 3, kind: input, shape index: {}]   ;;  %s3397_s4 = inlined_call_operand.vmem [shape: f32[256,128], index: 4, kind: input, shape index: {}]   ;;  %s3398_s5 = inlined_call_operand.vmem [shape: f32[1,128], index: 5, kind: input, shape index: {}]   ;;  %s3399_s6 = inlined_call_operand.vmem [shape: f32[1,128], index: 6, kind: input, shape index: {}]   ;;  %s3400_s7 = inlined_call_operand.vmem [shape: f32[1,128], index: 7, kind: input, shape index: {}]   ;;  %s3401_s8 = inlined_call_operand.vmem [shape: f32[128,256], index: 8, kind: input, shape index: {}]   ;;  %s3402_s9 = inlined_call_operand.vmem [shape: f32[1,256], index: 9, kind: input, shape index: {}]   ;;  %s3403_s10 = inlined_call_operand.vmem [shape: f32[256,128], index: 10, kind: input, shape index: {}]   ;;  %s3404_s11 = inlined_call_operand.vmem [shape: f32[1,128], index: 11, kind: input, shape index: {}]   ;;  %s3405_s12 = inlined_call_operand.hbm [shape: f32[2,16,128], index: 12, kind: output, shape index: {}, may-alias: {0,12}]  }
   0x1   :  { %18 = vsyncpa [#allocation4], 0  ;;  %s2491_s21 = smov [#allocation2]   ;;  %s2443_s25 = scalar_lea.hbm %s3393_s0, 512 }
   0x2   :  { %s24_s22 = sshll.u32 %s2491_s21, 4  ;;  %p2444_p0 = scmp.ne.s32.totalorder %s3393_s0, %s2443_s25  ;;  %s25_s22 = int_to_ptr.vmem [resolvable:$true] %s24_s22 }
   0x3   :  { %p2447_p1 = scmp.lt.u32.totalorder %s2443_s25, %s3393_s0 }
   0x5   :  { %p2449_p2 = pnand %p2447_p1, %p2444_p0 }
   0x7   :  { %2452 = shalt.err (!%p2449_p2)
}
   0x8   :  { %s2453_s30 = scalar_lea.vmem %s25_s22, 512  ;;  %p2458_p4 = scmp.lt.s32.totalorder %s25_s22, %s25_s22 }
   0x9   :  { %p2454_p3 = scmp.ne.s32.totalorder %s25_s22, %s2453_s30  ;;  %p2459_p5 = scmp.lt.s32.totalorder %s2453_s30, %s2453_s30 }
   0xb   :  { %p2460_p6 = por %p2459_p5, %p2458_p4 }
   0xd   :  { %p2461_p7 = pnand %p2460_p6, %p2454_p3 }
   0xf   :  { %2464 = shalt.err (!%p2461_p7)
}
  0x10   :  { %s2492_s13 = smov 128   ;;  %s2493_s14 = smov 8  }
  0x11   :  { %30 = dma.hbm_to_vmem [thread:$0]  %s3393_s0, 512, %s25_s22, [#allocation3], %s2492_s13, %s2492_s13, %s2493_s14  }
  0x12   :  { %2487 = dma.done.wait [#allocation3], 512  }
  0x13   :  { %2488 = vsyncadd [#allocation3], 4294966784  ;;  %v56_v0 = vld [vmem:[#allocation2] sm:$0xff]  ;;  %v58_v1 = vld [vmem:[#allocation2 + $0x10] sm:$0xff]  ;;  %vm644_vm0 = vcmask 130048  }
  0x14   :  { %62 = vadd.xlane.f32.xlu0 %v56_v0  ;;  %66 = vadd.xlane.f32.xlu1 %v58_v1  ;;  %v2576_v2 = vld [vmem:[#allocation2 + $0x8] sm:$0xff]  ;;  %v2578_v3 = vld [vmem:[#allocation2 + $0x18] sm:$0xff]  ;;  %v127_v6 = vld [vmem:[%s3396_s3] sm:$0xff] }
  0x15   :  { %v128_v4 = vld [vmem:[%s3396_s3 + $0x8] sm:$0xff]  ;;  %v134_v5 = vld [vmem:[%s3396_s3 + $0x38] sm:$0xff]  ;;  %v133_v8 = vld [vmem:[%s3396_s3 + $0x30] sm:$0xff] }
  0x16   :  { %v2110_v7 = vpack.c.bf16 %v134_v5, %v128_v4  ;;  %v130_v9 = vld [vmem:[%s3396_s3 + $0x18] sm:$0xff]  ;;  %v136_v10 = vld [vmem:[%s3396_s3 + $0x48] sm:$0xff]  ;;  %v2112_v11 = vpack.c.bf16 %v133_v8, %v127_v6  ;;  %v129_v13 = vld [vmem:[%s3396_s3 + $0x10] sm:$0xff] }
  0x17   :  { %v2142_v12 = vpack.c.bf16 %v136_v10, %v130_v9  ;;  %v135_v14 = vld [vmem:[%s3396_s3 + $0x40] sm:$0xff]  ;;  %v140_v15 = vld [vmem:[%s3396_s3 + $0x68] sm:$0xff]  ;;  %v146_v17 = vld [vmem:[%s3396_s3 + $0x98] sm:$0xff] }
  0x18   :  { %64 = vadd.xlane.f32.xlu0 %v2576_v2  ;;  %68 = vadd.xlane.f32.xlu1 %v2578_v3  ;;  %v2144_v16 = vpack.c.bf16 %v135_v14, %v129_v13  ;;  %v139_v18 = vld [vmem:[%s3396_s3 + $0x60] sm:$0xff]  ;;  %v145_v19 = vld [vmem:[%s3396_s3 + $0x90] sm:$0xff]  ;;  %v2114_v20 = vpack.c.bf16 %v146_v17, %v140_v15  ;;  %v142_v22 = vld [vmem:[%s3396_s3 + $0x78] sm:$0xff] }
  0x19   :  { %2111 = vmatprep.subr.bf16.mxu0 %v2110_v7  ;;  %2143 = vmatprep.subr.bf16.mxu1 %v2142_v12  ;;  %v2116_v21 = vpack.c.bf16 %v145_v19, %v139_v18  ;;  %v148_v23 = vld [vmem:[%s3396_s3 + $0xa8] sm:$0xff]  ;;  %v141_v24 = vld [vmem:[%s3396_s3 + $0x70] sm:$0xff]  ;;  %v147_v26 = vld [vmem:[%s3396_s3 + $0xa0] sm:$0xff] }
  0x1a   :  { %2113 = vmatpush1.bf16.msra.mxu0 %v2112_v11  ;;  %2145 = vmatpush1.bf16.msra.mxu1 %v2144_v16  ;;  %v2146_v25 = vpack.c.bf16 %v148_v23, %v142_v22  ;;  %v152_v27 = vld [vmem:[%s3396_s3 + $0xc8] sm:$0xff]  ;;  %v158_v28 = vld [vmem:[%s3396_s3 + $0xf8] sm:$0xff]  ;;  %v2148_v29 = vpack.c.bf16 %v147_v26, %v141_v24  ;;  %v151_v31 = vld [vmem:[%s3396_s3 + $0xc0] sm:$0xff] }
  0x1b   :  { %2115 = vmatprep.subr.bf16.mxu0 %v2114_v20  ;;  %v2118_v30 = vpack.c.bf16 %v158_v28, %v152_v27  ;;  %v157_v32 = vld [vmem:[%s3396_s3 + $0xf0] sm:$0xff]  ;;  %v154_v33 = vld [vmem:[%s3396_s3 + $0xd8] sm:$0xff]  ;;  %v160_v34 = vld [vmem:[%s3396_s3 + $0x108] sm:$0xff] }
  0x1c   :  { %2147 = vmatprep.subr.bf16.mxu1 %v2146_v25  ;;  %v153_v35 = vld [vmem:[%s3396_s3 + $0xd0] sm:$0xff]  ;;  %v159_v36 = vld [vmem:[%s3396_s3 + $0x100] sm:$0xff]  ;;  %v2120_v37 = vpack.c.bf16 %v157_v32, %v151_v31  ;;  %v2150_v38 = vpack.c.bf16 %v160_v34, %v154_v33  ;;  %v164_v56 = vld [vmem:[%s3396_s3 + $0x128] sm:$0xff] }
  0x1d   :  { %v2152_v39 = vpack.c.bf16 %v159_v36, %v153_v35  ;;  %v170_v57 = vld [vmem:[%s3396_s3 + $0x158] sm:$0xff]  ;;  %v163_v59 = vld [vmem:[%s3396_s3 + $0x120] sm:$0xff]  ;;  %v169_v60 = vld [vmem:[%s3396_s3 + $0x150] sm:$0xff] }
  0x1e   :  { %2117 = vmatpush1.bf16.msra.mxu0 %v2116_v21  ;;  %2149 = vmatpush1.bf16.msra.mxu1 %v2148_v29  ;;  %v2122_v58 = vpack.c.bf16 %v170_v57, %v164_v56  ;;  %v166_v61 = vld [vmem:[%s3396_s3 + $0x138] sm:$0xff]  ;;  %v2124_v62 = vpack.c.bf16 %v169_v60, %v163_v59  ;;  %v172_v63 = vld [vmem:[%s3396_s3 + $0x168] sm:$0xff]  ;;  %v175_v7 = vld [vmem:[%s3396_s3 + $0x180] sm:$0xff] }
  0x1f   :  { %2119 = vmatprep.subr.bf16.mxu0 %v2118_v30  ;;  %2151 = vmatprep.subr.bf16.mxu1 %v2150_v38  ;;  %v176_v4 = vld [vmem:[%s3396_s3 + $0x188] sm:$0xff]  ;;  %v182_v5 = vld [vmem:[%s3396_s3 + $0x1b8] sm:$0xff]  ;;  %v181_v8 = vld [vmem:[%s3396_s3 + $0x1b0] sm:$0xff] }
  0x20   :  { %v2126_v6 = vpack.c.bf16 %v182_v5, %v176_v4  ;;  %v178_v9 = vld [vmem:[%s3396_s3 + $0x198] sm:$0xff]  ;;  %v2128_v10 = vpack.c.bf16 %v181_v8, %v175_v7  ;;  %v184_v11 = vld [vmem:[%s3396_s3 + $0x1c8] sm:$0xff]  ;;  %v177_v12 = vld [vmem:[%s3396_s3 + $0x190] sm:$0xff] }
  0x21   :  { %v183_v13 = vld [vmem:[%s3396_s3 + $0x1c0] sm:$0xff]  ;;  %v2158_v14 = vpack.c.bf16 %v184_v11, %v178_v9  ;;  %v188_v16 = vld [vmem:[%s3396_s3 + $0x1e8] sm:$0xff]  ;;  %v194_v17 = vld [vmem:[%s3396_s3 + $0x218] sm:$0xff] }
  0x22   :  { %2121 = vmatpush1.bf16.msra.mxu0 %v2120_v37  ;;  %2153 = vmatpush1.bf16.msra.mxu1 %v2152_v39  ;;  %v2160_v15 = vpack.c.bf16 %v183_v13, %v177_v12  ;;  %v2130_v18 = vpack.c.bf16 %v194_v17, %v188_v16  ;;  %v187_v19 = vld [vmem:[%s3396_s3 + $0x1e0] sm:$0xff]  ;;  %v193_v20 = vld [vmem:[%s3396_s3 + $0x210] sm:$0xff]  ;;  %v190_v21 = vld [vmem:[%s3396_s3 + $0x1f8] sm:$0xff] }
  0x23   :  { %2123 = vmatprep.subr.bf16.mxu0 %v2122_v58  ;;  %v2132_v22 = vpack.c.bf16 %v193_v20, %v187_v19  ;;  %v196_v23 = vld [vmem:[%s3396_s3 + $0x228] sm:$0xff]  ;;  %v189_v24 = vld [vmem:[%s3396_s3 + $0x1f0] sm:$0xff]  ;;  %v195_v25 = vld [vmem:[%s3396_s3 + $0x220] sm:$0xff] }
  0x24   :  { %v2162_v26 = vpack.c.bf16 %v196_v23, %v190_v21  ;;  %v2164_v27 = vpack.c.bf16 %v195_v25, %v189_v24  ;;  %v200_v28 = vld [vmem:[%s3396_s3 + $0x248] sm:$0xff]  ;;  %v206_v29 = vld [vmem:[%s3396_s3 + $0x278] sm:$0xff]  ;;  %v199_v31 = vld [vmem:[%s3396_s3 + $0x240] sm:$0xff] }
  0x25   :  { %v2134_v30 = vpack.c.bf16 %v206_v29, %v200_v28  ;;  %v205_v32 = vld [vmem:[%s3396_s3 + $0x270] sm:$0xff]  ;;  %v202_v33 = vld [vmem:[%s3396_s3 + $0x258] sm:$0xff]  ;;  %v208_v35 = vld [vmem:[%s3396_s3 + $0x288] sm:$0xff] }
  0x26   :  { %2125 = vmatpush1.bf16.msra.mxu0 %v2124_v62  ;;  %v2136_v34 = vpack.c.bf16 %v205_v32, %v199_v31  ;;  %v201_v36 = vld [vmem:[%s3396_s3 + $0x250] sm:$0xff]  ;;  %v207_v37 = vld [vmem:[%s3396_s3 + $0x280] sm:$0xff]  ;;  %v2166_v38 = vpack.c.bf16 %v208_v35, %v202_v33  ;;  %v132_v56 = vld [vmem:[%s3396_s3 + $0x28] sm:$0xff] }
  0x27   :  { %2127 = vmatprep.subr.bf16.mxu0 %v2126_v6  ;;  %v2168_v39 = vpack.c.bf16 %v207_v37, %v201_v36  ;;  %v138_v58 = vld [vmem:[%s3396_s3 + $0x58] sm:$0xff]  ;;  %v1848_v9 = vld [vmem:[%s3394_s1] ss:$0 sm:$0xff]  ;;  %v137_v12 = vld [vmem:[%s3396_s3 + $0x50] sm:$0xff] }
  0x28   :  { %v2174_v59 = vpack.c.bf16 %v138_v58, %v132_v56  ;;  %v131_v11 = vld [vmem:[%s3396_s3 + $0x20] sm:$0xff]  ;;  %v149_v23 = vld [vmem:[%s3396_s3 + $0xb0] sm:$0xff]  ;;  %v156_v24 = vld [vmem:[%s3396_s3 + $0xe8] sm:$0xff] }
  0x29   :  { %v1849_v13 = vld [vmem:[%s3395_s2] ss:$0 sm:$0xff]  ;;  %v2176_v17 = vpack.c.bf16 %v137_v12, %v131_v11  ;;  %v162_v25 = vld [vmem:[%s3396_s3 + $0x118] sm:$0xff]  ;;  %v161_v32 = vld [vmem:[%s3396_s3 + $0x110] sm:$0xff] }
  0x2a   :  { %2129 = vmatpush1.bf16.msra.mxu0 %v2128_v10  ;;  %v2182_v29 = vpack.c.bf16 %v162_v25, %v156_v24  ;;  %v174_v35 = vld [vmem:[%s3396_s3 + $0x178] sm:$0xff]  ;;  %v197_v58 = vld [vmem:[%s3396_s3 + $0x230] sm:$0xff] }
  0x2b   :  { %2131 = vmatprep.subr.bf16.mxu0 %v2130_v18  ;;  %v143_v18 = vld [vmem:[%s3396_s3 + $0x80] sm:$0xff] }
  0x2c   :  { %v2180_v28 = vpack.c.bf16 %v149_v23, %v143_v18 }
  0x2e   :  { %2133 = vmatpush1.bf16.msra.mxu0 %v2132_v22 }
  0x2f   :  { %2135 = vmatprep.subr.bf16.mxu0 %v2134_v30 }
  0x32   :  { %2137 = vmatpush1.bf16.msra.mxu0 %v2136_v34  ;;  %v168_v34 = vld [vmem:[%s3396_s3 + $0x148] sm:$0xff] }
  0x33   :  { %v2186_v37 = vpack.c.bf16 %v174_v35, %v168_v34 }
  0xa1   :  { %v63_v40 = vpop.xlane.xlu0 %62  ;;  %v67_v41 = vpop.xlane.xlu1 %66 }
  0xa2   :  { %v71_v42 = vmul.f32 0.0078125, %v63_v40  ;;  %v73_v43 = vmul.f32 0.0078125, %v67_v41  ;;  %v212_v40 = vld [vmem:[%s3396_s3 + $0x2a8] sm:$0xff]  ;;  %v218_v41 = vld [vmem:[%s3396_s3 + $0x2d8] sm:$0xff] }
  0xa4   :  { %v2654_v44 = vsub.f32 %v56_v0, %v71_v42  ;;  %v2656_v45 = vsub.f32 %v58_v1, %v73_v43  ;;  %v165_v0 = vld [vmem:[%s3396_s3 + $0x130] sm:$0xff]  ;;  %v171_v1 = vld [vmem:[%s3396_s3 + $0x160] sm:$0xff]  ;;  %v2494_v43 = vmov 0.0  }
  0xa5   :  { %v65_v46 = vpop.xlane.xlu0 %64  ;;  %v69_v47 = vpop.xlane.xlu1 %68  ;;  %v211_v42 = vld [vmem:[%s3396_s3 + $0x2a0] sm:$0xff]  ;;  %287 = vmatprep.mubr.f32.mxu0 %v2494_v43  ;;  %376 = vmatprep.mubr.f32.mxu1 %v2494_v43 }
  0xa6   :  { %v72_v48 = vmul.f32 0.0078125, %v65_v46  ;;  %v79_v49 = vmul.f32 %v2654_v44, %v2654_v44  ;;  %v74_v50 = vmul.f32 0.0078125, %v69_v47  ;;  %v81_v53 = vmul.f32 %v2656_v45, %v2656_v45  ;;  %v217_v47 = vld [vmem:[%s3396_s3 + $0x2d0] sm:$0xff] }
  0xa7   :  { %v2138_v46 = vpack.c.bf16 %v218_v41, %v212_v40  ;;  %v173_v40 = vld [vmem:[%s3396_s3 + $0x170] sm:$0xff]  ;;  %v180_v41 = vld [vmem:[%s3396_s3 + $0x1a8] sm:$0xff] }
  0xa8   :  { %v2661_v51 = vsub.f32 %v2576_v2, %v72_v48  ;;  %83 = vadd.xlane.f32.xlu0 %v79_v49  ;;  %v2664_v52 = vsub.f32 %v2578_v3, %v74_v50  ;;  %v2154_v2 = vpack.c.bf16 %v172_v63, %v166_v61  ;;  %v2156_v3 = vpack.c.bf16 %v171_v1, %v165_v0  ;;  %v214_v48 = vld [vmem:[%s3396_s3 + $0x2b8] sm:$0xff]  ;;  %v220_v49 = vld [vmem:[%s3396_s3 + $0x2e8] sm:$0xff] }
  0xa9   :  { %v2140_v50 = vpack.c.bf16 %v217_v47, %v211_v42  ;;  %2139 = vmatprep.subr.bf16.mxu0 %v2138_v46  ;;  %v186_v42 = vld [vmem:[%s3396_s3 + $0x1d8] sm:$0xff] }
  0xaa   :  { %v80_v54 = vmul.f32 %v2661_v51, %v2661_v51  ;;  %v82_v55 = vmul.f32 %v2664_v52, %v2664_v52  ;;  %2155 = vmatprep.subr.bf16.mxu1 %v2154_v2 }
  0xab   :  { %2157 = vmatpush1.bf16.msra.mxu1 %v2156_v3  ;;  %2141 = vmatpush1.bf16.msra.mxu0 %v2140_v50  ;;  %v185_v50 = vld [vmem:[%s3396_s3 + $0x1d0] sm:$0xff] }
  0xac   :  { %87 = vadd.xlane.f32.xlu0 %v81_v53  ;;  %85 = vadd.xlane.f32.xlu1 %v80_v54  ;;  %v2170_v53 = vpack.c.bf16 %v220_v49, %v214_v48  ;;  %v213_v54 = vld [vmem:[%s3396_s3 + $0x2b0] sm:$0xff]  ;;  %v2190_v48 = vpack.c.bf16 %v186_v42, %v180_v41  ;;  %v179_v49 = vld [vmem:[%s3396_s3 + $0x1a0] sm:$0xff] }
  0xad   :  { %2159 = vmatprep.subr.bf16.mxu1 %v2158_v14  ;;  %2175 = vmatprep.subr.bf16.mxu0 %v2174_v59  ;;  %v144_v14 = vld [vmem:[%s3396_s3 + $0x88] sm:$0xff] }
  0xae   :  { %v204_v59 = vld [vmem:[%s3396_s3 + $0x268] sm:$0xff] }
  0xaf   :  { %2161 = vmatpush1.bf16.msra.mxu1 %v2160_v15 }
  0xb0   :  { %89 = vadd.xlane.f32.xlu1 %v82_v55  ;;  %2163 = vmatprep.subr.bf16.mxu1 %v2162_v26  ;;  %v219_v55 = vld [vmem:[%s3396_s3 + $0x2e0] sm:$0xff] }
  0xb1   :  { %v2172_v57 = vpack.c.bf16 %v219_v55, %v213_v54  ;;  %v198_v54 = vld [vmem:[%s3396_s3 + $0x238] sm:$0xff]  ;;  %v2192_v55 = vpack.c.bf16 %v185_v50, %v179_v49 }
  0xb3   :  { %2165 = vmatpush1.bf16.msra.mxu1 %v2164_v27 }
  0xb4   :  { %2167 = vmatprep.subr.bf16.mxu1 %v2166_v38 }
  0xb7   :  { %2169 = vmatpush1.bf16.msra.mxu1 %v2168_v39  ;;  %v167_v39 = vld [vmem:[%s3396_s3 + $0x140] sm:$0xff] }
  0xb8   :  { %2171 = vmatprep.subr.bf16.mxu1 %v2170_v53  ;;  %v2188_v46 = vpack.c.bf16 %v173_v40, %v167_v39  ;;  %v192_v53 = vld [vmem:[%s3396_s3 + $0x208] sm:$0xff] }
  0xb9   :  { %v2194_v56 = vpack.c.bf16 %v198_v54, %v192_v53 }
  0xbb   :  { %2173 = vmatpush1.bf16.msra.mxu1 %v2172_v57  ;;  %v191_v57 = vld [vmem:[%s3396_s3 + $0x200] sm:$0xff] }
 0x135   :  { %v84_v60 = vpop.xlane.xlu0 %83 }
 0x136   :  { %v91_v61 = vmul.f32 0.0078125, %v84_v60  ;;  %v210_v60 = vld [vmem:[%s3396_s3 + $0x298] sm:$0xff] }
 0x138   :  { %v95_v62 = vadd.f32 1e-05, %v91_v61  ;;  %v2196_v61 = vpack.c.bf16 %v197_v58, %v191_v57 }
 0x139   :  { %v86_v63 = vpop.xlane.xlu1 %85  ;;  %v88_v0 = vpop.xlane.xlu0 %87 }
 0x13a   :  { %2375 = vrsqrt.f32 %v95_v62  ;;  %v92_v1 = vmul.f32 0.0078125, %v86_v63  ;;  %v93_v2 = vmul.f32 0.0078125, %v88_v0  ;;  %v2198_v62 = vpack.c.bf16 %v210_v60, %v204_v59  ;;  %v203_v63 = vld [vmem:[%s3396_s3 + $0x260] sm:$0xff]  ;;  %v209_v0 = vld [vmem:[%s3396_s3 + $0x290] sm:$0xff] }
 0x13c   :  { %v96_v3 = vadd.f32 1e-05, %v92_v1  ;;  %v97_v4 = vadd.f32 1e-05, %v93_v2  ;;  %v216_v1 = vld [vmem:[%s3396_s3 + $0x2c8] sm:$0xff]  ;;  %v222_v2 = vld [vmem:[%s3396_s3 + $0x2f8] sm:$0xff] }
 0x13d   :  { %v90_v5 = vpop.xlane.xlu1 %89 }
 0x13e   :  { %2377 = vrsqrt.f32 %v96_v3  ;;  %v94_v6 = vmul.f32 0.0078125, %v90_v5  ;;  %v2200_v3 = vpack.c.bf16 %v209_v0, %v203_v63  ;;  %v215_v5 = vld [vmem:[%s3396_s3 + $0x2c0] sm:$0xff] }
 0x13f   :  { %2379 = vrsqrt.f32 %v97_v4  ;;  %v2202_v4 = vpack.c.bf16 %v222_v2, %v216_v1 }
 0x140   :  { %v98_v7 = vadd.f32 1e-05, %v94_v6  ;;  %v221_v6 = vld [vmem:[%s3396_s3 + $0x2f0] sm:$0xff] }
 0x142   :  { %2381 = vrsqrt.f32 %v98_v7  ;;  %v2204_v7 = vpack.c.bf16 %v221_v6, %v215_v5 }
 0x144   :  { %v2376_v8 = vpop.eup %2375 }
 0x145   :  { %v103_v10 = vmul.f32 %v2376_v8, %v2654_v44  ;;  %v150_v44 = vld [vmem:[%s3396_s3 + $0xb8] sm:$0xff] }
 0x146   :  { %v2178_v21 = vpack.c.bf16 %v150_v44, %v144_v14 }
 0x147   :  { %v113_v15 = vmul.f32 %v1848_v9, %v103_v10 }
 0x148   :  { %v2378_v16 = vpop.eup %2377 }
 0x149   :  { %v2380_v19 = vpop.eup %2379  ;;  %v2822_v20 = vadd.f32 %v1849_v13, %v113_v15  ;;  %v104_v22 = vmul.f32 %v2378_v16, %v2661_v51 }
 0x14a   :  { %v105_v26 = vmul.f32 %v2380_v19, %v2656_v45  ;;  %v155_v45 = vld [vmem:[%s3396_s3 + $0xe0] sm:$0xff] }
 0x14b   :  { %288 = vmatmul.mubr.f32.vlgmr.msra.gmra.mrb[0].mxu0 %v2822_v20  ;;  %377 = vmatmul.mubr.f32.vlgmr.msra.gmra.mrb[0].mxu1 %v2822_v20  ;;  %v114_v27 = vmul.f32 %v1848_v9, %v104_v22  ;;  %v2184_v36 = vpack.c.bf16 %v161_v32, %v155_v45 }
 0x14c   :  { %v2382_v51 = vpop.eup %2381  ;;  %2177 = vmatpush1.bf16.msra.mxu0 %v2176_v17  ;;  %293 = vmatprep.mubr.f32.mxu0 %v2494_v43  ;;  %v115_v31 = vmul.f32 %v1848_v9, %v105_v26 }
 0x14d   :  { %382 = vmatprep.mubr.f32.mxu1 %v2494_v43  ;;  %2179 = vmatprep.subr.bf16.mxu0 %v2178_v21  ;;  %v2839_v30 = vadd.f32 %v1849_v13, %v114_v27  ;;  %v106_v33 = vmul.f32 %v2382_v51, %v2664_v52 }
 0x14e   :  { %v125_v52 = vadd.f32 %v1849_v13, %v115_v31 }
 0x14f   :  { %294 = vmatmul.mubr.f32.gmra.mrb[2].mxu0 %v2839_v30  ;;  %383 = vmatmul.mubr.f32.gmra.mrb[2].mxu1 %v2839_v30  ;;  %v116_v38 = vmul.f32 %v1848_v9, %v106_v33 }
 0x150   :  { %2181 = vmatpush1.bf16.msra.mxu0 %v2180_v28  ;;  %299 = vmatprep.mubr.f32.mxu0 %v2494_v43 }
 0x151   :  { %388 = vmatprep.mubr.f32.mxu1 %v2494_v43  ;;  %2183 = vmatprep.subr.bf16.mxu0 %v2182_v29  ;;  %v126_v47 = vadd.f32 %v1849_v13, %v116_v38 }
 0x153   :  { %300 = vmatmul.mubr.f32.gmra.mrb[4].mxu0 %v125_v52  ;;  %389 = vmatmul.mubr.f32.gmra.mrb[4].mxu1 %v125_v52 }
 0x154   :  { %2185 = vmatpush1.bf16.msra.mxu0 %v2184_v36  ;;  %305 = vmatprep.mubr.f32.mxu0 %v2494_v43 }
 0x155   :  { %394 = vmatprep.mubr.f32.mxu1 %v2494_v43  ;;  %2187 = vmatprep.subr.bf16.mxu0 %v2186_v37 }
 0x157   :  { %306 = vmatmul.mubr.f32.gmra.mrb[6].mxu0 %v126_v47  ;;  %395 = vmatmul.mubr.f32.gmra.mrb[6].mxu1 %v126_v47 }
 0x158   :  { %2189 = vmatpush1.bf16.msra.mxu0 %v2188_v46  ;;  %465 = vmatprep.mubr.f32.mxu0 %v2494_v43 }
 0x159   :  { %2191 = vmatprep.subr.bf16.mxu0 %v2190_v48 }
 0x15c   :  { %2193 = vmatpush1.bf16.msra.mxu0 %v2192_v55 }
 0x15d   :  { %2195 = vmatprep.subr.bf16.mxu0 %v2194_v56 }
 0x160   :  { %2197 = vmatpush1.bf16.msra.mxu0 %v2196_v61 }
 0x161   :  { %2199 = vmatprep.subr.bf16.mxu0 %v2198_v62 }
 0x164   :  { %2201 = vmatpush1.bf16.msra.mxu0 %v2200_v3 }
 0x165   :  { %2203 = vmatprep.subr.bf16.mxu0 %v2202_v4 }
 0x168   :  { %2205 = vmatpush1.bf16.msra.mxu0 %v2204_v7 }
 0x16b   :  { %466 = vmatmul.mubr.f32.vlgmr.msra.gmra.mrb[8].mxu0 %v2822_v20 }
 0x16c   :  { %471 = vmatprep.mubr.f32.mxu0 %v2494_v43 }
 0x16f   :  { %472 = vmatmul.mubr.f32.gmra.mrb[10].mxu0 %v2839_v30 }
 0x170   :  { %477 = vmatprep.mubr.f32.mxu0 %v2494_v43 }
 0x173   :  { %478 = vmatmul.mubr.f32.gmra.mrb[12].mxu0 %v125_v52 }
 0x174   :  { %483 = vmatprep.mubr.f32.mxu0 %v2494_v43 }
 0x177   :  { %484 = vmatmul.mubr.f32.gmra.mrb[14].mxu0 %v126_v47 }
 0x21e   :  { %v289_v8 = vpop.f32.mrb[0].mxu0  ;;  %v378_v9 = vpop.f32.mrb[0].mxu1 }
 0x21f   :  { %v490_v10 = vmul.f32 0.088388346, %v289_v8  ;;  %v2920_v11 = vpop.f32.mrb[1].mxu0  ;;  %v380_v12 = vpop.f32.mrb[1].mxu1 }
 0x221   :  { %1982 = vmatprep.mubr.f32.mxu1 %v490_v10 }
 0x222   :  { %v295_v13 = vpop.f32.mrb[2].mxu0  ;;  %v384_v14 = vpop.f32.mrb[2].mxu1 }
 0x223   :  { %v2206_v44 = vpack.c.bf16 %v384_v14, %v378_v9  ;;  %v2922_v15 = vpop.f32.mrb[3].mxu0  ;;  %v386_v16 = vpop.f32.mrb[3].mxu1  ;;  %v491_v25 = vmul.f32 0.088388346, %v295_v13  ;;  %v867_v9 = vmul.f32 0.088388346, %v2920_v11 }
 0x224   :  { %v2924_v17 = vpack.c.bf16 %v386_v16, %v380_v12  ;;  %v868_v10 = vmul.f32 0.088388346, %v2922_v15 }
 0x225   :  { %2207 = vmatprep.subr.bf16.mxu1 %v2206_v44 }
 0x226   :  { %v301_v18 = vpop.f32.mrb[4].mxu0  ;;  %v390_v19 = vpop.f32.mrb[4].mxu1  ;;  %2209 = vmatpush3.bf16.xpose.msra.mxu1 %v2206_v44 }
 0x227   :  { %v303_v20 = vpop.f32.mrb[5].mxu0  ;;  %v392_v21 = vpop.f32.mrb[5].mxu1  ;;  %v492_v28 = vmul.f32 0.088388346, %v301_v18 }
 0x228   :  { %v869_v22 = vmul.f32 0.088388346, %v303_v20 }
 0x22a   :  { %v307_v23 = vpop.f32.mrb[6].mxu0  ;;  %v396_v24 = vpop.f32.mrb[6].mxu1  ;;  %2017 = vmatprep.mubr.f32.mxu0 %v869_v22 }
 0x22b   :  { %v2210_v26 = vpack.c.bf16 %v396_v24, %v390_v19  ;;  %v309_v27 = vpop.f32.mrb[7].mxu0  ;;  %v398_v51 = vpop.f32.mrb[7].mxu1  ;;  %v493_v30 = vmul.f32 0.088388346, %v307_v23 }
 0x22c   :  { %v2226_v29 = vpack.c.bf16 %v398_v51, %v392_v21  ;;  %v870_v31 = vmul.f32 0.088388346, %v309_v27 }
 0x22d   :  { %1983 = vmatmul.mubr.f32.vlgmr.msra.gmra.mrb[8].mxu1 %v491_v25  ;;  %2211 = vmatprep.subr.bf16.mxu1 %v2210_v26 }
 0x22e   :  { %2213 = vmatpush3.bf16.xpose.msra.mxu1 %v2210_v26  ;;  %1989 = vmatprep.mubr.f32.mxu1 %v492_v28 }
 0x22f   :  { %2227 = vmatprep.subr.bf16.mxu0 %v2226_v29 }
 0x230   :  { %2229 = vmatpush3.bf16.xpose.msra.mxu0 %v2226_v29 }
 0x235   :  { %1990 = vmatmul.mubr.f32.vlgmr.msra.gmra.mrb[10].mxu1 %v493_v30 }
 0x237   :  { %2018 = vmatmul.mubr.f32.vlgmr.msra.gmra.mrb[16].mxu0 %v870_v31 }
 0x23e   :  { %v467_v45 = vpop.f32.mrb[8].mxu0 }
 0x23f   :  { %v469_v32 = vpop.f32.mrb[9].mxu0 }
 0x242   :  { %v473_v33 = vpop.f32.mrb[10].mxu0 }
 0x243   :  { %v2214_v34 = vpack.c.bf16 %v473_v33, %v467_v45  ;;  %v475_v35 = vpop.f32.mrb[11].mxu0 }
 0x244   :  { %v2230_v36 = vpack.c.bf16 %v475_v35, %v469_v32 }
 0x245   :  { %2215 = vmatprep.subr.bf16.mxu1 %v2214_v34 }
 0x246   :  { %v479_v52 = vpop.f32.mrb[12].mxu0  ;;  %2217 = vmatpush3.bf16.msra.mxu1 %v2214_v34  ;;  %2231 = vmatprep.subr.bf16.mxu0 %v2230_v36 }
 0x247   :  { %v481_v37 = vpop.f32.mrb[13].mxu0  ;;  %2233 = vmatpush3.bf16.msra.mxu0 %v2230_v36 }
 0x24a   :  { %v485_v38 = vpop.f32.mrb[14].mxu0 }
 0x24b   :  { %v2218_v39 = vpack.c.bf16 %v485_v38, %v479_v52  ;;  %v487_v40 = vpop.f32.mrb[15].mxu0 }
 0x24c   :  { %v2234_v41 = vpack.c.bf16 %v487_v40, %v481_v37 }
 0x24d   :  { %2219 = vmatprep.subr.bf16.mxu1 %v2218_v39 }
 0x300   :  { %v1984_v42 = vpop.f32.mrb[8].mxu1 }
 0x301   :  { %v560_v46 = vpop.f32.mrb[9].mxu1  ;;  %v648_v47 = vsel %vm644_vm0, %v1984_v42, -inf }
 0x302   :  { %649 = vmax.xlane.f32.xlu1 %v648_v47  ;;  %v645_v48 = vsel %vm644_vm0, %v560_v46, -inf }
 0x303   :  { %646 = vmax.xlane.f32.xlu0 %v645_v48  ;;  %v1230_v48 = vld [vmem:[%s3397_s4 + $0x98] sm:$0xff] }
 0x308   :  { %v1991_v49 = vpop.f32.mrb[10].mxu1 }
 0x309   :  { %v635_v50 = vpop.f32.mrb[11].mxu1  ;;  %v654_v53 = vsel %vm644_vm0, %v1991_v49, -inf }
 0x30a   :  { %v2929_v54 = vpop.f32.mrb[16].mxu0  ;;  %655 = vmax.xlane.f32.xlu1 %v654_v53  ;;  %v651_v55 = vsel %vm644_vm0, %v635_v50, -inf  ;;  %v1232_v53 = vld [vmem:[%s3397_s4 + $0xa8] sm:$0xff] }
 0x30b   :  { %v1012_v56 = vpop.f32.mrb[17].mxu0  ;;  %652 = vmax.xlane.f32.xlu0 %v651_v55  ;;  %v1030_v15 = vsel %vm644_vm0, %v2929_v54, -inf  ;;  %v1233_v55 = vld [vmem:[%s3397_s4 + $0xb0] sm:$0xff] }
 0x30c   :  { %v1027_v19 = vsel %vm644_vm0, %v1012_v56, -inf }
 0x38f   :  { %v650_v57 = vpop.xlane.xlu1 %649 }
 0x390   :  { %v658_v58 = vsub.f32 %v1984_v42, %v650_v57  ;;  %v647_v59 = vpop.xlane.xlu0 %646  ;;  %v1228_v42 = vld [vmem:[%s3397_s4 + $0x88] sm:$0xff] }
 0x391   :  { %v657_v60 = vsub.f32 %v560_v46, %v647_v59  ;;  %v1229_v46 = vld [vmem:[%s3397_s4 + $0x90] sm:$0xff]  ;;  %v1236_v59 = vld [vmem:[%s3397_s4 + $0xc8] sm:$0xff] }
 0x392   :  { %v663_v61 = vmul.f32 1.442695, %v658_v58  ;;  %v1235_v58 = vld [vmem:[%s3397_s4 + $0xc0] sm:$0xff] }
 0x393   :  { %v661_v62 = vmul.f32 1.442695, %v657_v60  ;;  %v2254_v60 = vpack.c.bf16 %v1236_v59, %v1235_v58 }
 0x395   :  { %2383 = vpow2.f32 %v661_v62  ;;  %v1238_v62 = vld [vmem:[%s3397_s4 + $0xd8] sm:$0xff] }
 0x396   :  { %2385 = vpow2.f32 %v663_v61  ;;  %v1237_v61 = vld [vmem:[%s3397_s4 + $0xd0] sm:$0xff] }
 0x397   :  { %v656_v63 = vpop.xlane.xlu1 %655 }
 0x398   :  { %v660_v0 = vsub.f32 %v1991_v49, %v656_v63  ;;  %v653_v1 = vpop.xlane.xlu0 %652  ;;  %v2242_v49 = vpack.c.bf16 %v1230_v48, %v1229_v46  ;;  %v2258_v63 = vpack.c.bf16 %v1238_v62, %v1237_v61  ;;  %v864_v48 = vld [vmem:[%s3397_s4 + $0x68] sm:$0xff]  ;;  %v1858_v62 = vld [vmem:[%s3398_s5] ss:$0 sm:$0xff] }
 0x399   :  { %v659_v2 = vsub.f32 %v635_v50, %v653_v1  ;;  %v1231_v50 = vld [vmem:[%s3397_s4 + $0xa0] sm:$0xff]  ;;  %v1240_v1 = vld [vmem:[%s3397_s4 + $0xe8] sm:$0xff] }
 0x39a   :  { %v667_v3 = vmul.f32 1.442695, %v660_v0  ;;  %v1239_v0 = vld [vmem:[%s3397_s4 + $0xe0] sm:$0xff] }
 0x39b   :  { %v665_v4 = vmul.f32 1.442695, %v659_v2  ;;  %v2262_v2 = vpack.c.bf16 %v1240_v1, %v1239_v0 }
 0x39d   :  { %2387 = vpow2.f32 %v665_v4  ;;  %v1242_v4 = vld [vmem:[%s3397_s4 + $0xf8] sm:$0xff] }
 0x39e   :  { %2389 = vpow2.f32 %v667_v3  ;;  %v1241_v3 = vld [vmem:[%s3397_s4 + $0xf0] sm:$0xff] }
 0x39f   :  { %v2932_v5 = vpop.eup %2383 }
 0x3a0   :  { %v2934_v6 = vpop.eup %2385  ;;  %1996 = vmatprep.mubr.msk.f32.mxu1 %vm644_vm0, %v2932_v5  ;;  %v669_v38 = vsel %vm644_vm0, %v2932_v5, 0.0  ;;  %v2266_v5 = vpack.c.bf16 %v1242_v4, %v1241_v3  ;;  %v2439_v3 = vld [vmem:[#allocation2 + $0x8] sm:$0xff] }
 0x3a1   :  { %1997 = vmatmul.mubr.msk.f32.vlgmr.msra.gmra.mrb[12].mxu1 %vm644_vm0, %v2934_v6  ;;  %v672_v37 = vsel %vm644_vm0, %v2934_v6, 0.0  ;;  %v851_v6 = vld [vmem:[%s3397_s4] sm:$0xff] }
 0x3a2   :  { %2221 = vmatpush3.bf16.msra.mxu1 %v2218_v39 }
 0x3a3   :  { %2223 = vmatprep.subr.bf16.mxu1 %v2924_v17 }
 0x3a7   :  { %v2941_v7 = vpop.eup %2387 }
 0x3a8   :  { %v2390_v8 = vpop.eup %2389  ;;  %2003 = vmatprep.mubr.msk.f32.mxu1 %vm644_vm0, %v2941_v7  ;;  %v675_v40 = vsel %vm644_vm0, %v2941_v7, 0.0  ;;  %v852_v7 = vld [vmem:[%s3397_s4 + $0x8] sm:$0xff] }
 0x3a9   :  { %2004 = vmatmul.mubr.msk.f32.vlgmr.msra.gmra.mrb[14].mxu1 %vm644_vm0, %v2390_v8  ;;  %v678_v39 = vsel %vm644_vm0, %v2390_v8, 0.0  ;;  %v2270_v8 = vpack.c.bf16 %v852_v7, %v851_v6 }
 0x3aa   :  { %2010 = vmatprep.mubr.f32.mxu1 %v867_v9 }
 0x3ab   :  { %2225 = vmatpush3.bf16.xpose.msra.mxu1 %v2924_v17 }
 0x3ac   :  { %2235 = vmatprep.subr.bf16.mxu1 %v2234_v41 }
 0x3b2   :  { %2011 = vmatmul.mubr.f32.vlgmr.msra.gmra.mrb[16].mxu1 %v868_v10 }
 0x3b3   :  { %2237 = vmatpush3.bf16.msra.mxu1 %v2234_v41  ;;  %v1227_v41 = vld [vmem:[%s3397_s4 + $0x80] sm:$0xff] }
 0x3b4   :  { %v2238_v47 = vpack.c.bf16 %v1228_v42, %v1227_v41 }
 0x3b6   :  { %2239 = vmatprep.subr.bf16.mxu0 %v2238_v47 }
 0x474   :  { %v2949_v12 = vpop.f32.mrb[12].mxu1 }
 0x475   :  { %v2951_v13 = vpop.f32.mrb[13].mxu1 }
 0x47c   :  { %v2953_v14 = vpop.f32.mrb[14].mxu1 }
 0x47d   :  { %v2955_v11 = vpop.f32.mrb[15].mxu1 }
 0x485   :  { %v2012_v44 = vpop.f32.mrb[16].mxu1 }
 0x486   :  { %v937_v16 = vpop.f32.mrb[17].mxu1  ;;  %v1024_v18 = vsel %vm644_vm0, %v2012_v44, -inf }
 0x487   :  { %1025 = vmax.xlane.f32.xlu1 %v1024_v18  ;;  %v1021_v17 = vsel %vm644_vm0, %v937_v16, -inf }
 0x488   :  { %1022 = vmax.xlane.f32.xlu0 %v1021_v17 }
 0x48b   :  { %1031 = vmax.xlane.f32.xlu1 %v1030_v15  ;;  %v853_v15 = vld [vmem:[%s3397_s4 + $0x10] sm:$0xff] }
 0x48c   :  { %1028 = vmax.xlane.f32.xlu0 %v1027_v19  ;;  %v854_v19 = vld [vmem:[%s3397_s4 + $0x18] sm:$0xff] }
 0x514   :  { %v1026_v20 = vpop.xlane.xlu1 %1025 }
 0x515   :  { %v1034_v21 = vsub.f32 %v2012_v44, %v1026_v20  ;;  %v1023_v22 = vpop.xlane.xlu0 %1022 }
 0x516   :  { %v1033_v23 = vsub.f32 %v937_v16, %v1023_v22 }
 0x517   :  { %v1039_v24 = vmul.f32 1.442695, %v1034_v21 }
 0x518   :  { %v1037_v25 = vmul.f32 1.442695, %v1033_v23  ;;  %v1032_v26 = vpop.xlane.xlu1 %1031 }
 0x519   :  { %2391 = vpow2.f32 %v1039_v24  ;;  %v1036_v27 = vsub.f32 %v2929_v54, %v1032_v26  ;;  %v1029_v51 = vpop.xlane.xlu0 %1028  ;;  %v2246_v54 = vpack.c.bf16 %v1232_v53, %v1231_v50  ;;  %v865_v53 = vld [vmem:[%s3397_s4 + $0x70] sm:$0xff] }
 0x51a   :  { %2393 = vpow2.f32 %v1037_v25  ;;  %v1035_v28 = vsub.f32 %v1012_v56, %v1029_v51  ;;  %v1234_v56 = vld [vmem:[%s3397_s4 + $0xb8] sm:$0xff]  ;;  %v2274_v25 = vpack.c.bf16 %v854_v19, %v853_v15  ;;  %v855_v51 = vld [vmem:[%s3397_s4 + $0x20] sm:$0xff]  ;;  %v1496_v19 = vld [vmem:[%s3401_s8 + $0x10] sm:$0xff] }
 0x51b   :  { %v1043_v29 = vmul.f32 1.442695, %v1036_v27  ;;  %v2250_v57 = vpack.c.bf16 %v1234_v56, %v1233_v55 }
 0x51c   :  { %v1041_v30 = vmul.f32 1.442695, %v1035_v28  ;;  %v856_v28 = vld [vmem:[%s3397_s4 + $0x28] sm:$0xff] }
 0x51d   :  { %2395 = vpow2.f32 %v1043_v29 }
 0x51e   :  { %2397 = vpow2.f32 %v1041_v30 }
 0x523   :  { %v2392_v31 = vpop.eup %2391 }
 0x524   :  { %v2394_v45 = vpop.eup %2393  ;;  %v1048_v32 = vsel %vm644_vm0, %v2392_v31, 0.0 }
 0x525   :  { %2024 = vmatprep.mubr.msk.f32.mxu0 %vm644_vm0, %v2394_v45  ;;  %1049 = vadd.xlane.f32.xlu1 %v1048_v32  ;;  %v1045_v33 = vsel %vm644_vm0, %v2394_v45, 0.0 }
 0x526   :  { %2025 = vmatmul.mubr.msk.f32.vlgmr.msra.gmra.mrb[18].mxu0 %vm644_vm0, %v2392_v31  ;;  %1046 = vadd.xlane.f32.xlu0 %v1045_v33  ;;  %v2278_v33 = vpack.c.bf16 %v856_v28, %v855_v51 }
 0x527   :  { %v2396_v34 = vpop.eup %2395  ;;  %2241 = vmatpush3.bf16.msra.mxu0 %v2238_v47  ;;  %v863_v47 = vld [vmem:[%s3397_s4 + $0x60] sm:$0xff] }
 0x528   :  { %v2398_v35 = vpop.eup %2397  ;;  %v1054_v36 = vsel %vm644_vm0, %v2396_v34, 0.0  ;;  %2243 = vmatprep.subr.bf16.mxu0 %v2242_v49  ;;  %v2294_v50 = vpack.c.bf16 %v864_v48, %v863_v47  ;;  %v1507_v48 = vld [vmem:[%s3401_s8 + $0x68] sm:$0xff] }
 0x529   :  { %1055 = vadd.xlane.f32.xlu1 %v1054_v36  ;;  %2031 = vmatprep.mubr.msk.f32.mxu1 %vm644_vm0, %v2398_v35  ;;  %v1051_v52 = vsel %vm644_vm0, %v2398_v35, 0.0  ;;  %v857_v35 = vld [vmem:[%s3397_s4 + $0x30] sm:$0xff]  ;;  %v858_v36 = vld [vmem:[%s3397_s4 + $0x38] sm:$0xff] }
 0x52a   :  { %2032 = vmatmul.mubr.msk.f32.vlgmr.msra.gmra.mrb[18].mxu1 %vm644_vm0, %v2396_v34  ;;  %1052 = vadd.xlane.f32.xlu0 %v1051_v52  ;;  %v2282_v52 = vpack.c.bf16 %v858_v36, %v857_v35 }
 0x52b   :  { %1602 = vmatprep.mubr.f32.mxu1 %v2494_v43  ;;  %2245 = vmatpush3.bf16.msra.mxu0 %v2242_v49 }
 0x52c   :  { %2247 = vmatprep.subr.bf16.mxu0 %v2246_v54 }
 0x52d   :  { %673 = vadd.xlane.f32.xlu1 %v672_v37  ;;  %v859_v37 = vld [vmem:[%s3397_s4 + $0x40] sm:$0xff] }
 0x52e   :  { %670 = vadd.xlane.f32.xlu0 %v669_v38 }
 0x52f   :  { %2249 = vmatpush3.bf16.msra.mxu0 %v2246_v54  ;;  %v866_v54 = vld [vmem:[%s3397_s4 + $0x78] sm:$0xff] }
 0x530   :  { %2251 = vmatprep.subr.bf16.mxu0 %v2250_v57  ;;  %v2298_v55 = vpack.c.bf16 %v866_v54, %v865_v53  ;;  %v1506_v53 = vld [vmem:[%s3401_s8 + $0x60] sm:$0xff]  ;;  %v1508_v54 = vld [vmem:[%s3401_s8 + $0x70] sm:$0xff] }
 0x531   :  { %679 = vadd.xlane.f32.xlu1 %v678_v39  ;;  %v861_v39 = vld [vmem:[%s3397_s4 + $0x50] sm:$0xff] }
 0x532   :  { %676 = vadd.xlane.f32.xlu0 %v675_v40  ;;  %v862_v40 = vld [vmem:[%s3397_s4 + $0x58] sm:$0xff] }
 0x533   :  { %2253 = vmatpush3.bf16.msra.mxu0 %v2250_v57  ;;  %v2290_v42 = vpack.c.bf16 %v862_v40, %v861_v39 }
 0x534   :  { %2255 = vmatprep.subr.bf16.mxu0 %v2254_v60 }
 0x537   :  { %2257 = vmatpush3.bf16.msra.mxu0 %v2254_v60 }
 0x538   :  { %2259 = vmatprep.subr.bf16.mxu0 %v2258_v63 }
 0x53b   :  { %2261 = vmatpush3.bf16.msra.mxu0 %v2258_v63 }
 0x53c   :  { %2263 = vmatprep.subr.bf16.mxu0 %v2262_v2 }
 0x53f   :  { %2265 = vmatpush3.bf16.msra.mxu0 %v2262_v2 }
 0x540   :  { %2267 = vmatprep.subr.bf16.mxu0 %v2266_v5 }
 0x543   :  { %2269 = vmatpush3.bf16.msra.mxu0 %v2266_v5 }
 0x544   :  { %2271 = vmatprep.subr.bf16.mxu0 %v2270_v8 }
 0x5b2   :  { %v1050_v44 = vpop.xlane.xlu1 %1049 }
 0x5b3   :  { %v1047_v9 = vpop.xlane.xlu0 %1046 }
 0x5b4   :  { %2399 = vrcp.f32 %v1047_v9 }
 0x5b5   :  { %2401 = vrcp.f32 %v1050_v44 }
 0x5b6   :  { %v1056_v18 = vpop.xlane.xlu1 %1055 }
 0x5b7   :  { %v1053_v10 = vpop.xlane.xlu0 %1052 }
 0x5b8   :  { %2403 = vrcp.f32 %v1053_v10  ;;  %v2442_v10 = vld [vmem:[#allocation2 + $0x10] sm:$0xff] }
 0x5ba   :  { %v674_v41 = vpop.xlane.xlu1 %673 }
 0x5bb   :  { %v671_v16 = vpop.xlane.xlu0 %670 }
 0x5bc   :  { %2405 = vrcp.f32 %v671_v16  ;;  %v1495_v16 = vld [vmem:[%s3401_s8 + $0x8] sm:$0xff] }
 0x5bd   :  { %2407 = vrcp.f32 %v1056_v18  ;;  %v1497_v18 = vld [vmem:[%s3401_s8 + $0x18] sm:$0xff] }
 0x5be   :  { %v2400_v20 = vpop.eup %2399  ;;  %2409 = vrcp.f32 %v674_v41  ;;  %v680_v49 = vpop.xlane.xlu1 %679  ;;  %v2302_v15 = vpack.c.bf16 %v1497_v18, %v1495_v16 }
 0x5bf   :  { %v2402_v22 = vpop.eup %2401  ;;  %v677_v46 = vpop.xlane.xlu0 %676 }
 0x5c0   :  { %2411 = vrcp.f32 %v677_v46  ;;  %2303 = vmatprep.subr.bf16.mxu1 %v2302_v15  ;;  %v1524_v15 = vld [vmem:[%s3401_s8 + $0xf0] sm:$0xff] }
 0x5c1   :  { %2413 = vrcp.f32 %v680_v49  ;;  %v1509_v49 = vld [vmem:[%s3401_s8 + $0x78] sm:$0xff] }
 0x5c2   :  { %v2404_v26 = vpop.eup %2403 }
 0x5c6   :  { %v2406_v29 = vpop.eup %2405 }
 0x5c7   :  { %v2408_v31 = vpop.eup %2407  ;;  %v847_v34 = vmul.f32 %v2406_v29, %v2951_v13  ;;  %v860_v13 = vld [vmem:[%s3397_s4 + $0x48] sm:$0xff]  ;;  %v1502_v29 = vld [vmem:[%s3401_s8 + $0x40] sm:$0xff] }
 0x5c8   :  { %v2286_v38 = vpack.c.bf16 %v860_v13, %v859_v37  ;;  %v2410_v56 = vpop.eup %2409 }
 0x5c9   :  { %v848_v58 = vmul.f32 %v2410_v56, %v2949_v12  ;;  %v2440_v12 = vld [vmem:[#allocation2] sm:$0xff]  ;;  %v1511_v56 = vld [vmem:[%s3401_s8 + $0x88] sm:$0xff] }
 0x5ca   :  { %v2412_v57 = vpop.eup %2411 }
 0x5cb   :  { %v2414_v59 = vpop.eup %2413  ;;  %v849_v60 = vmul.f32 %v2412_v57, %v2955_v11  ;;  %v1513_v57 = vld [vmem:[%s3401_s8 + $0x98] sm:$0xff] }
 0x5cc   :  { %v850_v61 = vmul.f32 %v2414_v59, %v2953_v14  ;;  %v1510_v59 = vld [vmem:[%s3401_s8 + $0x80] sm:$0xff] }
 0x5f9   :  { %v2026_v17 = vpop.f32.mrb[18].mxu0 }
 0x5fa   :  { %v1129_v21 = vpop.f32.mrb[19].mxu0  ;;  %v1224_v24 = vmul.f32 %v2402_v22, %v2026_v17  ;;  %v1494_v17 = vld [vmem:[%s3401_s8] sm:$0xff] }
 0x5fb   :  { %v1223_v23 = vmul.f32 %v2400_v20, %v1129_v21  ;;  %v1499_v20 = vld [vmem:[%s3401_s8 + $0x28] sm:$0xff]  ;;  %v1501_v21 = vld [vmem:[%s3401_s8 + $0x38] sm:$0xff]  ;;  %v2304_v22 = vpack.c.bf16 %v1496_v19, %v1494_v17  ;;  %v1522_v17 = vld [vmem:[%s3401_s8 + $0xe0] sm:$0xff] }
 0x5fc   :  { %v2332_v19 = vpack.c.bf16 %v1524_v15, %v1522_v17  ;;  %v1707_v17 = vld [vmem:[%s3403_s10 + $0x40] sm:$0xff]  ;;  %v1708_v15 = vld [vmem:[%s3403_s10 + $0x48] sm:$0xff] }
 0x5fd   :  { %v2033_v27 = vpop.f32.mrb[18].mxu1  ;;  %2066 = vmatprep.mubr.f32.mxu0 %v1223_v23  ;;  %v2306_v23 = vpack.c.bf16 %v1501_v21, %v1499_v20  ;;  %2305 = vmatpush1.bf16.msra.mxu1 %v2304_v22 }
 0x5fe   :  { %v1210_v30 = vpop.f32.mrb[19].mxu1  ;;  %2067 = vmatmul.mubr.f32.vlgmr.msra.gmra.mrb[20].mxu0 %v1224_v24  ;;  %v1226_v32 = vmul.f32 %v2408_v31, %v2033_v27  ;;  %v1498_v24 = vld [vmem:[%s3401_s8 + $0x20] sm:$0xff]  ;;  %v1505_v27 = vld [vmem:[%s3401_s8 + $0x58] sm:$0xff] }
 0x5ff   :  { %v1225_v45 = vmul.f32 %v2404_v26, %v1210_v30  ;;  %2273 = vmatpush3.bf16.msra.mxu0 %v2270_v8  ;;  %v2441_v8 = vld [vmem:[#allocation2 + $0x18] sm:$0xff]  ;;  %v1503_v26 = vld [vmem:[%s3401_s8 + $0x48] sm:$0xff]  ;;  %2307 = vmatprep.subr.bf16.mxu1 %v2306_v23  ;;  %v1504_v30 = vld [vmem:[%s3401_s8 + $0x50] sm:$0xff] }
 0x600   :  { %2275 = vmatprep.subr.bf16.mxu0 %v2274_v25  ;;  %v2310_v28 = vpack.c.bf16 %v1505_v27, %v1503_v26  ;;  %v2312_v31 = vpack.c.bf16 %v1504_v30, %v1502_v29 }
 0x601   :  { %2069 = vmatprep.mubr.f32.mxu0 %v1225_v45 }
 0x602   :  { %2070 = vmatmul.mubr.f32.gmra.mrb[22].mxu0 %v1226_v32 }
 0x603   :  { %2277 = vmatpush3.bf16.msra.mxu0 %v2274_v25  ;;  %2104 = vmatprep.mubr.f32.mxu0 %v847_v34  ;;  %v1500_v25 = vld [vmem:[%s3401_s8 + $0x30] sm:$0xff] }
 0x604   :  { %2279 = vmatprep.subr.bf16.mxu0 %v2278_v33  ;;  %v2308_v51 = vpack.c.bf16 %v1500_v25, %v1498_v24 }
 0x606   :  { %2309 = vmatpush1.bf16.msra.mxu1 %v2308_v51 }
 0x607   :  { %2281 = vmatpush3.bf16.msra.mxu0 %v2278_v33  ;;  %2311 = vmatprep.subr.bf16.mxu1 %v2310_v28 }
 0x608   :  { %2283 = vmatprep.subr.bf16.mxu0 %v2282_v52 }
 0x60a   :  { %2313 = vmatpush1.bf16.msra.mxu1 %v2312_v31 }
 0x60b   :  { %2285 = vmatpush3.bf16.msra.mxu0 %v2282_v52 }
 0x60c   :  { %2287 = vmatprep.subr.bf16.mxu0 %v2286_v38 }
 0x60f   :  { %2289 = vmatpush3.bf16.msra.mxu0 %v2286_v38 }
 0x610   :  { %2291 = vmatprep.subr.bf16.mxu0 %v2290_v42 }
 0x613   :  { %2293 = vmatpush3.bf16.msra.mxu0 %v2290_v42 }
 0x614   :  { %2295 = vmatprep.subr.bf16.mxu0 %v2294_v50 }
 0x617   :  { %2297 = vmatpush3.bf16.msra.mxu0 %v2294_v50  ;;  %v2314_v50 = vpack.c.bf16 %v1509_v49, %v1507_v48 }
 0x618   :  { %2299 = vmatprep.subr.bf16.mxu0 %v2298_v55 }
 0x619   :  { %2315 = vmatprep.subr.bf16.mxu1 %v2314_v50 }
 0x61b   :  { %2301 = vmatpush3.bf16.msra.mxu0 %v2298_v55  ;;  %v2316_v55 = vpack.c.bf16 %v1508_v54, %v1506_v53  ;;  %v1716_v53 = vld [vmem:[%s3403_s10 + $0x88] sm:$0xff] }
 0x61d   :  { %2317 = vmatpush1.bf16.msra.mxu1 %v2316_v55  ;;  %v1700_v55 = vld [vmem:[%s3403_s10 + $0x8] sm:$0xff] }
 0x61e   :  { %2105 = vmatmul.mubr.f32.vlgmr.msra.gmra.mrb[20].mxu0 %v848_v58  ;;  %v2318_v58 = vpack.c.bf16 %v1513_v57, %v1511_v56  ;;  %v1717_v56 = vld [vmem:[%s3403_s10 + $0x90] sm:$0xff]  ;;  %v1718_v57 = vld [vmem:[%s3403_s10 + $0x98] sm:$0xff] }
 0x61f   :  { %2107 = vmatprep.mubr.f32.mxu0 %v849_v60  ;;  %v1512_v60 = vld [vmem:[%s3401_s8 + $0x90] sm:$0xff] }
 0x620   :  { %2319 = vmatprep.subr.bf16.mxu1 %v2318_v58  ;;  %v2338_v58 = vpack.c.bf16 %v1718_v57, %v1717_v56 }
 0x622   :  { %2108 = vmatmul.mubr.f32.gmra.mrb[22].mxu0 %v850_v61  ;;  %v2320_v61 = vpack.c.bf16 %v1512_v60, %v1510_v59  ;;  %v1701_v59 = vld [vmem:[%s3403_s10 + $0x10] sm:$0xff]  ;;  %v1702_v60 = vld [vmem:[%s3403_s10 + $0x18] sm:$0xff] }
 0x624   :  { %2321 = vmatpush1.bf16.msra.mxu1 %v2320_v61  ;;  %v2340_v61 = vpack.c.bf16 %v1702_v60, %v1701_v59 }
 0x6f1   :  { %v2106_v63 = vpop.f32.mrb[20].mxu0 }
 0x6f2   :  { %v1421_v0 = vadd.f32 %v2106_v63, %v1858_v62  ;;  %v1394_v1 = vpop.f32.mrb[21].mxu0  ;;  %v1517_v63 = vld [vmem:[%s3401_s8 + $0xb8] sm:$0xff] }
 0x6f3   :  { %v1420_v2 = vadd.f32 %v1858_v62, %v1394_v1  ;;  %v1514_v1 = vld [vmem:[%s3401_s8 + $0xa0] sm:$0xff] }
 0x6f4   :  { %v3082_v4 = vadd.f32 %v2439_v3, %v1421_v0 }
 0x6f5   :  { %v3084_v5 = vadd.f32 %v2440_v12, %v1420_v2  ;;  %v2109_v11 = vpop.f32.mrb[22].mxu0  ;;  %v1516_v2 = vld [vmem:[%s3401_s8 + $0xb0] sm:$0xff]  ;;  %v1519_v12 = vld [vmem:[%s3401_s8 + $0xc8] sm:$0xff] }
 0x6f6   :  { %v1423_v6 = vadd.f32 %v2109_v11, %v1858_v62  ;;  %1432 = vadd.xlane.f32.xlu1 %v3082_v4  ;;  %v1404_v14 = vpop.f32.mrb[23].mxu0  ;;  %v2324_v3 = vpack.c.bf16 %v1516_v2, %v1514_v1  ;;  %v1521_v11 = vld [vmem:[%s3401_s8 + $0xd8] sm:$0xff]  ;;  %v1703_v1 = vld [vmem:[%s3403_s10 + $0x20] sm:$0xff]  ;;  %v1704_v2 = vld [vmem:[%s3403_s10 + $0x28] sm:$0xff] }
 0x6f7   :  { %v1422_v7 = vadd.f32 %v1858_v62, %v1404_v14  ;;  %1430 = vadd.xlane.f32.xlu0 %v3084_v5  ;;  %v1515_v62 = vld [vmem:[%s3401_s8 + $0xa8] sm:$0xff]  ;;  %v2326_v14 = vpack.c.bf16 %v1521_v11, %v1519_v12  ;;  %v1721_v12 = vld [vmem:[%s3403_s10 + $0xb0] sm:$0xff]  ;;  %v1722_v11 = vld [vmem:[%s3403_s10 + $0xb8] sm:$0xff] }
 0x6f8   :  { %v3088_v9 = vadd.f32 %v2441_v8, %v1423_v6  ;;  %v2322_v0 = vpack.c.bf16 %v1517_v63, %v1515_v62  ;;  %v1518_v6 = vld [vmem:[%s3401_s8 + $0xc0] sm:$0xff]  ;;  %v1523_v8 = vld [vmem:[%s3401_s8 + $0xe8] sm:$0xff] }
 0x6f9   :  { %v3090_v44 = vadd.f32 %v2442_v10, %v1422_v7  ;;  %v1520_v7 = vld [vmem:[%s3401_s8 + $0xd0] sm:$0xff]  ;;  %v1525_v10 = vld [vmem:[%s3401_s8 + $0xf8] sm:$0xff]  ;;  %v1719_v62 = vld [vmem:[%s3403_s10 + $0xa0] sm:$0xff] }
 0x6fa   :  { %1436 = vadd.xlane.f32.xlu1 %v3088_v9  ;;  %2323 = vmatprep.subr.bf16.mxu1 %v2322_v0  ;;  %v2328_v16 = vpack.c.bf16 %v1520_v7, %v1518_v6  ;;  %v2330_v18 = vpack.c.bf16 %v1525_v10, %v1523_v8  ;;  %v1720_v63 = vld [vmem:[%s3403_s10 + $0xa8] sm:$0xff]  ;;  %v2346_v6 = vpack.c.bf16 %v1722_v11, %v1721_v12  ;;  %v1706_v7 = vld [vmem:[%s3403_s10 + $0x38] sm:$0xff]  ;;  %v1723_v10 = vld [vmem:[%s3403_s10 + $0xc0] sm:$0xff] }
 0x6fb   :  { %1434 = vadd.xlane.f32.xlu0 %v3090_v44  ;;  %2325 = vmatpush1.bf16.msra.mxu1 %v2324_v3  ;;  %v2342_v0 = vpack.c.bf16 %v1720_v63, %v1719_v62  ;;  %v2344_v3 = vpack.c.bf16 %v1704_v2, %v1703_v1 }
 0x6fc   :  { %2327 = vmatprep.subr.bf16.mxu1 %v2326_v14  ;;  %v1705_v14 = vld [vmem:[%s3403_s10 + $0x30] sm:$0xff] }
 0x6fd   :  { %v2348_v8 = vpack.c.bf16 %v1706_v7, %v1705_v14 }
 0x6ff   :  { %2329 = vmatpush1.bf16.msra.mxu1 %v2328_v16  ;;  %v1724_v16 = vld [vmem:[%s3403_s10 + $0xc8] sm:$0xff] }
 0x700   :  { %2331 = vmatprep.subr.bf16.mxu1 %v2330_v18  ;;  %v2350_v18 = vpack.c.bf16 %v1724_v16, %v1723_v10 }
 0x703   :  { %2333 = vmatpush1.bf16.msra.mxu1 %v2332_v19  ;;  %v2352_v19 = vpack.c.bf16 %v1708_v15, %v1707_v17 }
 0x783   :  { %v1433_v45 = vpop.xlane.xlu1 %1432 }
 0x784   :  { %v1439_v32 = vmul.f32 0.0078125, %v1433_v45  ;;  %v1431_v33 = vpop.xlane.xlu0 %1430 }
 0x785   :  { %v1438_v34 = vmul.f32 0.0078125, %v1431_v33 }
 0x786   :  { %v3131_v35 = vsub.f32 %v3082_v4, %v1439_v32  ;;  %v1859_v32 = vld [vmem:[%s3399_s6] ss:$0 sm:$0xff] }
 0x787   :  { %v3134_v36 = vsub.f32 %v3084_v5, %v1438_v34  ;;  %v1437_v52 = vpop.xlane.xlu1 %1436 }
 0x788   :  { %v1441_v37 = vmul.f32 0.0078125, %v1437_v52  ;;  %v1435_v13 = vpop.xlane.xlu0 %1434  ;;  %v1447_v38 = vmul.f32 %v3131_v35, %v3131_v35  ;;  %v1860_v52 = vld [vmem:[%s3400_s7] ss:$0 sm:$0xff] }
 0x789   :  { %v1440_v39 = vmul.f32 0.0078125, %v1435_v13  ;;  %v1446_v40 = vmul.f32 %v3134_v36, %v3134_v36 }
 0x78a   :  { %v3141_v41 = vsub.f32 %v3088_v9, %v1441_v37  ;;  %1452 = vadd.xlane.f32.xlu1 %v1447_v38 }
 0x78b   :  { %v3144_v42 = vsub.f32 %v3090_v44, %v1440_v39  ;;  %1450 = vadd.xlane.f32.xlu0 %v1446_v40 }
 0x78c   :  { %v1449_v46 = vmul.f32 %v3141_v41, %v3141_v41 }
 0x78d   :  { %v1448_v47 = vmul.f32 %v3144_v42, %v3144_v42 }
 0x78e   :  { %1456 = vadd.xlane.f32.xlu1 %v1449_v46 }
 0x78f   :  { %1454 = vadd.xlane.f32.xlu0 %v1448_v47 }
 0x817   :  { %v1453_v20 = vpop.xlane.xlu1 %1452 }
 0x818   :  { %v1459_v21 = vmul.f32 0.0078125, %v1453_v20  ;;  %v1451_v22 = vpop.xlane.xlu0 %1450  ;;  %v1725_v20 = vld [vmem:[%s3403_s10 + $0xd0] sm:$0xff] }
 0x819   :  { %v1458_v23 = vmul.f32 0.0078125, %v1451_v22 }
 0x81a   :  { %v1463_v24 = vadd.f32 1e-05, %v1459_v21  ;;  %v1726_v21 = vld [vmem:[%s3403_s10 + $0xd8] sm:$0xff] }
 0x81b   :  { %v1462_v25 = vadd.f32 1e-05, %v1458_v23  ;;  %v1457_v26 = vpop.xlane.xlu1 %1456  ;;  %v2354_v22 = vpack.c.bf16 %v1726_v21, %v1725_v20  ;;  %v1709_v23 = vld [vmem:[%s3403_s10 + $0x50] sm:$0xff] }
 0x81c   :  { %2415 = vrsqrt.f32 %v1463_v24  ;;  %v1461_v27 = vmul.f32 0.0078125, %v1457_v26  ;;  %v1455_v51 = vpop.xlane.xlu0 %1454  ;;  %v1710_v24 = vld [vmem:[%s3403_s10 + $0x58] sm:$0xff]  ;;  %v1727_v26 = vld [vmem:[%s3403_s10 + $0xe0] sm:$0xff] }
 0x81d   :  { %2417 = vrsqrt.f32 %v1462_v25  ;;  %v1460_v28 = vmul.f32 0.0078125, %v1455_v51  ;;  %v2356_v25 = vpack.c.bf16 %v1710_v24, %v1709_v23 }
 0x81e   :  { %v1465_v29 = vadd.f32 1e-05, %v1461_v27  ;;  %v1728_v27 = vld [vmem:[%s3403_s10 + $0xe8] sm:$0xff] }
 0x81f   :  { %v1464_v30 = vadd.f32 1e-05, %v1460_v28  ;;  %v2358_v51 = vpack.c.bf16 %v1728_v27, %v1727_v26  ;;  %v1711_v28 = vld [vmem:[%s3403_s10 + $0x60] sm:$0xff] }
 0x821   :  { %2419 = vrsqrt.f32 %v1464_v30 }
 0x822   :  { %2421 = vrsqrt.f32 %v1465_v29  ;;  %v1712_v29 = vld [vmem:[%s3403_s10 + $0x68] sm:$0xff] }
 0x823   :  { %v2360_v30 = vpack.c.bf16 %v1712_v29, %v1711_v28 }
 0x826   :  { %v2416_v31 = vpop.eup %2415 }
 0x827   :  { %v2418_v45 = vpop.eup %2417  ;;  %v1471_v34 = vmul.f32 %v2416_v31, %v3131_v35  ;;  %v1729_v31 = vld [vmem:[%s3403_s10 + $0xf0] sm:$0xff] }
 0x828   :  { %v1470_v33 = vmul.f32 %v2418_v45, %v3134_v36  ;;  %v1730_v45 = vld [vmem:[%s3403_s10 + $0xf8] sm:$0xff] }
 0x829   :  { %v1481_v39 = vmul.f32 %v1859_v32, %v1471_v34  ;;  %v1714_v34 = vld [vmem:[%s3403_s10 + $0x78] sm:$0xff] }
 0x82a   :  { %v1480_v37 = vmul.f32 %v1859_v32, %v1470_v33  ;;  %v1713_v33 = vld [vmem:[%s3403_s10 + $0x70] sm:$0xff] }
 0x82b   :  { %v2420_v13 = vpop.eup %2419  ;;  %v1491_v47 = vadd.f32 %v1860_v52, %v1481_v39  ;;  %v1526_v39 = vld [vmem:[%s3402_s9] sm:$0x3] }
 0x82c   :  { %v1490_v38 = vadd.f32 %v1860_v52, %v1480_v37  ;;  %v1472_v40 = vmul.f32 %v2420_v13, %v3144_v42  ;;  %v2422_v46 = vpop.eup %2421  ;;  %v1715_v42 = vld [vmem:[%s3403_s10 + $0x80] sm:$0xff]  ;;  %v1528_v37 = vlaneseq }
 0x82d   :  { %v1473_v36 = vmul.f32 %v2422_v46, %v3141_v41  ;;  %v2334_v54 = vpack.c.bf16 %v1716_v53, %v1715_v42  ;;  %v1699_v41 = vld [vmem:[%s3403_s10] sm:$0xff] }
 0x82e   :  { %1603 = vmatmul.mubr.f32.vlgmr.msra.gmra.mrb[20].mxu1 %v1490_v38  ;;  %v1482_v48 = vmul.f32 %v1859_v32, %v1472_v40  ;;  %v1529_v13 = vshrl.u32 %v1528_v37, 7 }
 0x82f   :  { %1608 = vmatprep.mubr.f32.mxu1 %v2494_v43  ;;  %v1483_v49 = vmul.f32 %v1859_v32, %v1473_v36  ;;  %2335 = vmatprep.subr.bf16.mxu1 %v2334_v54  ;;  %v2362_v32 = vpack.c.bf16 %v1730_v45, %v1729_v31 }
 0x830   :  { %v1492_v35 = vadd.f32 %v1860_v52, %v1482_v48  ;;  %v1530_v38 = vsub.s32 0, %v1529_v13  ;;  %v1534_v40 = vsub.s32 1, %v1529_v13 }
 0x831   :  { %v1493_v50 = vadd.f32 %v1860_v52, %v1483_v49  ;;  %v2364_v52 = vpack.c.bf16 %v1714_v34, %v1713_v33 }
 0x832   :  { %1609 = vmatmul.mubr.f32.gmra.mrb[22].mxu1 %v1491_v47  ;;  %v1531_v46 = vrot.slane %v1526_v39, %v1530_v38  ;;  %v1535_v47 = vrot.slane %v1526_v39, %v1534_v40 }
 0x833   :  { %1614 = vmatprep.mubr.f32.mxu1 %v2494_v43 }
 0x836   :  { %1615 = vmatmul.mubr.f32.gmra.mrb[24].mxu1 %v1492_v35 }
 0x837   :  { %1620 = vmatprep.mubr.f32.mxu1 %v2494_v43  ;;  %v2336_v43 = vpack.c.bf16 %v1700_v55, %v1699_v41 }
 0x839   :  { %2337 = vmatpush3.bf16.msra.mxu1 %v2336_v43 }
 0x83a   :  { %1621 = vmatmul.mubr.f32.gmra.mrb[26].mxu1 %v1493_v50  ;;  %2339 = vmatprep.subr.bf16.mxu1 %v2338_v58 }
 0x83d   :  { %2341 = vmatpush3.bf16.msra.mxu1 %v2340_v61 }
 0x83e   :  { %2343 = vmatprep.subr.bf16.mxu1 %v2342_v0 }
 0x841   :  { %2345 = vmatpush3.bf16.msra.mxu1 %v2344_v3 }
 0x842   :  { %2347 = vmatprep.subr.bf16.mxu1 %v2346_v6 }
 0x845   :  { %2349 = vmatpush3.bf16.msra.mxu1 %v2348_v8 }
 0x846   :  { %2351 = vmatprep.subr.bf16.mxu1 %v2350_v18 }
 0x849   :  { %2353 = vmatpush3.bf16.msra.mxu1 %v2352_v19 }
 0x84a   :  { %2355 = vmatprep.subr.bf16.mxu1 %v2354_v22 }
 0x84d   :  { %2357 = vmatpush3.bf16.msra.mxu1 %v2356_v25 }
 0x84e   :  { %2359 = vmatprep.subr.bf16.mxu1 %v2358_v51 }
 0x851   :  { %2361 = vmatpush3.bf16.msra.mxu1 %v2360_v30 }
 0x852   :  { %2363 = vmatprep.subr.bf16.mxu1 %v2362_v32 }
 0x855   :  { %2365 = vmatpush3.bf16.msra.mxu1 %v2364_v52 }
 0x901   :  { %v1604_v48 = vpop.f32.mrb[20].mxu1 }
 0x902   :  { %v3322_v36 = vadd.f32 %v1604_v48, %v1531_v46  ;;  %v1606_v35 = vpop.f32.mrb[21].mxu1 }
 0x903   :  { %v3324_v49 = vadd.f32 %v1606_v35, %v1535_v47 }
 0x904   :  { %v1627_v50 = vmul.f32 %v3322_v36, %v3322_v36 }
 0x905   :  { %v1628_v42 = vmul.f32 %v3324_v49, %v3324_v49  ;;  %v1610_v53 = vpop.f32.mrb[22].mxu1 }
 0x906   :  { %v1635_v54 = vmul.f32 %v1627_v50, %v3322_v36  ;;  %v3331_v41 = vadd.f32 %v1610_v53, %v1531_v46  ;;  %v1612_v55 = vpop.f32.mrb[23].mxu1 }
 0x907   :  { %v1636_v43 = vmul.f32 %v1628_v42, %v3324_v49  ;;  %v3334_v56 = vadd.f32 %v1612_v55, %v1535_v47 }
 0x908   :  { %v1643_v57 = vmul.f32 0.044715, %v1635_v54  ;;  %v1629_v58 = vmul.f32 %v3331_v41, %v3331_v41 }
 0x909   :  { %v1644_v59 = vmul.f32 0.044715, %v1636_v43  ;;  %v1630_v60 = vmul.f32 %v3334_v56, %v3334_v56  ;;  %v1616_v61 = vpop.f32.mrb[24].mxu1 }
 0x90a   :  { %v1651_v62 = vadd.f32 %v1643_v57, %v3322_v36  ;;  %v1637_v63 = vmul.f32 %v1629_v58, %v3331_v41  ;;  %v3342_v0 = vadd.f32 %v1616_v61, %v1531_v46  ;;  %v1618_v1 = vpop.f32.mrb[25].mxu1 }
 0x90b   :  { %v1652_v2 = vadd.f32 %v1644_v59, %v3324_v49  ;;  %v1638_v3 = vmul.f32 %v1630_v60, %v3334_v56  ;;  %v3346_v12 = vadd.f32 %v1618_v1, %v1535_v47 }
 0x90c   :  { %v1659_v11 = vmul.f32 0.7978846, %v1651_v62  ;;  %v1645_v6 = vmul.f32 0.044715, %v1637_v63  ;;  %v1631_v14 = vmul.f32 %v3342_v0, %v3342_v0 }
 0x90d   :  { %v1660_v7 = vmul.f32 0.7978846, %v1652_v2  ;;  %v1646_v8 = vmul.f32 0.044715, %v1638_v3  ;;  %v1632_v10 = vmul.f32 %v3346_v12, %v3346_v12  ;;  %v1622_v16 = vpop.f32.mrb[26].mxu1 }
 0x90e   :  { %2423 = vtanh.f32 %v1659_v11  ;;  %v1653_v18 = vadd.f32 %v1645_v6, %v3331_v41  ;;  %v1639_v17 = vmul.f32 %v1631_v14, %v3342_v0  ;;  %v3354_v15 = vadd.f32 %v1622_v16, %v1531_v46  ;;  %v1624_v19 = vpop.f32.mrb[27].mxu1 }
 0x90f   :  { %v1654_v20 = vadd.f32 %v1646_v8, %v3334_v56  ;;  %v1640_v21 = vmul.f32 %v1632_v10, %v3346_v12  ;;  %v1625_v22 = vadd.f32 %v1624_v19, %v1535_v47  ;;  %2425 = vtanh.f32 %v1660_v7 }
 0x910   :  { %v1661_v23 = vmul.f32 0.7978846, %v1653_v18  ;;  %v1647_v24 = vmul.f32 0.044715, %v1639_v17  ;;  %v1633_v25 = vmul.f32 %v3354_v15, %v3354_v15  ;;  %v1861_v18 = vld [vmem:[%s3404_s11] ss:$0 sm:$0xff] }
 0x911   :  { %v1662_v26 = vmul.f32 0.7978846, %v1654_v20  ;;  %v1648_v27 = vmul.f32 0.044715, %v1640_v21  ;;  %v1634_v51 = vmul.f32 %v1625_v22, %v1625_v22  ;;  %s2495_s11 = smov [#allocation5]  }
 0x912   :  { %v1655_v28 = vadd.f32 %v1647_v24, %v3342_v0  ;;  %v1641_v29 = vmul.f32 %v1633_v25, %v3354_v15  ;;  %2427 = vtanh.f32 %v1661_v23  ;;  %s1836_s19 = sshll.u32 %s2495_s11, 4  ;;  %s1837_s19 = int_to_ptr.vmem [resolvable:$true] %s1836_s19 }
 0x913   :  { %v1656_v30 = vadd.f32 %v1648_v27, %v3346_v12  ;;  %v1642_v31 = vmul.f32 %v1634_v51, %v1625_v22  ;;  %2429 = vtanh.f32 %v1662_v26  ;;  %s2465_s3 = scalar_lea.vmem %s1837_s19, 512  ;;  %p2470_p9 = scmp.lt.s32.totalorder %s1837_s19, %s1837_s19 }
 0x914   :  { %v1663_v45 = vmul.f32 0.7978846, %v1655_v28  ;;  %v1649_v32 = vmul.f32 0.044715, %v1641_v29  ;;  %p2466_p8 = scmp.ne.s32.totalorder %s1837_s19, %s2465_s3  ;;  %p2471_p10 = scmp.lt.s32.totalorder %s2465_s3, %s2465_s3 }
 0x915   :  { %v1664_v33 = vmul.f32 0.7978846, %v1656_v30  ;;  %v1650_v34 = vmul.f32 0.044715, %v1642_v31 }
 0x916   :  { %v1657_v52 = vadd.f32 %v1649_v32, %v3354_v15  ;;  %2431 = vtanh.f32 %v1663_v45  ;;  %p2472_p11 = por %p2471_p10, %p2470_p9 }
 0x917   :  { %v1658_v37 = vadd.f32 %v1650_v34, %v1625_v22  ;;  %2433 = vtanh.f32 %v1664_v33 }
 0x918   :  { %v2424_v13 = vpop.eup %2423  ;;  %v1665_v38 = vmul.f32 0.7978846, %v1657_v52  ;;  %p2473_p12 = pnand %p2472_p11, %p2466_p8 }
 0x919   :  { %v2426_v39 = vpop.eup %2425  ;;  %v1675_v40 = vadd.f32 1.0, %v2424_v13  ;;  %v1666_v46 = vmul.f32 0.7978846, %v1658_v37 }
 0x91a   :  { %v1676_v47 = vadd.f32 1.0, %v2426_v39  ;;  %2435 = vtanh.f32 %v1665_v38 }
 0x91b   :  { %v1683_v48 = vmul.f32 0.5, %v1675_v40  ;;  %2437 = vtanh.f32 %v1666_v46 }
 0x91c   :  { %v2428_v35 = vpop.eup %2427  ;;  %v1684_v50 = vmul.f32 0.5, %v1676_v47 }
 0x91d   :  { %v2430_v42 = vpop.eup %2429  ;;  %v1677_v53 = vadd.f32 1.0, %v2428_v35  ;;  %v1691_v43 = vmul.f32 %v1683_v48, %v3322_v36 }
 0x91e   :  { %v1692_v54 = vmul.f32 %v1684_v50, %v3324_v49  ;;  %v1678_v55 = vadd.f32 1.0, %v2430_v42 }
 0x91f   :  { %v1685_v57 = vmul.f32 0.5, %v1677_v53 }
 0x920   :  { %v2432_v58 = vpop.eup %2431  ;;  %1802 = vmatprep.mubr.f32.mxu1 %v1692_v54  ;;  %v1686_v59 = vmul.f32 0.5, %v1678_v55 }
 0x921   :  { %v2434_v60 = vpop.eup %2433  ;;  %1803 = vmatmul.mubr.f32.vlgmr.msra.gmra.mrb[28].mxu1 %v1691_v43  ;;  %v1679_v61 = vadd.f32 1.0, %v2432_v58  ;;  %v1693_v1 = vmul.f32 %v1685_v57, %v3331_v41 }
 0x922   :  { %v1694_v62 = vmul.f32 %v1686_v59, %v3334_v56  ;;  %v1680_v63 = vadd.f32 1.0, %v2434_v60 }
 0x923   :  { %v1687_v2 = vmul.f32 0.5, %v1679_v61 }
 0x924   :  { %v2436_v3 = vpop.eup %2435  ;;  %1807 = vmatprep.mubr.f32.mxu1 %v1694_v62  ;;  %v1688_v11 = vmul.f32 0.5, %v1680_v63 }
 0x925   :  { %v2438_v49 = vpop.eup %2437  ;;  %1808 = vmatmul.mubr.f32.gmra.mrb[30].mxu1 %v1693_v1  ;;  %v1681_v6 = vadd.f32 1.0, %v2436_v3  ;;  %v1695_v7 = vmul.f32 %v1687_v2, %v3342_v0 }
 0x926   :  { %v1696_v36 = vmul.f32 %v1688_v11, %v3346_v12  ;;  %v1682_v14 = vadd.f32 1.0, %v2438_v49 }
 0x927   :  { %v1689_v8 = vmul.f32 0.5, %v1681_v6 }
 0x928   :  { %1812 = vmatprep.mubr.f32.mxu1 %v1696_v36  ;;  %v1690_v10 = vmul.f32 0.5, %v1682_v14 }
 0x929   :  { %1813 = vmatmul.mubr.f32.gmra.mrb[32].mxu1 %v1695_v7  ;;  %v1697_v16 = vmul.f32 %v1689_v8, %v3354_v15 }
 0x92a   :  { %v1698_v56 = vmul.f32 %v1690_v10, %v1625_v22 }
 0x92c   :  { %1817 = vmatprep.mubr.f32.mxu1 %v1698_v56 }
 0x92d   :  { %1818 = vmatmul.mubr.f32.gmra.mrb[34].mxu1 %v1697_v16 }
 0x9f4   :  { %v1966_v41 = vpop.f32.mrb[28].mxu1 }
 0x9f5   :  { %v1967_v17 = vpop.f32.mrb[29].mxu1 }
 0x9f6   :  { %v1968_v19 = vadd.f32 %v1967_v17, %v1966_v41 }
 0x9f8   :  { %v1805_v12 = vadd.f32 %v1968_v19, %v1861_v18  ;;  %v1969_v20 = vpop.f32.mrb[30].mxu1 }
 0x9f9   :  { %v1970_v21 = vpop.f32.mrb[31].mxu1 }
 0x9fa   :  { %v1823_v0 = vadd.f32 %v1805_v12, %v3084_v5  ;;  %v1971_v23 = vadd.f32 %v1970_v21, %v1969_v20 }
 0x9fc   :  { %1827 = vst [vmem:[#allocation5] sm:$0xff] %v1823_v0  ;;  %v1810_v24 = vadd.f32 %v1971_v23, %v1861_v18  ;;  %v1972_v22 = vpop.f32.mrb[32].mxu1 }
 0x9fd   :  { %v1973_v25 = vpop.f32.mrb[33].mxu1 }
 0x9fe   :  { %v1824_v15 = vadd.f32 %v1810_v24, %v3082_v4  ;;  %v1974_v26 = vadd.f32 %v1973_v25, %v1972_v22 }
 0xa00   :  { %1828 = vst [vmem:[#allocation5 + $0x8] sm:$0xff] %v1824_v15  ;;  %v1815_v27 = vadd.f32 %v1974_v26, %v1861_v18  ;;  %v1975_v51 = vpop.f32.mrb[34].mxu1 }
 0xa01   :  { %v1976_v28 = vpop.f32.mrb[35].mxu1 }
 0xa02   :  { %v1825_v29 = vadd.f32 %v1815_v27, %v3090_v44  ;;  %v1977_v30 = vadd.f32 %v1976_v28, %v1975_v51 }
 0xa04   :  { %1829 = vst [vmem:[#allocation5 + $0x10] sm:$0xff] %v1825_v29  ;;  %v1820_v31 = vadd.f32 %v1977_v30, %v1861_v18 }
 0xa06   :  { %v1826_v5 = vadd.f32 %v1820_v31, %v3088_v9 }
 0xa08   :  { %1830 = vst [vmem:[#allocation5 + $0x18] sm:$0xff] %v1826_v5 }
 0xa09   :  { %2476 = shalt.err (!%p2473_p12)
}
 0xa0a   :  { %s2477_s21 = scalar_lea.hbm %s3405_s12, 512 }
 0xa0b   :  { %p2478_p13 = scmp.ne.s32.totalorder %s3405_s12, %s2477_s21  ;;  %p2481_p0 = scmp.lt.u32.totalorder %s2477_s21, %s3405_s12 }
 0xa0d   :  { %p2483_p1 = pnand %p2481_p0, %p2478_p13 }
 0xa0f   :  { %2486 = shalt.err (!%p2483_p1)
}
 0xa10   :  { %1842 = dma.vmem_to_hbm [thread:$0]  %s1837_s19, 512, %s3405_s12, [#allocation4], %s2492_s13, %s2492_s13, %s2493_s14  }
 0xa11   :  { %2489 = dma.done.wait [#allocation4], 512  }
 0xa12   :  { %2490 = vsyncadd [#allocation4], 4294966784 }
 0xa13   :  { %1846 = vsyncpa [#allocation3], 1 }
 0xa14   :  { %1847 = vsyncpa [#allocation4], 1 }

// kernel: transformer_forward.2
= control target key start
LH: loop header
LB: loop body
LE: loop exit
PB: predicated region body
PF: predicated region fallthrough
CT: control target
= control target key end

     0   :  { %17 = vsyncpa [#allocation3], 0  ;;  %s2965_s0 = inlined_call_operand.vmem [shape: f32[2,16,128], index: 0, kind: input, shape index: {}, may-alias: {0,12}]   ;;  %s2966_s1 = inlined_call_operand.vmem [shape: f32[1,128], index: 1, kind: input, shape index: {}]   ;;  %s2967_s2 = inlined_call_operand.vmem [shape: f32[1,128], index: 2, kind: input, shape index: {}]   ;;  %s2968_s3 = inlined_call_operand.hbm [shape: f32[128,768], index: 3, kind: input, shape index: {}]   ;;  %s2969_s4 = inlined_call_operand.hbm [shape: f32[256,128], index: 4, kind: input, shape index: {}]   ;;  %s2970_s5 = inlined_call_operand.vmem [shape: f32[1,128], index: 5, kind: input, shape index: {}]   ;;  %s2971_s6 = inlined_call_operand.vmem [shape: f32[1,128], index: 6, kind: input, shape index: {}]   ;;  %s2972_s7 = inlined_call_operand.vmem [shape: f32[1,128], index: 7, kind: input, shape index: {}]   ;;  %s2973_s8 = inlined_call_operand.hbm [shape: f32[128,256], index: 8, kind: input, shape index: {}]   ;;  %s2974_s9 = inlined_call_operand.vmem [shape: f32[1,256], index: 9, kind: input, shape index: {}]   ;;  %s2975_s10 = inlined_call_operand.hbm [shape: f32[256,128], index: 10, kind: input, shape index: {}]   ;;  %s2976_s11 = inlined_call_operand.vmem [shape: f32[1,128], index: 11, kind: input, shape index: {}]   ;;  %s2977_s12 = inlined_call_operand.vmem [shape: f32[2,16,128], index: 12, kind: output, shape index: {}, may-alias: {0,12}]  }
   0x1   :  { %18 = vsyncpa [#allocation5], 0 }
   0x2   :  { %19 = vsyncpa [#allocation8], 0  ;;  %s2573_s21 = smov [#allocation4]   ;;  %s2479_s25 = scalar_lea.hbm %s2969_s4, 4096 }
   0x3   :  { %s43_s22 = sshll.u32 %s2573_s21, 4  ;;  %p2480_p0 = scmp.ne.s32.totalorder %s2969_s4, %s2479_s25  ;;  %s44_s22 = int_to_ptr.vmem [resolvable:$true] %s43_s22 }
   0x4   :  { %p2483_p1 = scmp.lt.u32.totalorder %s2479_s25, %s2969_s4 }
   0x6   :  { %p2485_p2 = pnand %p2483_p1, %p2480_p0 }
   0x8   :  { %2488 = shalt.err (!%p2485_p2)
}
   0x9   :  { %s2489_s30 = scalar_lea.vmem %s44_s22, 4096  ;;  %p2494_p4 = scmp.lt.s32.totalorder %s44_s22, %s44_s22 }
   0xa   :  { %p2490_p3 = scmp.ne.s32.totalorder %s44_s22, %s2489_s30  ;;  %p2495_p5 = scmp.lt.s32.totalorder %s2489_s30, %s2489_s30 }
   0xc   :  { %p2496_p6 = por %p2495_p5, %p2494_p4 }
   0xe   :  { %p2497_p7 = pnand %p2496_p6, %p2490_p3 }
  0x10   :  { %2500 = shalt.err (!%p2497_p7)
}
  0x11   :  { %s2574_s13 = smov 128   ;;  %s2575_s14 = smov 8  }
  0x12   :  { %49 = dma.hbm_to_vmem [thread:$0]  %s2969_s4, 4096, %s44_s22, [#allocation5], %s2574_s13, %s2574_s13, %s2575_s14  }
  0x13   :  { %s2576_s17 = smov [#allocation2]   ;;  %s2501_s21 = scalar_lea.hbm %s2968_s3, 12288 }
  0x14   :  { %s31_s18 = sshll.u32 %s2576_s17, 4  ;;  %p2502_p8 = scmp.ne.s32.totalorder %s2968_s3, %s2501_s21  ;;  %s32_s18 = int_to_ptr.vmem [resolvable:$true] %s31_s18 }
  0x15   :  { %p2505_p9 = scmp.lt.u32.totalorder %s2501_s21, %s2968_s3 }
  0x17   :  { %p2507_p10 = pnand %p2505_p9, %p2502_p8 }
  0x19   :  { %2510 = shalt.err (!%p2507_p10)
}
  0x1a   :  { %s2511_s27 = scalar_lea.vmem %s32_s18, 12288  ;;  %p2516_p12 = scmp.lt.s32.totalorder %s32_s18, %s32_s18 }
  0x1b   :  { %p2512_p11 = scmp.ne.s32.totalorder %s32_s18, %s2511_s27  ;;  %p2517_p13 = scmp.lt.s32.totalorder %s2511_s27, %s2511_s27 }
  0x1d   :  { %p2518_p0 = por %p2517_p13, %p2516_p12 }
  0x1f   :  { %p2519_p1 = pnand %p2518_p0, %p2512_p11 }
  0x21   :  { %2522 = shalt.err (!%p2519_p1)
}
  0x22   :  { %s2577_s4 = smov 768   ;;  %s2578_s22 = smov 48  }
  0x23   :  { %37 = dma.hbm_to_vmem [thread:$0]  %s2968_s3, 12288, %s32_s18, [#allocation3], %s2577_s4, %s2577_s4, %s2578_s22  }
  0x24   :  { %s2579_s30 = smov [#allocation6]   ;;  %s2523_s19 = scalar_lea.hbm %s2973_s8, 4096 }
  0x25   :  { %s61_s15 = sshll.u32 %s2579_s30, 4  ;;  %p2524_p2 = scmp.ne.s32.totalorder %s2973_s8, %s2523_s19  ;;  %s62_s15 = int_to_ptr.vmem [resolvable:$true] %s61_s15 }
  0x26   :  { %p2527_p3 = scmp.lt.u32.totalorder %s2523_s19, %s2973_s8 }
  0x28   :  { %p2529_p4 = pnand %p2527_p3, %p2524_p2 }
  0x2a   :  { %2532 = shalt.err (!%p2529_p4)
}
  0x2b   :  { %s2533_s25 = scalar_lea.vmem %s62_s15, 4096  ;;  %p2538_p6 = scmp.lt.s32.totalorder %s62_s15, %s62_s15 }
  0x2c   :  { %p2534_p5 = scmp.ne.s32.totalorder %s62_s15, %s2533_s25  ;;  %p2539_p7 = scmp.lt.s32.totalorder %s2533_s25, %s2533_s25 }
  0x2e   :  { %p2540_p8 = por %p2539_p7, %p2538_p6 }
  0x30   :  { %p2541_p9 = pnand %p2540_p8, %p2534_p5 }
  0x32   :  { %2544 = shalt.err (!%p2541_p9)
}
  0x33   :  { %s2580_s3 = smov 256   ;;  %s2581_s18 = smov 16  }
  0x34   :  { %67 = dma.hbm_to_vmem [thread:$0]  %s2973_s8, 4096, %s62_s15, [#allocation5], %s2580_s3, %s2580_s3, %s2581_s18  }
  0x35   :  { %s2582_s4 = smov [#allocation7]   ;;  %s2545_s30 = scalar_lea.hbm %s2975_s10, 4096 }
  0x36   :  { %s75_s22 = sshll.u32 %s2582_s4, 4  ;;  %p2546_p10 = scmp.ne.s32.totalorder %s2975_s10, %s2545_s30  ;;  %s76_s22 = int_to_ptr.vmem [resolvable:$true] %s75_s22 }
  0x37   :  { %p2549_p11 = scmp.lt.u32.totalorder %s2545_s30, %s2975_s10 }
  0x39   :  { %p2551_p12 = pnand %p2549_p11, %p2546_p10 }
  0x3b   :  { %2554 = shalt.err (!%p2551_p12)
}
  0x3c   :  { %s2555_s21 = scalar_lea.vmem %s76_s22, 4096  ;;  %p2560_p0 = scmp.lt.s32.totalorder %s76_s22, %s76_s22 }
  0x3d   :  { %p2556_p13 = scmp.ne.s32.totalorder %s76_s22, %s2555_s21  ;;  %p2561_p1 = scmp.lt.s32.totalorder %s2555_s21, %s2555_s21 }
  0x3f   :  { %p2562_p2 = por %p2561_p1, %p2560_p0 }
  0x41   :  { %p2563_p3 = pnand %p2562_p2, %p2556_p13 }
  0x43   :  { %2566 = shalt.err (!%p2563_p3)
}
  0x44   :  { %81 = dma.hbm_to_vmem [thread:$0]  %s2975_s10, 4096, %s76_s22, [#allocation8], %s2574_s13, %s2574_s13, %s2575_s14  }
  0x45   :  { %2567 = dma.done.wait [#allocation3], 12288  }
  0x46   :  { %2568 = vsyncadd [#allocation3], 4294955008 }
  0x47   :  { %2569 = dma.done.wait [#allocation5], 8192  }
  0x48   :  { %2570 = vsyncadd [#allocation5], 4294959104 }
  0x49   :  { %2571 = dma.done.wait [#allocation8], 4096  }
  0x4a   :  { %2572 = vsyncadd [#allocation8], 4294963200  ;;  %v96_v0 = vld [vmem:[%s2965_s0] sm:$0xff]  ;;  %v98_v1 = vld [vmem:[%s2965_s0 + $0x10] sm:$0xff]  ;;  %vm684_vm0 = vcmask 130048  }
  0x4b   :  { %102 = vadd.xlane.f32.xlu0 %v96_v0  ;;  %106 = vadd.xlane.f32.xlu1 %v98_v1  ;;  %v2712_v2 = vld [vmem:[%s2965_s0 + $0x8] sm:$0xff]  ;;  %v2717_v3 = vld [vmem:[%s2965_s0 + $0x18] sm:$0xff]  ;;  %v167_v6 = vld [vmem:[#allocation2] sm:$0xff] }
  0x4c   :  { %v168_v4 = vld [vmem:[#allocation2 + $0x8] sm:$0xff]  ;;  %v174_v5 = vld [vmem:[#allocation2 + $0x38] sm:$0xff]  ;;  %v173_v8 = vld [vmem:[#allocation2 + $0x30] sm:$0xff] }
  0x4d   :  { %v2140_v7 = vpack.c.bf16 %v174_v5, %v168_v4  ;;  %v170_v9 = vld [vmem:[#allocation2 + $0x18] sm:$0xff]  ;;  %v176_v10 = vld [vmem:[#allocation2 + $0x48] sm:$0xff]  ;;  %v2142_v11 = vpack.c.bf16 %v173_v8, %v167_v6  ;;  %v169_v13 = vld [vmem:[#allocation2 + $0x10] sm:$0xff] }
  0x4e   :  { %v2172_v12 = vpack.c.bf16 %v176_v10, %v170_v9  ;;  %v175_v14 = vld [vmem:[#allocation2 + $0x40] sm:$0xff]  ;;  %v180_v15 = vld [vmem:[#allocation2 + $0x68] sm:$0xff]  ;;  %v186_v17 = vld [vmem:[#allocation2 + $0x98] sm:$0xff] }
  0x4f   :  { %104 = vadd.xlane.f32.xlu0 %v2712_v2  ;;  %108 = vadd.xlane.f32.xlu1 %v2717_v3  ;;  %v2174_v16 = vpack.c.bf16 %v175_v14, %v169_v13  ;;  %v179_v18 = vld [vmem:[#allocation2 + $0x60] sm:$0xff]  ;;  %v185_v19 = vld [vmem:[#allocation2 + $0x90] sm:$0xff]  ;;  %v2144_v20 = vpack.c.bf16 %v186_v17, %v180_v15  ;;  %v182_v22 = vld [vmem:[#allocation2 + $0x78] sm:$0xff] }
  0x50   :  { %2141 = vmatprep.subr.bf16.mxu0 %v2140_v7  ;;  %2173 = vmatprep.subr.bf16.mxu1 %v2172_v12  ;;  %v2146_v21 = vpack.c.bf16 %v185_v19, %v179_v18  ;;  %v188_v23 = vld [vmem:[#allocation2 + $0xa8] sm:$0xff]  ;;  %v181_v24 = vld [vmem:[#allocation2 + $0x70] sm:$0xff]  ;;  %v187_v26 = vld [vmem:[#allocation2 + $0xa0] sm:$0xff] }
  0x51   :  { %2143 = vmatpush1.bf16.msra.mxu0 %v2142_v11  ;;  %2175 = vmatpush1.bf16.msra.mxu1 %v2174_v16  ;;  %v2176_v25 = vpack.c.bf16 %v188_v23, %v182_v22  ;;  %v192_v27 = vld [vmem:[#allocation2 + $0xc8] sm:$0xff]  ;;  %v198_v28 = vld [vmem:[#allocation2 + $0xf8] sm:$0xff]  ;;  %v2178_v29 = vpack.c.bf16 %v187_v26, %v181_v24  ;;  %v191_v31 = vld [vmem:[#allocation2 + $0xc0] sm:$0xff] }
  0x52   :  { %2145 = vmatprep.subr.bf16.mxu0 %v2144_v20  ;;  %v2148_v30 = vpack.c.bf16 %v198_v28, %v192_v27  ;;  %v197_v32 = vld [vmem:[#allocation2 + $0xf0] sm:$0xff]  ;;  %v194_v33 = vld [vmem:[#allocation2 + $0xd8] sm:$0xff]  ;;  %v200_v34 = vld [vmem:[#allocation2 + $0x108] sm:$0xff] }
  0x53   :  { %2177 = vmatprep.subr.bf16.mxu1 %v2176_v25  ;;  %v193_v35 = vld [vmem:[#allocation2 + $0xd0] sm:$0xff]  ;;  %v199_v36 = vld [vmem:[#allocation2 + $0x100] sm:$0xff]  ;;  %v2150_v37 = vpack.c.bf16 %v197_v32, %v191_v31  ;;  %v2180_v38 = vpack.c.bf16 %v200_v34, %v194_v33  ;;  %v204_v56 = vld [vmem:[#allocation2 + $0x128] sm:$0xff] }
  0x54   :  { %v2182_v39 = vpack.c.bf16 %v199_v36, %v193_v35  ;;  %v210_v57 = vld [vmem:[#allocation2 + $0x158] sm:$0xff]  ;;  %v203_v59 = vld [vmem:[#allocation2 + $0x120] sm:$0xff]  ;;  %v209_v60 = vld [vmem:[#allocation2 + $0x150] sm:$0xff] }
  0x55   :  { %2147 = vmatpush1.bf16.msra.mxu0 %v2146_v21  ;;  %2179 = vmatpush1.bf16.msra.mxu1 %v2178_v29  ;;  %v2152_v58 = vpack.c.bf16 %v210_v57, %v204_v56  ;;  %v206_v61 = vld [vmem:[#allocation2 + $0x138] sm:$0xff]  ;;  %v2154_v62 = vpack.c.bf16 %v209_v60, %v203_v59  ;;  %v212_v63 = vld [vmem:[#allocation2 + $0x168] sm:$0xff]  ;;  %v215_v7 = vld [vmem:[#allocation2 + $0x180] sm:$0xff] }
  0x56   :  { %2149 = vmatprep.subr.bf16.mxu0 %v2148_v30  ;;  %2181 = vmatprep.subr.bf16.mxu1 %v2180_v38  ;;  %v216_v4 = vld [vmem:[#allocation2 + $0x188] sm:$0xff]  ;;  %v222_v5 = vld [vmem:[#allocation2 + $0x1b8] sm:$0xff]  ;;  %v221_v8 = vld [vmem:[#allocation2 + $0x1b0] sm:$0xff] }
  0x57   :  { %v2156_v6 = vpack.c.bf16 %v222_v5, %v216_v4  ;;  %v218_v9 = vld [vmem:[#allocation2 + $0x198] sm:$0xff]  ;;  %v2158_v10 = vpack.c.bf16 %v221_v8, %v215_v7  ;;  %v224_v11 = vld [vmem:[#allocation2 + $0x1c8] sm:$0xff]  ;;  %v217_v12 = vld [vmem:[#allocation2 + $0x190] sm:$0xff] }
  0x58   :  { %v223_v13 = vld [vmem:[#allocation2 + $0x1c0] sm:$0xff]  ;;  %v2188_v14 = vpack.c.bf16 %v224_v11, %v218_v9  ;;  %v228_v16 = vld [vmem:[#allocation2 + $0x1e8] sm:$0xff]  ;;  %v234_v17 = vld [vmem:[#allocation2 + $0x218] sm:$0xff] }
  0x59   :  { %2151 = vmatpush1.bf16.msra.mxu0 %v2150_v37  ;;  %2183 = vmatpush1.bf16.msra.mxu1 %v2182_v39  ;;  %v2190_v15 = vpack.c.bf16 %v223_v13, %v217_v12  ;;  %v2160_v18 = vpack.c.bf16 %v234_v17, %v228_v16  ;;  %v227_v19 = vld [vmem:[#allocation2 + $0x1e0] sm:$0xff]  ;;  %v233_v20 = vld [vmem:[#allocation2 + $0x210] sm:$0xff]  ;;  %v230_v21 = vld [vmem:[#allocation2 + $0x1f8] sm:$0xff] }
  0x5a   :  { %2153 = vmatprep.subr.bf16.mxu0 %v2152_v58  ;;  %v2162_v22 = vpack.c.bf16 %v233_v20, %v227_v19  ;;  %v236_v23 = vld [vmem:[#allocation2 + $0x228] sm:$0xff]  ;;  %v229_v24 = vld [vmem:[#allocation2 + $0x1f0] sm:$0xff]  ;;  %v235_v25 = vld [vmem:[#allocation2 + $0x220] sm:$0xff] }
  0x5b   :  { %v2192_v26 = vpack.c.bf16 %v236_v23, %v230_v21  ;;  %v2194_v27 = vpack.c.bf16 %v235_v25, %v229_v24  ;;  %v240_v28 = vld [vmem:[#allocation2 + $0x248] sm:$0xff]  ;;  %v246_v29 = vld [vmem:[#allocation2 + $0x278] sm:$0xff]  ;;  %v239_v31 = vld [vmem:[#allocation2 + $0x240] sm:$0xff] }
  0x5c   :  { %v2164_v30 = vpack.c.bf16 %v246_v29, %v240_v28  ;;  %v245_v32 = vld [vmem:[#allocation2 + $0x270] sm:$0xff]  ;;  %v242_v33 = vld [vmem:[#allocation2 + $0x258] sm:$0xff]  ;;  %v248_v35 = vld [vmem:[#allocation2 + $0x288] sm:$0xff] }
  0x5d   :  { %2155 = vmatpush1.bf16.msra.mxu0 %v2154_v62  ;;  %v2166_v34 = vpack.c.bf16 %v245_v32, %v239_v31  ;;  %v241_v36 = vld [vmem:[#allocation2 + $0x250] sm:$0xff]  ;;  %v247_v37 = vld [vmem:[#allocation2 + $0x280] sm:$0xff]  ;;  %v2196_v38 = vpack.c.bf16 %v248_v35, %v242_v33  ;;  %v172_v56 = vld [vmem:[#allocation2 + $0x28] sm:$0xff] }
  0x5e   :  { %2157 = vmatprep.subr.bf16.mxu0 %v2156_v6  ;;  %v2198_v39 = vpack.c.bf16 %v247_v37, %v241_v36  ;;  %v178_v58 = vld [vmem:[#allocation2 + $0x58] sm:$0xff]  ;;  %v1878_v9 = vld [vmem:[%s2966_s1] ss:$0 sm:$0xff]  ;;  %v177_v12 = vld [vmem:[#allocation2 + $0x50] sm:$0xff] }
  0x5f   :  { %v2204_v59 = vpack.c.bf16 %v178_v58, %v172_v56  ;;  %v171_v11 = vld [vmem:[#allocation2 + $0x20] sm:$0xff]  ;;  %v189_v24 = vld [vmem:[#allocation2 + $0xb0] sm:$0xff]  ;;  %v202_v25 = vld [vmem:[#allocation2 + $0x118] sm:$0xff] }
  0x60   :  { %v1879_v13 = vld [vmem:[%s2967_s2] ss:$0 sm:$0xff]  ;;  %v201_v33 = vld [vmem:[#allocation2 + $0x110] sm:$0xff]  ;;  %v214_v35 = vld [vmem:[#allocation2 + $0x178] sm:$0xff] }
  0x61   :  { %2159 = vmatpush1.bf16.msra.mxu0 %v2158_v10  ;;  %v183_v19 = vld [vmem:[#allocation2 + $0x80] sm:$0xff]  ;;  %v237_v58 = vld [vmem:[#allocation2 + $0x230] sm:$0xff] }
  0x62   :  { %2161 = vmatprep.subr.bf16.mxu0 %v2160_v18  ;;  %v2206_v18 = vpack.c.bf16 %v177_v12, %v171_v11  ;;  %v2210_v29 = vpack.c.bf16 %v189_v24, %v183_v19  ;;  %v195_v32 = vld [vmem:[#allocation2 + $0xe0] sm:$0xff] }
  0x63   :  { %v2214_v36 = vpack.c.bf16 %v201_v33, %v195_v32 }
  0x65   :  { %2163 = vmatpush1.bf16.msra.mxu0 %v2162_v22 }
  0x66   :  { %2165 = vmatprep.subr.bf16.mxu0 %v2164_v30 }
  0x69   :  { %2167 = vmatpush1.bf16.msra.mxu0 %v2166_v34  ;;  %v208_v34 = vld [vmem:[#allocation2 + $0x148] sm:$0xff] }
  0xd8   :  { %v103_v40 = vpop.xlane.xlu0 %102  ;;  %v107_v41 = vpop.xlane.xlu1 %106 }
  0xd9   :  { %v111_v42 = vmul.f32 0.0078125, %v103_v40  ;;  %v113_v43 = vmul.f32 0.0078125, %v107_v41  ;;  %v252_v40 = vld [vmem:[#allocation2 + $0x2a8] sm:$0xff]  ;;  %v258_v41 = vld [vmem:[#allocation2 + $0x2d8] sm:$0xff] }
  0xdb   :  { %v2721_v44 = vsub.f32 %v96_v0, %v111_v42  ;;  %v2723_v45 = vsub.f32 %v98_v1, %v113_v43  ;;  %v205_v0 = vld [vmem:[#allocation2 + $0x130] sm:$0xff]  ;;  %v211_v1 = vld [vmem:[#allocation2 + $0x160] sm:$0xff]  ;;  %v2583_v43 = vmov 0.0  }
  0xdc   :  { %v105_v46 = vpop.xlane.xlu0 %104  ;;  %v109_v47 = vpop.xlane.xlu1 %108  ;;  %v251_v42 = vld [vmem:[#allocation2 + $0x2a0] sm:$0xff]  ;;  %327 = vmatprep.mubr.f32.mxu0 %v2583_v43  ;;  %416 = vmatprep.mubr.f32.mxu1 %v2583_v43 }
  0xdd   :  { %v112_v48 = vmul.f32 0.0078125, %v105_v46  ;;  %v119_v49 = vmul.f32 %v2721_v44, %v2721_v44  ;;  %v114_v50 = vmul.f32 0.0078125, %v109_v47  ;;  %v121_v53 = vmul.f32 %v2723_v45, %v2723_v45  ;;  %v257_v47 = vld [vmem:[#allocation2 + $0x2d0] sm:$0xff] }
  0xde   :  { %v2168_v46 = vpack.c.bf16 %v258_v41, %v252_v40  ;;  %v207_v40 = vld [vmem:[#allocation2 + $0x140] sm:$0xff]  ;;  %v213_v41 = vld [vmem:[#allocation2 + $0x170] sm:$0xff] }
  0xdf   :  { %v2728_v51 = vsub.f32 %v2712_v2, %v112_v48  ;;  %123 = vadd.xlane.f32.xlu0 %v119_v49  ;;  %v2731_v52 = vsub.f32 %v2717_v3, %v114_v50  ;;  %v2184_v2 = vpack.c.bf16 %v212_v63, %v206_v61  ;;  %v2186_v3 = vpack.c.bf16 %v211_v1, %v205_v0  ;;  %v254_v48 = vld [vmem:[#allocation2 + $0x2b8] sm:$0xff]  ;;  %v260_v49 = vld [vmem:[#allocation2 + $0x2e8] sm:$0xff] }
  0xe0   :  { %v2170_v50 = vpack.c.bf16 %v257_v47, %v251_v42  ;;  %2169 = vmatprep.subr.bf16.mxu0 %v2168_v46  ;;  %v220_v42 = vld [vmem:[#allocation2 + $0x1a8] sm:$0xff]  ;;  %v2218_v46 = vpack.c.bf16 %v213_v41, %v207_v40 }
  0xe1   :  { %v120_v54 = vmul.f32 %v2728_v51, %v2728_v51  ;;  %v122_v55 = vmul.f32 %v2731_v52, %v2731_v52  ;;  %2185 = vmatprep.subr.bf16.mxu1 %v2184_v2 }
  0xe2   :  { %2187 = vmatpush1.bf16.msra.mxu1 %v2186_v3  ;;  %2171 = vmatpush1.bf16.msra.mxu0 %v2170_v50  ;;  %v225_v50 = vld [vmem:[#allocation2 + $0x1d0] sm:$0xff] }
  0xe3   :  { %127 = vadd.xlane.f32.xlu0 %v121_v53  ;;  %125 = vadd.xlane.f32.xlu1 %v120_v54  ;;  %v2200_v53 = vpack.c.bf16 %v260_v49, %v254_v48  ;;  %v253_v54 = vld [vmem:[#allocation2 + $0x2b0] sm:$0xff]  ;;  %v219_v49 = vld [vmem:[#allocation2 + $0x1a0] sm:$0xff] }
  0xe4   :  { %2189 = vmatprep.subr.bf16.mxu1 %v2188_v14  ;;  %2205 = vmatprep.subr.bf16.mxu0 %v2204_v59  ;;  %v184_v14 = vld [vmem:[#allocation2 + $0x88] sm:$0xff] }
  0xe5   :  { %v244_v59 = vld [vmem:[#allocation2 + $0x268] sm:$0xff] }
  0xe6   :  { %2191 = vmatpush1.bf16.msra.mxu1 %v2190_v15  ;;  %v190_v15 = vld [vmem:[#allocation2 + $0xb8] sm:$0xff] }
  0xe7   :  { %129 = vadd.xlane.f32.xlu1 %v122_v55  ;;  %2193 = vmatprep.subr.bf16.mxu1 %v2192_v26  ;;  %v259_v55 = vld [vmem:[#allocation2 + $0x2e0] sm:$0xff]  ;;  %v2208_v22 = vpack.c.bf16 %v190_v15, %v184_v14 }
  0xe8   :  { %v2202_v57 = vpack.c.bf16 %v259_v55, %v253_v54  ;;  %v238_v54 = vld [vmem:[#allocation2 + $0x238] sm:$0xff]  ;;  %v2222_v55 = vpack.c.bf16 %v225_v50, %v219_v49 }
  0xea   :  { %2195 = vmatpush1.bf16.msra.mxu1 %v2194_v27 }
  0xeb   :  { %2197 = vmatprep.subr.bf16.mxu1 %v2196_v38  ;;  %v2216_v38 = vpack.c.bf16 %v214_v35, %v208_v34 }
  0xee   :  { %2199 = vmatpush1.bf16.msra.mxu1 %v2198_v39 }
  0xef   :  { %2201 = vmatprep.subr.bf16.mxu1 %v2200_v53  ;;  %v232_v53 = vld [vmem:[#allocation2 + $0x208] sm:$0xff] }
  0xf0   :  { %v2224_v56 = vpack.c.bf16 %v238_v54, %v232_v53 }
  0xf2   :  { %2203 = vmatpush1.bf16.msra.mxu1 %v2202_v57  ;;  %v231_v57 = vld [vmem:[#allocation2 + $0x200] sm:$0xff] }
 0x16c   :  { %v124_v60 = vpop.xlane.xlu0 %123 }
 0x16d   :  { %v131_v61 = vmul.f32 0.0078125, %v124_v60  ;;  %v250_v60 = vld [vmem:[#allocation2 + $0x298] sm:$0xff] }
 0x16f   :  { %v135_v62 = vadd.f32 1e-05, %v131_v61  ;;  %v2226_v61 = vpack.c.bf16 %v237_v58, %v231_v57 }
 0x170   :  { %v126_v63 = vpop.xlane.xlu1 %125  ;;  %v128_v0 = vpop.xlane.xlu0 %127 }
 0x171   :  { %2411 = vrsqrt.f32 %v135_v62  ;;  %v132_v1 = vmul.f32 0.0078125, %v126_v63  ;;  %v133_v2 = vmul.f32 0.0078125, %v128_v0  ;;  %v2228_v62 = vpack.c.bf16 %v250_v60, %v244_v59  ;;  %v243_v63 = vld [vmem:[#allocation2 + $0x260] sm:$0xff]  ;;  %v249_v0 = vld [vmem:[#allocation2 + $0x290] sm:$0xff] }
 0x173   :  { %v136_v3 = vadd.f32 1e-05, %v132_v1  ;;  %v137_v4 = vadd.f32 1e-05, %v133_v2  ;;  %v256_v1 = vld [vmem:[#allocation2 + $0x2c8] sm:$0xff]  ;;  %v262_v2 = vld [vmem:[#allocation2 + $0x2f8] sm:$0xff] }
 0x174   :  { %v130_v5 = vpop.xlane.xlu1 %129 }
 0x175   :  { %2413 = vrsqrt.f32 %v136_v3  ;;  %v134_v6 = vmul.f32 0.0078125, %v130_v5  ;;  %v2230_v3 = vpack.c.bf16 %v249_v0, %v243_v63  ;;  %v255_v5 = vld [vmem:[#allocation2 + $0x2c0] sm:$0xff] }
 0x176   :  { %2415 = vrsqrt.f32 %v137_v4  ;;  %v2232_v4 = vpack.c.bf16 %v262_v2, %v256_v1 }
 0x177   :  { %v138_v7 = vadd.f32 1e-05, %v134_v6  ;;  %v261_v6 = vld [vmem:[#allocation2 + $0x2f0] sm:$0xff] }
 0x179   :  { %2417 = vrsqrt.f32 %v138_v7  ;;  %v2234_v7 = vpack.c.bf16 %v261_v6, %v255_v5 }
 0x17b   :  { %v2412_v8 = vpop.eup %2411 }
 0x17c   :  { %v143_v10 = vmul.f32 %v2412_v8, %v2721_v44  ;;  %v196_v44 = vld [vmem:[#allocation2 + $0xe8] sm:$0xff] }
 0x17d   :  { %v2212_v30 = vpack.c.bf16 %v202_v25, %v196_v44 }
 0x17e   :  { %v153_v16 = vmul.f32 %v1878_v9, %v143_v10 }
 0x17f   :  { %v2414_v17 = vpop.eup %2413 }
 0x180   :  { %v2416_v20 = vpop.eup %2415  ;;  %v2748_v21 = vadd.f32 %v1879_v13, %v153_v16  ;;  %v144_v23 = vmul.f32 %v2414_v17, %v2728_v51 }
 0x181   :  { %v145_v26 = vmul.f32 %v2416_v20, %v2723_v45 }
 0x182   :  { %328 = vmatmul.mubr.f32.vlgmr.msra.gmra.mrb[0].mxu0 %v2748_v21  ;;  %417 = vmatmul.mubr.f32.vlgmr.msra.gmra.mrb[0].mxu1 %v2748_v21  ;;  %v154_v27 = vmul.f32 %v1878_v9, %v144_v23 }
 0x183   :  { %v2418_v28 = vpop.eup %2417  ;;  %2207 = vmatpush1.bf16.msra.mxu0 %v2206_v18  ;;  %333 = vmatprep.mubr.f32.mxu0 %v2583_v43  ;;  %v155_v31 = vmul.f32 %v1878_v9, %v145_v26 }
 0x184   :  { %422 = vmatprep.mubr.f32.mxu1 %v2583_v43  ;;  %2209 = vmatprep.subr.bf16.mxu0 %v2208_v22  ;;  %v2756_v51 = vadd.f32 %v1879_v13, %v154_v27  ;;  %v146_v45 = vmul.f32 %v2418_v28, %v2731_v52  ;;  %v226_v52 = vld [vmem:[#allocation2 + $0x1d8] sm:$0xff] }
 0x185   :  { %v165_v37 = vadd.f32 %v1879_v13, %v155_v31  ;;  %v2220_v48 = vpack.c.bf16 %v226_v52, %v220_v42 }
 0x186   :  { %334 = vmatmul.mubr.f32.gmra.mrb[2].mxu0 %v2756_v51  ;;  %423 = vmatmul.mubr.f32.gmra.mrb[2].mxu1 %v2756_v51  ;;  %v156_v39 = vmul.f32 %v1878_v9, %v146_v45 }
 0x187   :  { %2211 = vmatpush1.bf16.msra.mxu0 %v2210_v29  ;;  %339 = vmatprep.mubr.f32.mxu0 %v2583_v43 }
 0x188   :  { %428 = vmatprep.mubr.f32.mxu1 %v2583_v43  ;;  %2213 = vmatprep.subr.bf16.mxu0 %v2212_v30  ;;  %v166_v47 = vadd.f32 %v1879_v13, %v156_v39 }
 0x18a   :  { %340 = vmatmul.mubr.f32.gmra.mrb[4].mxu0 %v165_v37  ;;  %429 = vmatmul.mubr.f32.gmra.mrb[4].mxu1 %v165_v37 }
 0x18b   :  { %2215 = vmatpush1.bf16.msra.mxu0 %v2214_v36  ;;  %345 = vmatprep.mubr.f32.mxu0 %v2583_v43 }
 0x18c   :  { %434 = vmatprep.mubr.f32.mxu1 %v2583_v43  ;;  %2217 = vmatprep.subr.bf16.mxu0 %v2216_v38 }
 0x18e   :  { %346 = vmatmul.mubr.f32.gmra.mrb[6].mxu0 %v166_v47  ;;  %435 = vmatmul.mubr.f32.gmra.mrb[6].mxu1 %v166_v47 }
 0x18f   :  { %2219 = vmatpush1.bf16.msra.mxu0 %v2218_v46  ;;  %505 = vmatprep.mubr.f32.mxu0 %v2583_v43 }
 0x190   :  { %2221 = vmatprep.subr.bf16.mxu0 %v2220_v48 }
 0x193   :  { %2223 = vmatpush1.bf16.msra.mxu0 %v2222_v55 }
 0x194   :  { %2225 = vmatprep.subr.bf16.mxu0 %v2224_v56 }
 0x197   :  { %2227 = vmatpush1.bf16.msra.mxu0 %v2226_v61 }
 0x198   :  { %2229 = vmatprep.subr.bf16.mxu0 %v2228_v62 }
 0x19b   :  { %2231 = vmatpush1.bf16.msra.mxu0 %v2230_v3 }
 0x19c   :  { %2233 = vmatprep.subr.bf16.mxu0 %v2232_v4 }
 0x19f   :  { %2235 = vmatpush1.bf16.msra.mxu0 %v2234_v7 }
 0x1a2   :  { %506 = vmatmul.mubr.f32.vlgmr.msra.gmra.mrb[8].mxu0 %v2748_v21 }
 0x1a3   :  { %511 = vmatprep.mubr.f32.mxu0 %v2583_v43 }
 0x1a6   :  { %512 = vmatmul.mubr.f32.gmra.mrb[10].mxu0 %v2756_v51 }
 0x1a7   :  { %517 = vmatprep.mubr.f32.mxu0 %v2583_v43 }
 0x1aa   :  { %518 = vmatmul.mubr.f32.gmra.mrb[12].mxu0 %v165_v37 }
 0x1ab   :  { %523 = vmatprep.mubr.f32.mxu0 %v2583_v43 }
 0x1ae   :  { %524 = vmatmul.mubr.f32.gmra.mrb[14].mxu0 %v166_v47 }
 0x255   :  { %v329_v8 = vpop.f32.mrb[0].mxu0  ;;  %v418_v9 = vpop.f32.mrb[0].mxu1 }
 0x256   :  { %v530_v10 = vmul.f32 0.088388346, %v329_v8  ;;  %v2771_v11 = vpop.f32.mrb[1].mxu0  ;;  %v420_v12 = vpop.f32.mrb[1].mxu1 }
 0x258   :  { %2012 = vmatprep.mubr.f32.mxu1 %v530_v10 }
 0x259   :  { %v335_v13 = vpop.f32.mrb[2].mxu0  ;;  %v424_v14 = vpop.f32.mrb[2].mxu1 }
 0x25a   :  { %v2236_v15 = vpack.c.bf16 %v424_v14, %v418_v9  ;;  %v2773_v16 = vpop.f32.mrb[3].mxu0  ;;  %v426_v17 = vpop.f32.mrb[3].mxu1  ;;  %v531_v25 = vmul.f32 0.088388346, %v335_v13  ;;  %v907_v9 = vmul.f32 0.088388346, %v2771_v11 }
 0x25b   :  { %v2775_v18 = vpack.c.bf16 %v426_v17, %v420_v12  ;;  %v908_v10 = vmul.f32 0.088388346, %v2773_v16 }
 0x25c   :  { %2237 = vmatprep.subr.bf16.mxu1 %v2236_v15 }
 0x25d   :  { %v341_v19 = vpop.f32.mrb[4].mxu0  ;;  %v430_v20 = vpop.f32.mrb[4].mxu1  ;;  %2239 = vmatpush3.bf16.xpose.msra.mxu1 %v2236_v15 }
 0x25e   :  { %v343_v21 = vpop.f32.mrb[5].mxu0  ;;  %v432_v22 = vpop.f32.mrb[5].mxu1  ;;  %v532_v29 = vmul.f32 0.088388346, %v341_v19 }
 0x25f   :  { %v909_v23 = vmul.f32 0.088388346, %v343_v21 }
 0x261   :  { %v347_v24 = vpop.f32.mrb[6].mxu0  ;;  %v436_v44 = vpop.f32.mrb[6].mxu1  ;;  %2047 = vmatprep.mubr.f32.mxu0 %v909_v23 }
 0x262   :  { %v2240_v26 = vpack.c.bf16 %v436_v44, %v430_v20  ;;  %v349_v27 = vpop.f32.mrb[7].mxu0  ;;  %v438_v28 = vpop.f32.mrb[7].mxu1  ;;  %v533_v51 = vmul.f32 0.088388346, %v347_v24 }
 0x263   :  { %v2256_v30 = vpack.c.bf16 %v438_v28, %v432_v22  ;;  %v910_v31 = vmul.f32 0.088388346, %v349_v27 }
 0x264   :  { %2013 = vmatmul.mubr.f32.vlgmr.msra.gmra.mrb[8].mxu1 %v531_v25  ;;  %2241 = vmatprep.subr.bf16.mxu1 %v2240_v26 }
 0x265   :  { %2243 = vmatpush3.bf16.xpose.msra.mxu1 %v2240_v26  ;;  %2019 = vmatprep.mubr.f32.mxu1 %v532_v29 }
 0x266   :  { %2257 = vmatprep.subr.bf16.mxu0 %v2256_v30 }
 0x267   :  { %2259 = vmatpush3.bf16.xpose.msra.mxu0 %v2256_v30 }
 0x26c   :  { %2020 = vmatmul.mubr.f32.vlgmr.msra.gmra.mrb[10].mxu1 %v533_v51 }
 0x26e   :  { %2048 = vmatmul.mubr.f32.vlgmr.msra.gmra.mrb[16].mxu0 %v910_v31 }
 0x275   :  { %v507_v32 = vpop.f32.mrb[8].mxu0 }
 0x276   :  { %v509_v33 = vpop.f32.mrb[9].mxu0 }
 0x279   :  { %v513_v45 = vpop.f32.mrb[10].mxu0 }
 0x27a   :  { %v2244_v34 = vpack.c.bf16 %v513_v45, %v507_v32  ;;  %v515_v35 = vpop.f32.mrb[11].mxu0 }
 0x27b   :  { %v2260_v36 = vpack.c.bf16 %v515_v35, %v509_v33 }
 0x27c   :  { %2245 = vmatprep.subr.bf16.mxu1 %v2244_v34 }
 0x27d   :  { %v519_v37 = vpop.f32.mrb[12].mxu0  ;;  %2247 = vmatpush3.bf16.msra.mxu1 %v2244_v34  ;;  %2261 = vmatprep.subr.bf16.mxu0 %v2260_v36 }
 0x27e   :  { %v521_v38 = vpop.f32.mrb[13].mxu0  ;;  %2263 = vmatpush3.bf16.msra.mxu0 %v2260_v36 }
 0x281   :  { %v525_v39 = vpop.f32.mrb[14].mxu0 }
 0x282   :  { %v2248_v40 = vpack.c.bf16 %v525_v39, %v519_v37  ;;  %v527_v41 = vpop.f32.mrb[15].mxu0 }
 0x283   :  { %v2264_v42 = vpack.c.bf16 %v527_v41, %v521_v38 }
 0x284   :  { %2249 = vmatprep.subr.bf16.mxu1 %v2248_v40 }
 0x337   :  { %v2014_v52 = vpop.f32.mrb[8].mxu1 }
 0x338   :  { %v600_v46 = vpop.f32.mrb[9].mxu1  ;;  %v688_v47 = vsel %vm684_vm0, %v2014_v52, -inf }
 0x339   :  { %689 = vmax.xlane.f32.xlu1 %v688_v47  ;;  %v685_v48 = vsel %vm684_vm0, %v600_v46, -inf }
 0x33a   :  { %686 = vmax.xlane.f32.xlu0 %v685_v48  ;;  %v1270_v48 = vld [vmem:[#allocation4 + $0x98] sm:$0xff] }
 0x33f   :  { %v2021_v49 = vpop.f32.mrb[10].mxu1 }
 0x340   :  { %v675_v50 = vpop.f32.mrb[11].mxu1  ;;  %v694_v53 = vsel %vm684_vm0, %v2021_v49, -inf }
 0x341   :  { %v2780_v54 = vpop.f32.mrb[16].mxu0  ;;  %695 = vmax.xlane.f32.xlu1 %v694_v53  ;;  %v691_v55 = vsel %vm684_vm0, %v675_v50, -inf  ;;  %v1272_v53 = vld [vmem:[#allocation4 + $0xa8] sm:$0xff] }
 0x342   :  { %v1052_v56 = vpop.f32.mrb[17].mxu0  ;;  %692 = vmax.xlane.f32.xlu0 %v691_v55  ;;  %v1070_v16 = vsel %vm684_vm0, %v2780_v54, -inf  ;;  %v1273_v55 = vld [vmem:[#allocation4 + $0xb0] sm:$0xff] }
 0x343   :  { %v1067_v20 = vsel %vm684_vm0, %v1052_v56, -inf }
 0x3c6   :  { %v690_v57 = vpop.xlane.xlu1 %689 }
 0x3c7   :  { %v698_v58 = vsub.f32 %v2014_v52, %v690_v57  ;;  %v687_v59 = vpop.xlane.xlu0 %686  ;;  %v1268_v52 = vld [vmem:[#allocation4 + $0x88] sm:$0xff] }
 0x3c8   :  { %v697_v60 = vsub.f32 %v600_v46, %v687_v59  ;;  %v1269_v46 = vld [vmem:[#allocation4 + $0x90] sm:$0xff]  ;;  %v1276_v59 = vld [vmem:[#allocation4 + $0xc8] sm:$0xff] }
 0x3c9   :  { %v703_v61 = vmul.f32 1.442695, %v698_v58  ;;  %v1275_v58 = vld [vmem:[#allocation4 + $0xc0] sm:$0xff] }
 0x3ca   :  { %v701_v62 = vmul.f32 1.442695, %v697_v60  ;;  %v2284_v60 = vpack.c.bf16 %v1276_v59, %v1275_v58 }
 0x3cc   :  { %2419 = vpow2.f32 %v701_v62  ;;  %v1278_v62 = vld [vmem:[#allocation4 + $0xd8] sm:$0xff] }
 0x3cd   :  { %2421 = vpow2.f32 %v703_v61  ;;  %v1277_v61 = vld [vmem:[#allocation4 + $0xd0] sm:$0xff] }
 0x3ce   :  { %v696_v63 = vpop.xlane.xlu1 %695 }
 0x3cf   :  { %v700_v0 = vsub.f32 %v2021_v49, %v696_v63  ;;  %v693_v1 = vpop.xlane.xlu0 %692  ;;  %v2272_v49 = vpack.c.bf16 %v1270_v48, %v1269_v46  ;;  %v2288_v63 = vpack.c.bf16 %v1278_v62, %v1277_v61  ;;  %v904_v48 = vld [vmem:[#allocation4 + $0x68] sm:$0xff]  ;;  %v1888_v62 = vld [vmem:[%s2970_s5] ss:$0 sm:$0xff] }
 0x3d0   :  { %v699_v2 = vsub.f32 %v675_v50, %v693_v1  ;;  %v1271_v50 = vld [vmem:[#allocation4 + $0xa0] sm:$0xff]  ;;  %v1280_v1 = vld [vmem:[#allocation4 + $0xe8] sm:$0xff] }
 0x3d1   :  { %v707_v3 = vmul.f32 1.442695, %v700_v0  ;;  %v1279_v0 = vld [vmem:[#allocation4 + $0xe0] sm:$0xff] }
 0x3d2   :  { %v705_v4 = vmul.f32 1.442695, %v699_v2  ;;  %v2292_v2 = vpack.c.bf16 %v1280_v1, %v1279_v0 }
 0x3d4   :  { %2423 = vpow2.f32 %v705_v4  ;;  %v1282_v4 = vld [vmem:[#allocation4 + $0xf8] sm:$0xff] }
 0x3d5   :  { %2425 = vpow2.f32 %v707_v3  ;;  %v1281_v3 = vld [vmem:[#allocation4 + $0xf0] sm:$0xff] }
 0x3d6   :  { %v2783_v5 = vpop.eup %2419 }
 0x3d7   :  { %v2785_v6 = vpop.eup %2421  ;;  %2026 = vmatprep.mubr.msk.f32.mxu1 %vm684_vm0, %v2783_v5  ;;  %v709_v39 = vsel %vm684_vm0, %v2783_v5, 0.0  ;;  %v2296_v5 = vpack.c.bf16 %v1282_v4, %v1281_v3 }
 0x3d8   :  { %2027 = vmatmul.mubr.msk.f32.vlgmr.msra.gmra.mrb[12].mxu1 %vm684_vm0, %v2785_v6  ;;  %v712_v38 = vsel %vm684_vm0, %v2785_v6, 0.0  ;;  %v891_v6 = vld [vmem:[#allocation4] sm:$0xff] }
 0x3d9   :  { %2251 = vmatpush3.bf16.msra.mxu1 %v2248_v40 }
 0x3da   :  { %2253 = vmatprep.subr.bf16.mxu1 %v2775_v18 }
 0x3de   :  { %v2792_v7 = vpop.eup %2423 }
 0x3df   :  { %v2426_v8 = vpop.eup %2425  ;;  %2033 = vmatprep.mubr.msk.f32.mxu1 %vm684_vm0, %v2792_v7  ;;  %v715_v41 = vsel %vm684_vm0, %v2792_v7, 0.0  ;;  %v892_v7 = vld [vmem:[#allocation4 + $0x8] sm:$0xff] }
 0x3e0   :  { %2034 = vmatmul.mubr.msk.f32.vlgmr.msra.gmra.mrb[14].mxu1 %vm684_vm0, %v2426_v8  ;;  %v718_v40 = vsel %vm684_vm0, %v2426_v8, 0.0  ;;  %v2300_v8 = vpack.c.bf16 %v892_v7, %v891_v6 }
 0x3e1   :  { %2040 = vmatprep.mubr.f32.mxu1 %v907_v9 }
 0x3e2   :  { %2255 = vmatpush3.bf16.xpose.msra.mxu1 %v2775_v18 }
 0x3e3   :  { %2265 = vmatprep.subr.bf16.mxu1 %v2264_v42 }
 0x3e9   :  { %2041 = vmatmul.mubr.f32.vlgmr.msra.gmra.mrb[16].mxu1 %v908_v10 }
 0x3ea   :  { %2267 = vmatpush3.bf16.msra.mxu1 %v2264_v42  ;;  %v1267_v42 = vld [vmem:[#allocation4 + $0x80] sm:$0xff] }
 0x3eb   :  { %v2268_v47 = vpack.c.bf16 %v1268_v52, %v1267_v42  ;;  %v902_v42 = vld [vmem:[#allocation4 + $0x58] sm:$0xff] }
 0x3ed   :  { %2269 = vmatprep.subr.bf16.mxu0 %v2268_v47 }
 0x4ab   :  { %v2800_v12 = vpop.f32.mrb[12].mxu1 }
 0x4ac   :  { %v2802_v13 = vpop.f32.mrb[13].mxu1 }
 0x4b3   :  { %v2804_v14 = vpop.f32.mrb[14].mxu1 }
 0x4b4   :  { %v2806_v11 = vpop.f32.mrb[15].mxu1 }
 0x4bc   :  { %v2042_v15 = vpop.f32.mrb[16].mxu1 }
 0x4bd   :  { %v977_v17 = vpop.f32.mrb[17].mxu1  ;;  %v1064_v19 = vsel %vm684_vm0, %v2042_v15, -inf }
 0x4be   :  { %1065 = vmax.xlane.f32.xlu1 %v1064_v19  ;;  %v1061_v18 = vsel %vm684_vm0, %v977_v17, -inf }
 0x4bf   :  { %1062 = vmax.xlane.f32.xlu0 %v1061_v18 }
 0x4c2   :  { %1071 = vmax.xlane.f32.xlu1 %v1070_v16  ;;  %v893_v16 = vld [vmem:[#allocation4 + $0x10] sm:$0xff] }
 0x4c3   :  { %1068 = vmax.xlane.f32.xlu0 %v1067_v20  ;;  %v894_v20 = vld [vmem:[#allocation4 + $0x18] sm:$0xff] }
 0x54b   :  { %v1066_v21 = vpop.xlane.xlu1 %1065 }
 0x54c   :  { %v1074_v22 = vsub.f32 %v2042_v15, %v1066_v21  ;;  %v1063_v23 = vpop.xlane.xlu0 %1062 }
 0x54d   :  { %v1073_v24 = vsub.f32 %v977_v17, %v1063_v23 }
 0x54e   :  { %v1079_v44 = vmul.f32 1.442695, %v1074_v22 }
 0x54f   :  { %v1077_v25 = vmul.f32 1.442695, %v1073_v24  ;;  %v1072_v26 = vpop.xlane.xlu1 %1071 }
 0x550   :  { %2427 = vpow2.f32 %v1079_v44  ;;  %v1076_v27 = vsub.f32 %v2780_v54, %v1072_v26  ;;  %v1069_v28 = vpop.xlane.xlu0 %1068  ;;  %v2276_v54 = vpack.c.bf16 %v1272_v53, %v1271_v50  ;;  %v905_v53 = vld [vmem:[#allocation4 + $0x70] sm:$0xff] }
 0x551   :  { %2429 = vpow2.f32 %v1077_v25  ;;  %v1075_v29 = vsub.f32 %v1052_v56, %v1069_v28  ;;  %v1274_v56 = vld [vmem:[#allocation4 + $0xb8] sm:$0xff]  ;;  %v2304_v25 = vpack.c.bf16 %v894_v20, %v893_v16  ;;  %v895_v28 = vld [vmem:[#allocation4 + $0x20] sm:$0xff]  ;;  %v1536_v20 = vld [vmem:[#allocation6 + $0x10] sm:$0xff] }
 0x552   :  { %v1083_v30 = vmul.f32 1.442695, %v1076_v27  ;;  %v2280_v57 = vpack.c.bf16 %v1274_v56, %v1273_v55 }
 0x553   :  { %v1081_v51 = vmul.f32 1.442695, %v1075_v29  ;;  %v896_v29 = vld [vmem:[#allocation4 + $0x28] sm:$0xff] }
 0x554   :  { %2431 = vpow2.f32 %v1083_v30 }
 0x555   :  { %2433 = vpow2.f32 %v1081_v51 }
 0x55a   :  { %v2428_v31 = vpop.eup %2427 }
 0x55b   :  { %v2430_v32 = vpop.eup %2429  ;;  %v1088_v33 = vsel %vm684_vm0, %v2428_v31, 0.0 }
 0x55c   :  { %2054 = vmatprep.mubr.msk.f32.mxu0 %vm684_vm0, %v2430_v32  ;;  %1089 = vadd.xlane.f32.xlu1 %v1088_v33  ;;  %v1085_v45 = vsel %vm684_vm0, %v2430_v32, 0.0 }
 0x55d   :  { %2055 = vmatmul.mubr.msk.f32.vlgmr.msra.gmra.mrb[18].mxu0 %vm684_vm0, %v2428_v31  ;;  %1086 = vadd.xlane.f32.xlu0 %v1085_v45  ;;  %v2308_v45 = vpack.c.bf16 %v896_v29, %v895_v28 }
 0x55e   :  { %v2432_v34 = vpop.eup %2431  ;;  %2271 = vmatpush3.bf16.msra.mxu0 %v2268_v47 }
 0x55f   :  { %v2434_v35 = vpop.eup %2433  ;;  %v1094_v36 = vsel %vm684_vm0, %v2432_v34, 0.0  ;;  %2273 = vmatprep.subr.bf16.mxu0 %v2272_v49 }
 0x560   :  { %1095 = vadd.xlane.f32.xlu1 %v1094_v36  ;;  %2061 = vmatprep.mubr.msk.f32.mxu1 %vm684_vm0, %v2434_v35  ;;  %v1091_v37 = vsel %vm684_vm0, %v2434_v35, 0.0  ;;  %v897_v35 = vld [vmem:[#allocation4 + $0x30] sm:$0xff]  ;;  %v898_v36 = vld [vmem:[#allocation4 + $0x38] sm:$0xff] }
 0x561   :  { %2062 = vmatmul.mubr.msk.f32.vlgmr.msra.gmra.mrb[18].mxu1 %vm684_vm0, %v2432_v34  ;;  %1092 = vadd.xlane.f32.xlu0 %v1091_v37  ;;  %v2312_v37 = vpack.c.bf16 %v898_v36, %v897_v35 }
 0x562   :  { %1642 = vmatprep.mubr.f32.mxu1 %v2583_v43  ;;  %2275 = vmatpush3.bf16.msra.mxu0 %v2272_v49 }
 0x563   :  { %2277 = vmatprep.subr.bf16.mxu0 %v2276_v54 }
 0x564   :  { %713 = vadd.xlane.f32.xlu1 %v712_v38  ;;  %v899_v38 = vld [vmem:[#allocation4 + $0x40] sm:$0xff] }
 0x565   :  { %710 = vadd.xlane.f32.xlu0 %v709_v39  ;;  %v900_v39 = vld [vmem:[#allocation4 + $0x48] sm:$0xff] }
 0x566   :  { %2279 = vmatpush3.bf16.msra.mxu0 %v2276_v54  ;;  %v906_v54 = vld [vmem:[#allocation4 + $0x78] sm:$0xff] }
 0x567   :  { %2281 = vmatprep.subr.bf16.mxu0 %v2280_v57  ;;  %v2328_v55 = vpack.c.bf16 %v906_v54, %v905_v53  ;;  %v1546_v53 = vld [vmem:[#allocation6 + $0x60] sm:$0xff]  ;;  %v1548_v54 = vld [vmem:[#allocation6 + $0x70] sm:$0xff] }
 0x568   :  { %719 = vadd.xlane.f32.xlu1 %v718_v40  ;;  %v2316_v40 = vpack.c.bf16 %v900_v39, %v899_v38 }
 0x569   :  { %716 = vadd.xlane.f32.xlu0 %v715_v41  ;;  %v901_v41 = vld [vmem:[#allocation4 + $0x50] sm:$0xff] }
 0x56a   :  { %2283 = vmatpush3.bf16.msra.mxu0 %v2280_v57  ;;  %v2320_v46 = vpack.c.bf16 %v902_v42, %v901_v41 }
 0x56b   :  { %2285 = vmatprep.subr.bf16.mxu0 %v2284_v60 }
 0x56e   :  { %2287 = vmatpush3.bf16.msra.mxu0 %v2284_v60 }
 0x56f   :  { %2289 = vmatprep.subr.bf16.mxu0 %v2288_v63 }
 0x572   :  { %2291 = vmatpush3.bf16.msra.mxu0 %v2288_v63 }
 0x573   :  { %2293 = vmatprep.subr.bf16.mxu0 %v2292_v2 }
 0x576   :  { %2295 = vmatpush3.bf16.msra.mxu0 %v2292_v2 }
 0x577   :  { %2297 = vmatprep.subr.bf16.mxu0 %v2296_v5 }
 0x57a   :  { %2299 = vmatpush3.bf16.msra.mxu0 %v2296_v5 }
 0x57b   :  { %2301 = vmatprep.subr.bf16.mxu0 %v2300_v8 }
 0x5e9   :  { %v1090_v15 = vpop.xlane.xlu1 %1089 }
 0x5ea   :  { %v1087_v9 = vpop.xlane.xlu0 %1086 }
 0x5eb   :  { %2435 = vrcp.f32 %v1087_v9 }
 0x5ec   :  { %2437 = vrcp.f32 %v1090_v15 }
 0x5ed   :  { %v1096_v19 = vpop.xlane.xlu1 %1095 }
 0x5ee   :  { %v1093_v10 = vpop.xlane.xlu0 %1092 }
 0x5ef   :  { %2439 = vrcp.f32 %v1093_v10  ;;  %v2478_v10 = vld [vmem:[%s2965_s0 + $0x10] sm:$0xff] }
 0x5f1   :  { %v714_v52 = vpop.xlane.xlu1 %713 }
 0x5f2   :  { %v711_v17 = vpop.xlane.xlu0 %710 }
 0x5f3   :  { %2441 = vrcp.f32 %v711_v17  ;;  %v1535_v17 = vld [vmem:[#allocation6 + $0x8] sm:$0xff] }
 0x5f4   :  { %2443 = vrcp.f32 %v1096_v19  ;;  %v1537_v19 = vld [vmem:[#allocation6 + $0x18] sm:$0xff] }
 0x5f5   :  { %v2436_v21 = vpop.eup %2435  ;;  %2445 = vrcp.f32 %v714_v52  ;;  %v720_v49 = vpop.xlane.xlu1 %719  ;;  %v2332_v16 = vpack.c.bf16 %v1537_v19, %v1535_v17 }
 0x5f6   :  { %v2438_v23 = vpop.eup %2437  ;;  %v717_v47 = vpop.xlane.xlu0 %716 }
 0x5f7   :  { %2447 = vrcp.f32 %v717_v47  ;;  %2333 = vmatprep.subr.bf16.mxu1 %v2332_v16  ;;  %v1564_v16 = vld [vmem:[#allocation6 + $0xf0] sm:$0xff] }
 0x5f8   :  { %2449 = vrcp.f32 %v720_v49  ;;  %v1549_v49 = vld [vmem:[#allocation6 + $0x78] sm:$0xff] }
 0x5f9   :  { %v2440_v26 = vpop.eup %2439 }
 0x5fd   :  { %v2442_v30 = vpop.eup %2441 }
 0x5fe   :  { %v2444_v31 = vpop.eup %2443  ;;  %v887_v34 = vmul.f32 %v2442_v30, %v2802_v13  ;;  %v903_v13 = vld [vmem:[#allocation4 + $0x60] sm:$0xff] }
 0x5ff   :  { %v2324_v50 = vpack.c.bf16 %v904_v48, %v903_v13  ;;  %v2446_v56 = vpop.eup %2445  ;;  %v1542_v30 = vld [vmem:[#allocation6 + $0x40] sm:$0xff]  ;;  %v1547_v48 = vld [vmem:[#allocation6 + $0x68] sm:$0xff] }
 0x600   :  { %v888_v58 = vmul.f32 %v2446_v56, %v2800_v12  ;;  %v2475_v12 = vld [vmem:[%s2965_s0 + $0x8] sm:$0xff] }
 0x601   :  { %v2448_v57 = vpop.eup %2447  ;;  %v1551_v56 = vld [vmem:[#allocation6 + $0x88] sm:$0xff] }
 0x602   :  { %v2450_v59 = vpop.eup %2449  ;;  %v889_v60 = vmul.f32 %v2448_v57, %v2806_v11  ;;  %v2476_v11 = vld [vmem:[%s2965_s0] sm:$0xff]  ;;  %v1553_v57 = vld [vmem:[#allocation6 + $0x98] sm:$0xff] }
 0x603   :  { %v890_v61 = vmul.f32 %v2450_v59, %v2804_v14  ;;  %v1550_v59 = vld [vmem:[#allocation6 + $0x80] sm:$0xff] }
 0x630   :  { %v2056_v18 = vpop.f32.mrb[18].mxu0 }
 0x631   :  { %v1169_v22 = vpop.f32.mrb[19].mxu0  ;;  %v1264_v44 = vmul.f32 %v2438_v23, %v2056_v18  ;;  %v1534_v18 = vld [vmem:[#allocation6] sm:$0xff] }
 0x632   :  { %v1263_v24 = vmul.f32 %v2436_v21, %v1169_v22  ;;  %v1539_v21 = vld [vmem:[#allocation6 + $0x28] sm:$0xff]  ;;  %v1541_v22 = vld [vmem:[#allocation6 + $0x38] sm:$0xff]  ;;  %v2334_v23 = vpack.c.bf16 %v1536_v20, %v1534_v18  ;;  %v1562_v18 = vld [vmem:[#allocation6 + $0xe0] sm:$0xff] }
 0x633   :  { %v2362_v20 = vpack.c.bf16 %v1564_v16, %v1562_v18  ;;  %v1747_v18 = vld [vmem:[#allocation7 + $0x40] sm:$0xff]  ;;  %v1748_v16 = vld [vmem:[#allocation7 + $0x48] sm:$0xff] }
 0x634   :  { %v2063_v27 = vpop.f32.mrb[18].mxu1  ;;  %2096 = vmatprep.mubr.f32.mxu0 %v1263_v24  ;;  %v2336_v24 = vpack.c.bf16 %v1541_v22, %v1539_v21  ;;  %2335 = vmatpush1.bf16.msra.mxu1 %v2334_v23 }
 0x635   :  { %v1250_v51 = vpop.f32.mrb[19].mxu1  ;;  %2097 = vmatmul.mubr.f32.vlgmr.msra.gmra.mrb[20].mxu0 %v1264_v44  ;;  %v1266_v33 = vmul.f32 %v2444_v31, %v2063_v27  ;;  %v1538_v44 = vld [vmem:[#allocation6 + $0x20] sm:$0xff]  ;;  %v1545_v27 = vld [vmem:[#allocation6 + $0x58] sm:$0xff] }
 0x636   :  { %v1265_v32 = vmul.f32 %v2440_v26, %v1250_v51  ;;  %2303 = vmatpush3.bf16.msra.mxu0 %v2300_v8  ;;  %v2477_v8 = vld [vmem:[%s2965_s0 + $0x18] sm:$0xff]  ;;  %v1543_v26 = vld [vmem:[#allocation6 + $0x48] sm:$0xff]  ;;  %2337 = vmatprep.subr.bf16.mxu1 %v2336_v24  ;;  %v1544_v51 = vld [vmem:[#allocation6 + $0x50] sm:$0xff] }
 0x637   :  { %2305 = vmatprep.subr.bf16.mxu0 %v2304_v25  ;;  %v2340_v29 = vpack.c.bf16 %v1545_v27, %v1543_v26  ;;  %v2342_v31 = vpack.c.bf16 %v1544_v51, %v1542_v30 }
 0x638   :  { %2099 = vmatprep.mubr.f32.mxu0 %v1265_v32 }
 0x639   :  { %2100 = vmatmul.mubr.f32.gmra.mrb[22].mxu0 %v1266_v33 }
 0x63a   :  { %2307 = vmatpush3.bf16.msra.mxu0 %v2304_v25  ;;  %2134 = vmatprep.mubr.f32.mxu0 %v887_v34  ;;  %v1540_v25 = vld [vmem:[#allocation6 + $0x30] sm:$0xff] }
 0x63b   :  { %2309 = vmatprep.subr.bf16.mxu0 %v2308_v45  ;;  %v2338_v28 = vpack.c.bf16 %v1540_v25, %v1538_v44 }
 0x63d   :  { %2339 = vmatpush1.bf16.msra.mxu1 %v2338_v28 }
 0x63e   :  { %2311 = vmatpush3.bf16.msra.mxu0 %v2308_v45  ;;  %2341 = vmatprep.subr.bf16.mxu1 %v2340_v29 }
 0x63f   :  { %2313 = vmatprep.subr.bf16.mxu0 %v2312_v37 }
 0x641   :  { %2343 = vmatpush1.bf16.msra.mxu1 %v2342_v31 }
 0x642   :  { %2315 = vmatpush3.bf16.msra.mxu0 %v2312_v37 }
 0x643   :  { %2317 = vmatprep.subr.bf16.mxu0 %v2316_v40 }
 0x646   :  { %2319 = vmatpush3.bf16.msra.mxu0 %v2316_v40 }
 0x647   :  { %2321 = vmatprep.subr.bf16.mxu0 %v2320_v46 }
 0x64a   :  { %2323 = vmatpush3.bf16.msra.mxu0 %v2320_v46 }
 0x64b   :  { %2325 = vmatprep.subr.bf16.mxu0 %v2324_v50 }
 0x64e   :  { %2327 = vmatpush3.bf16.msra.mxu0 %v2324_v50  ;;  %v2344_v50 = vpack.c.bf16 %v1549_v49, %v1547_v48 }
 0x64f   :  { %2329 = vmatprep.subr.bf16.mxu0 %v2328_v55 }
 0x650   :  { %2345 = vmatprep.subr.bf16.mxu1 %v2344_v50 }
 0x652   :  { %2331 = vmatpush3.bf16.msra.mxu0 %v2328_v55  ;;  %v2346_v55 = vpack.c.bf16 %v1548_v54, %v1546_v53  ;;  %v1755_v53 = vld [vmem:[#allocation7 + $0x80] sm:$0xff] }
 0x654   :  { %2347 = vmatpush1.bf16.msra.mxu1 %v2346_v55  ;;  %v1739_v55 = vld [vmem:[#allocation7] sm:$0xff] }
 0x655   :  { %2135 = vmatmul.mubr.f32.vlgmr.msra.gmra.mrb[20].mxu0 %v888_v58  ;;  %v2348_v58 = vpack.c.bf16 %v1553_v57, %v1551_v56  ;;  %v1740_v56 = vld [vmem:[#allocation7 + $0x8] sm:$0xff] }
 0x656   :  { %2137 = vmatprep.mubr.f32.mxu0 %v889_v60  ;;  %v1552_v60 = vld [vmem:[#allocation6 + $0x90] sm:$0xff]  ;;  %v2366_v57 = vpack.c.bf16 %v1740_v56, %v1739_v55 }
 0x657   :  { %2349 = vmatprep.subr.bf16.mxu1 %v2348_v58  ;;  %v1757_v58 = vld [vmem:[#allocation7 + $0x90] sm:$0xff] }
 0x659   :  { %2138 = vmatmul.mubr.f32.gmra.mrb[22].mxu0 %v890_v61  ;;  %v2350_v61 = vpack.c.bf16 %v1552_v60, %v1550_v59  ;;  %v1741_v60 = vld [vmem:[#allocation7 + $0x10] sm:$0xff] }
 0x65b   :  { %2351 = vmatpush1.bf16.msra.mxu1 %v2350_v61  ;;  %v1742_v61 = vld [vmem:[#allocation7 + $0x18] sm:$0xff] }
 0x728   :  { %v2136_v63 = vpop.f32.mrb[20].mxu0 }
 0x729   :  { %v1461_v0 = vadd.f32 %v2136_v63, %v1888_v62  ;;  %v1434_v1 = vpop.f32.mrb[21].mxu0  ;;  %v1557_v63 = vld [vmem:[#allocation6 + $0xb8] sm:$0xff] }
 0x72a   :  { %v1460_v2 = vadd.f32 %v1888_v62, %v1434_v1  ;;  %v1554_v1 = vld [vmem:[#allocation6 + $0xa0] sm:$0xff] }
 0x72b   :  { %v2840_v3 = vadd.f32 %v2475_v12, %v1461_v0 }
 0x72c   :  { %v2845_v14 = vadd.f32 %v2476_v11, %v1460_v2  ;;  %v2139_v4 = vpop.f32.mrb[22].mxu0  ;;  %v1556_v2 = vld [vmem:[#allocation6 + $0xb0] sm:$0xff]  ;;  %v1559_v11 = vld [vmem:[#allocation6 + $0xc8] sm:$0xff] }
 0x72d   :  { %v1463_v5 = vadd.f32 %v2139_v4, %v1888_v62  ;;  %1472 = vadd.xlane.f32.xlu1 %v2840_v3  ;;  %v1444_v6 = vpop.f32.mrb[23].mxu0  ;;  %v2354_v12 = vpack.c.bf16 %v1556_v2, %v1554_v1  ;;  %v1561_v4 = vld [vmem:[#allocation6 + $0xd8] sm:$0xff]  ;;  %v1743_v1 = vld [vmem:[#allocation7 + $0x20] sm:$0xff]  ;;  %v1744_v2 = vld [vmem:[#allocation7 + $0x28] sm:$0xff] }
 0x72e   :  { %v1462_v7 = vadd.f32 %v1888_v62, %v1444_v6  ;;  %1470 = vadd.xlane.f32.xlu0 %v2845_v14  ;;  %v1555_v62 = vld [vmem:[#allocation6 + $0xa8] sm:$0xff]  ;;  %v2356_v6 = vpack.c.bf16 %v1561_v4, %v1559_v11  ;;  %v1761_v11 = vld [vmem:[#allocation7 + $0xb0] sm:$0xff]  ;;  %v1762_v4 = vld [vmem:[#allocation7 + $0xb8] sm:$0xff] }
 0x72f   :  { %v2852_v9 = vadd.f32 %v2477_v8, %v1463_v5  ;;  %v2352_v0 = vpack.c.bf16 %v1557_v63, %v1555_v62  ;;  %v1558_v5 = vld [vmem:[#allocation6 + $0xc0] sm:$0xff]  ;;  %v1563_v8 = vld [vmem:[#allocation6 + $0xe8] sm:$0xff]  ;;  %v2370_v62 = vpack.c.bf16 %v1742_v61, %v1741_v60 }
 0x730   :  { %v2857_v15 = vadd.f32 %v2478_v10, %v1462_v7  ;;  %v1560_v7 = vld [vmem:[#allocation6 + $0xd0] sm:$0xff]  ;;  %v1565_v10 = vld [vmem:[#allocation6 + $0xf8] sm:$0xff]  ;;  %v1759_v63 = vld [vmem:[#allocation7 + $0xa0] sm:$0xff] }
 0x731   :  { %1476 = vadd.xlane.f32.xlu1 %v2852_v9  ;;  %2353 = vmatprep.subr.bf16.mxu1 %v2352_v0  ;;  %v2358_v17 = vpack.c.bf16 %v1560_v7, %v1558_v5  ;;  %v2360_v19 = vpack.c.bf16 %v1565_v10, %v1563_v8  ;;  %v2376_v5 = vpack.c.bf16 %v1762_v4, %v1761_v11  ;;  %v1746_v7 = vld [vmem:[#allocation7 + $0x38] sm:$0xff]  ;;  %v1763_v10 = vld [vmem:[#allocation7 + $0xc0] sm:$0xff] }
 0x732   :  { %1474 = vadd.xlane.f32.xlu0 %v2857_v15  ;;  %2355 = vmatpush1.bf16.msra.mxu1 %v2354_v12  ;;  %v2374_v12 = vpack.c.bf16 %v1744_v2, %v1743_v1 }
 0x733   :  { %2357 = vmatprep.subr.bf16.mxu1 %v2356_v6  ;;  %v1745_v6 = vld [vmem:[#allocation7 + $0x30] sm:$0xff] }
 0x734   :  { %v2378_v8 = vpack.c.bf16 %v1746_v7, %v1745_v6 }
 0x736   :  { %2359 = vmatpush1.bf16.msra.mxu1 %v2358_v17  ;;  %v1764_v17 = vld [vmem:[#allocation7 + $0xc8] sm:$0xff] }
 0x737   :  { %2361 = vmatprep.subr.bf16.mxu1 %v2360_v19  ;;  %v2380_v19 = vpack.c.bf16 %v1764_v17, %v1763_v10 }
 0x73a   :  { %2363 = vmatpush1.bf16.msra.mxu1 %v2362_v20  ;;  %v2382_v20 = vpack.c.bf16 %v1748_v16, %v1747_v18 }
 0x7ba   :  { %v1473_v32 = vpop.xlane.xlu1 %1472 }
 0x7bb   :  { %v1479_v33 = vmul.f32 0.0078125, %v1473_v32  ;;  %v1471_v45 = vpop.xlane.xlu0 %1470 }
 0x7bc   :  { %v1478_v34 = vmul.f32 0.0078125, %v1471_v45 }
 0x7bd   :  { %v2862_v35 = vsub.f32 %v2840_v3, %v1479_v33  ;;  %v1889_v33 = vld [vmem:[%s2971_s6] ss:$0 sm:$0xff] }
 0x7be   :  { %v2865_v36 = vsub.f32 %v2845_v14, %v1478_v34  ;;  %v1477_v37 = vpop.xlane.xlu1 %1476 }
 0x7bf   :  { %v1481_v38 = vmul.f32 0.0078125, %v1477_v37  ;;  %v1475_v39 = vpop.xlane.xlu0 %1474  ;;  %v1487_v40 = vmul.f32 %v2862_v35, %v2862_v35  ;;  %v1890_v37 = vld [vmem:[%s2972_s7] ss:$0 sm:$0xff] }
 0x7c0   :  { %v1480_v41 = vmul.f32 0.0078125, %v1475_v39  ;;  %v1486_v42 = vmul.f32 %v2865_v36, %v2865_v36 }
 0x7c1   :  { %v2872_v52 = vsub.f32 %v2852_v9, %v1481_v38  ;;  %1492 = vadd.xlane.f32.xlu1 %v1487_v40 }
 0x7c2   :  { %v2875_v46 = vsub.f32 %v2857_v15, %v1480_v41  ;;  %1490 = vadd.xlane.f32.xlu0 %v1486_v42 }
 0x7c3   :  { %v1489_v47 = vmul.f32 %v2872_v52, %v2872_v52 }
 0x7c4   :  { %v1488_v13 = vmul.f32 %v2875_v46, %v2875_v46 }
 0x7c5   :  { %1496 = vadd.xlane.f32.xlu1 %v1489_v47 }
 0x7c6   :  { %1494 = vadd.xlane.f32.xlu0 %v1488_v13 }
 0x84e   :  { %v1493_v21 = vpop.xlane.xlu1 %1492 }
 0x84f   :  { %v1499_v22 = vmul.f32 0.0078125, %v1493_v21  ;;  %v1491_v23 = vpop.xlane.xlu0 %1490  ;;  %v1765_v21 = vld [vmem:[#allocation7 + $0xd0] sm:$0xff] }
 0x850   :  { %v1498_v24 = vmul.f32 0.0078125, %v1491_v23 }
 0x851   :  { %v1503_v44 = vadd.f32 1e-05, %v1499_v22  ;;  %v1766_v22 = vld [vmem:[#allocation7 + $0xd8] sm:$0xff] }
 0x852   :  { %v1502_v25 = vadd.f32 1e-05, %v1498_v24  ;;  %v1497_v26 = vpop.xlane.xlu1 %1496  ;;  %v2384_v23 = vpack.c.bf16 %v1766_v22, %v1765_v21  ;;  %v1749_v24 = vld [vmem:[#allocation7 + $0x50] sm:$0xff] }
 0x853   :  { %2451 = vrsqrt.f32 %v1503_v44  ;;  %v1501_v27 = vmul.f32 0.0078125, %v1497_v26  ;;  %v1495_v28 = vpop.xlane.xlu0 %1494  ;;  %v1750_v44 = vld [vmem:[#allocation7 + $0x58] sm:$0xff]  ;;  %v1767_v26 = vld [vmem:[#allocation7 + $0xe0] sm:$0xff] }
 0x854   :  { %2453 = vrsqrt.f32 %v1502_v25  ;;  %v1500_v29 = vmul.f32 0.0078125, %v1495_v28  ;;  %v2386_v25 = vpack.c.bf16 %v1750_v44, %v1749_v24 }
 0x855   :  { %v1505_v30 = vadd.f32 1e-05, %v1501_v27  ;;  %v1768_v27 = vld [vmem:[#allocation7 + $0xe8] sm:$0xff] }
 0x856   :  { %v1504_v51 = vadd.f32 1e-05, %v1500_v29  ;;  %v2388_v28 = vpack.c.bf16 %v1768_v27, %v1767_v26  ;;  %v1751_v29 = vld [vmem:[#allocation7 + $0x60] sm:$0xff] }
 0x858   :  { %2455 = vrsqrt.f32 %v1504_v51 }
 0x859   :  { %2457 = vrsqrt.f32 %v1505_v30  ;;  %v1752_v30 = vld [vmem:[#allocation7 + $0x68] sm:$0xff] }
 0x85a   :  { %v2390_v51 = vpack.c.bf16 %v1752_v30, %v1751_v29 }
 0x85d   :  { %v2452_v31 = vpop.eup %2451 }
 0x85e   :  { %v2454_v32 = vpop.eup %2453  ;;  %v1511_v34 = vmul.f32 %v2452_v31, %v2862_v35  ;;  %v1769_v31 = vld [vmem:[#allocation7 + $0xf0] sm:$0xff] }
 0x85f   :  { %v1510_v45 = vmul.f32 %v2454_v32, %v2865_v36  ;;  %v1770_v32 = vld [vmem:[#allocation7 + $0xf8] sm:$0xff] }
 0x860   :  { %v1521_v41 = vmul.f32 %v1889_v33, %v1511_v34  ;;  %v1754_v34 = vld [vmem:[#allocation7 + $0x78] sm:$0xff] }
 0x861   :  { %v1520_v38 = vmul.f32 %v1889_v33, %v1510_v45  ;;  %v1753_v45 = vld [vmem:[#allocation7 + $0x70] sm:$0xff] }
 0x862   :  { %v2456_v39 = vpop.eup %2455  ;;  %v1531_v13 = vadd.f32 %v1890_v37, %v1521_v41  ;;  %v1566_v41 = vld [vmem:[%s2974_s9] sm:$0x3] }
 0x863   :  { %v1530_v40 = vadd.f32 %v1890_v37, %v1520_v38  ;;  %v1512_v42 = vmul.f32 %v2456_v39, %v2875_v46  ;;  %v2458_v47 = vpop.eup %2457  ;;  %v1756_v46 = vld [vmem:[#allocation7 + $0x88] sm:$0xff]  ;;  %v1568_v38 = vlaneseq }
 0x864   :  { %v1513_v36 = vmul.f32 %v2458_v47, %v2872_v52  ;;  %v2364_v54 = vpack.c.bf16 %v1756_v46, %v1755_v53  ;;  %v1758_v52 = vld [vmem:[#allocation7 + $0x98] sm:$0xff] }
 0x865   :  { %1643 = vmatmul.mubr.f32.vlgmr.msra.gmra.mrb[20].mxu1 %v1530_v40  ;;  %v1522_v48 = vmul.f32 %v1889_v33, %v1512_v42  ;;  %v2368_v59 = vpack.c.bf16 %v1758_v52, %v1757_v58  ;;  %v1569_v39 = vshrl.u32 %v1568_v38, 7 }
 0x866   :  { %1648 = vmatprep.mubr.f32.mxu1 %v2583_v43  ;;  %v1523_v49 = vmul.f32 %v1889_v33, %v1513_v36  ;;  %2365 = vmatprep.subr.bf16.mxu1 %v2364_v54  ;;  %v2392_v33 = vpack.c.bf16 %v1770_v32, %v1769_v31 }
 0x867   :  { %v1532_v35 = vadd.f32 %v1890_v37, %v1522_v48  ;;  %2367 = vmatpush3.bf16.msra.mxu1 %v2366_v57  ;;  %v1570_v40 = vsub.s32 0, %v1569_v39  ;;  %v1574_v42 = vsub.s32 1, %v1569_v39 }
 0x868   :  { %v1533_v50 = vadd.f32 %v1890_v37, %v1523_v49  ;;  %2369 = vmatprep.subr.bf16.mxu1 %v2368_v59  ;;  %v2394_v37 = vpack.c.bf16 %v1754_v34, %v1753_v45 }
 0x869   :  { %1649 = vmatmul.mubr.f32.gmra.mrb[22].mxu1 %v1531_v13  ;;  %v1571_v47 = vrot.slane %v1566_v41, %v1570_v40  ;;  %v1575_v13 = vrot.slane %v1566_v41, %v1574_v42 }
 0x86a   :  { %1654 = vmatprep.mubr.f32.mxu1 %v2583_v43 }
 0x86b   :  { %2371 = vmatpush3.bf16.msra.mxu1 %v2370_v62 }
 0x86d   :  { %1655 = vmatmul.mubr.f32.gmra.mrb[24].mxu1 %v1532_v35 }
 0x86e   :  { %1660 = vmatprep.mubr.f32.mxu1 %v2583_v43  ;;  %v1760_v43 = vld [vmem:[#allocation7 + $0xa8] sm:$0xff] }
 0x86f   :  { %v2372_v0 = vpack.c.bf16 %v1760_v43, %v1759_v63 }
 0x871   :  { %1661 = vmatmul.mubr.f32.gmra.mrb[26].mxu1 %v1533_v50  ;;  %2373 = vmatprep.subr.bf16.mxu1 %v2372_v0 }
 0x872   :  { %2375 = vmatpush3.bf16.msra.mxu1 %v2374_v12 }
 0x873   :  { %2377 = vmatprep.subr.bf16.mxu1 %v2376_v5 }
 0x876   :  { %2379 = vmatpush3.bf16.msra.mxu1 %v2378_v8 }
 0x877   :  { %2381 = vmatprep.subr.bf16.mxu1 %v2380_v19 }
 0x87a   :  { %2383 = vmatpush3.bf16.msra.mxu1 %v2382_v20 }
 0x87b   :  { %2385 = vmatprep.subr.bf16.mxu1 %v2384_v23 }
 0x87e   :  { %2387 = vmatpush3.bf16.msra.mxu1 %v2386_v25 }
 0x87f   :  { %2389 = vmatprep.subr.bf16.mxu1 %v2388_v28 }
 0x882   :  { %2391 = vmatpush3.bf16.msra.mxu1 %v2390_v51 }
 0x883   :  { %2393 = vmatprep.subr.bf16.mxu1 %v2392_v33 }
 0x886   :  { %2395 = vmatpush3.bf16.msra.mxu1 %v2394_v37 }
 0x938   :  { %v1644_v48 = vpop.f32.mrb[20].mxu1 }
 0x939   :  { %v2897_v36 = vadd.f32 %v1644_v48, %v1571_v47  ;;  %v1646_v35 = vpop.f32.mrb[21].mxu1 }
 0x93a   :  { %v2899_v49 = vadd.f32 %v1646_v35, %v1575_v13 }
 0x93b   :  { %v1667_v50 = vmul.f32 %v2897_v36, %v2897_v36 }
 0x93c   :  { %v1668_v53 = vmul.f32 %v2899_v49, %v2899_v49  ;;  %v1650_v46 = vpop.f32.mrb[22].mxu1 }
 0x93d   :  { %v1675_v54 = vmul.f32 %v1667_v50, %v2897_v36  ;;  %v2906_v55 = vadd.f32 %v1650_v46, %v1571_v47  ;;  %v1652_v56 = vpop.f32.mrb[23].mxu1 }
 0x93e   :  { %v1676_v57 = vmul.f32 %v1668_v53, %v2899_v49  ;;  %v2909_v58 = vadd.f32 %v1652_v56, %v1575_v13 }
 0x93f   :  { %v1683_v52 = vmul.f32 0.044715, %v1675_v54  ;;  %v1669_v59 = vmul.f32 %v2906_v55, %v2906_v55 }
 0x940   :  { %v1684_v60 = vmul.f32 0.044715, %v1676_v57  ;;  %v1670_v61 = vmul.f32 %v2909_v58, %v2909_v58  ;;  %v1656_v62 = vpop.f32.mrb[24].mxu1 }
 0x941   :  { %v1691_v63 = vadd.f32 %v1683_v52, %v2897_v36  ;;  %v1677_v43 = vmul.f32 %v1669_v59, %v2906_v55  ;;  %v2917_v0 = vadd.f32 %v1656_v62, %v1571_v47  ;;  %v1658_v1 = vpop.f32.mrb[25].mxu1 }
 0x942   :  { %v1692_v2 = vadd.f32 %v1684_v60, %v2899_v49  ;;  %v1678_v12 = vmul.f32 %v1670_v61, %v2909_v58  ;;  %v2921_v11 = vadd.f32 %v1658_v1, %v1575_v13 }
 0x943   :  { %v1699_v4 = vmul.f32 0.7978846, %v1691_v63  ;;  %v1685_v5 = vmul.f32 0.044715, %v1677_v43  ;;  %v1671_v6 = vmul.f32 %v2917_v0, %v2917_v0 }
 0x944   :  { %v1700_v7 = vmul.f32 0.7978846, %v1692_v2  ;;  %v1686_v8 = vmul.f32 0.044715, %v1678_v12  ;;  %v1672_v10 = vmul.f32 %v2921_v11, %v2921_v11  ;;  %v1662_v17 = vpop.f32.mrb[26].mxu1 }
 0x945   :  { %2459 = vtanh.f32 %v1699_v4  ;;  %v1693_v19 = vadd.f32 %v1685_v5, %v2906_v55  ;;  %v1679_v18 = vmul.f32 %v1671_v6, %v2917_v0  ;;  %v2929_v16 = vadd.f32 %v1662_v17, %v1571_v47  ;;  %v1664_v20 = vpop.f32.mrb[27].mxu1 }
 0x946   :  { %v1694_v21 = vadd.f32 %v1686_v8, %v2909_v58  ;;  %v1680_v22 = vmul.f32 %v1672_v10, %v2921_v11  ;;  %v1665_v23 = vadd.f32 %v1664_v20, %v1575_v13  ;;  %2461 = vtanh.f32 %v1700_v7 }
 0x947   :  { %v1701_v24 = vmul.f32 0.7978846, %v1693_v19  ;;  %v1687_v44 = vmul.f32 0.044715, %v1679_v18  ;;  %v1673_v25 = vmul.f32 %v2929_v16, %v2929_v16  ;;  %v1891_v19 = vld [vmem:[%s2976_s11] ss:$0 sm:$0xff] }
 0x948   :  { %v1702_v26 = vmul.f32 0.7978846, %v1694_v21  ;;  %v1688_v27 = vmul.f32 0.044715, %v1680_v22  ;;  %v1674_v28 = vmul.f32 %v1665_v23, %v1665_v23 }
 0x949   :  { %v1695_v29 = vadd.f32 %v1687_v44, %v2917_v0  ;;  %v1681_v30 = vmul.f32 %v1673_v25, %v2929_v16  ;;  %2463 = vtanh.f32 %v1701_v24 }
 0x94a   :  { %v1696_v51 = vadd.f32 %v1688_v27, %v2921_v11  ;;  %v1682_v31 = vmul.f32 %v1674_v28, %v1665_v23  ;;  %2465 = vtanh.f32 %v1702_v26 }
 0x94b   :  { %v1703_v32 = vmul.f32 0.7978846, %v1695_v29  ;;  %v1689_v33 = vmul.f32 0.044715, %v1681_v30 }
 0x94c   :  { %v1704_v45 = vmul.f32 0.7978846, %v1696_v51  ;;  %v1690_v34 = vmul.f32 0.044715, %v1682_v31 }
 0x94d   :  { %v1697_v37 = vadd.f32 %v1689_v33, %v2929_v16  ;;  %2467 = vtanh.f32 %v1703_v32 }
 0x94e   :  { %v1698_v38 = vadd.f32 %v1690_v34, %v1665_v23  ;;  %2469 = vtanh.f32 %v1704_v45 }
 0x94f   :  { %v2460_v39 = vpop.eup %2459  ;;  %v1705_v40 = vmul.f32 0.7978846, %v1697_v37 }
 0x950   :  { %v2462_v41 = vpop.eup %2461  ;;  %v1715_v42 = vadd.f32 1.0, %v2460_v39  ;;  %v1706_v47 = vmul.f32 0.7978846, %v1698_v38 }
 0x951   :  { %v1716_v13 = vadd.f32 1.0, %v2462_v41  ;;  %2471 = vtanh.f32 %v1705_v40 }
 0x952   :  { %v1723_v48 = vmul.f32 0.5, %v1715_v42  ;;  %2473 = vtanh.f32 %v1706_v47 }
 0x953   :  { %v2464_v35 = vpop.eup %2463  ;;  %v1724_v50 = vmul.f32 0.5, %v1716_v13 }
 0x954   :  { %v2466_v53 = vpop.eup %2465  ;;  %v1717_v46 = vadd.f32 1.0, %v2464_v35  ;;  %v1731_v57 = vmul.f32 %v1723_v48, %v2897_v36 }
 0x955   :  { %v1732_v54 = vmul.f32 %v1724_v50, %v2899_v49  ;;  %v1718_v56 = vadd.f32 1.0, %v2466_v53 }
 0x956   :  { %v1725_v52 = vmul.f32 0.5, %v1717_v46 }
 0x957   :  { %v2468_v59 = vpop.eup %2467  ;;  %1842 = vmatprep.mubr.f32.mxu1 %v1732_v54  ;;  %v1726_v60 = vmul.f32 0.5, %v1718_v56 }
 0x958   :  { %v2470_v61 = vpop.eup %2469  ;;  %1843 = vmatmul.mubr.f32.vlgmr.msra.gmra.mrb[28].mxu1 %v1731_v57  ;;  %v1719_v62 = vadd.f32 1.0, %v2468_v59  ;;  %v1733_v1 = vmul.f32 %v1725_v52, %v2906_v55 }
 0x959   :  { %v1734_v63 = vmul.f32 %v1726_v60, %v2909_v58  ;;  %v1720_v43 = vadd.f32 1.0, %v2470_v61 }
 0x95a   :  { %v1727_v2 = vmul.f32 0.5, %v1719_v62 }
 0x95b   :  { %v2472_v12 = vpop.eup %2471  ;;  %1847 = vmatprep.mubr.f32.mxu1 %v1734_v63  ;;  %v1728_v4 = vmul.f32 0.5, %v1720_v43 }
 0x95c   :  { %v2474_v49 = vpop.eup %2473  ;;  %1848 = vmatmul.mubr.f32.gmra.mrb[30].mxu1 %v1733_v1  ;;  %v1721_v5 = vadd.f32 1.0, %v2472_v12  ;;  %v1735_v7 = vmul.f32 %v1727_v2, %v2917_v0 }
 0x95d   :  { %v1736_v36 = vmul.f32 %v1728_v4, %v2921_v11  ;;  %v1722_v6 = vadd.f32 1.0, %v2474_v49 }
 0x95e   :  { %v1729_v8 = vmul.f32 0.5, %v1721_v5 }
 0x95f   :  { %1852 = vmatprep.mubr.f32.mxu1 %v1736_v36  ;;  %v1730_v10 = vmul.f32 0.5, %v1722_v6 }
 0x960   :  { %1853 = vmatmul.mubr.f32.gmra.mrb[32].mxu1 %v1735_v7  ;;  %v1737_v17 = vmul.f32 %v1729_v8, %v2929_v16 }
 0x961   :  { %v1738_v58 = vmul.f32 %v1730_v10, %v1665_v23 }
 0x963   :  { %1857 = vmatprep.mubr.f32.mxu1 %v1738_v58 }
 0x964   :  { %1858 = vmatmul.mubr.f32.gmra.mrb[34].mxu1 %v1737_v17 }
 0xa2b   :  { %v1996_v55 = vpop.f32.mrb[28].mxu1 }
 0xa2c   :  { %v1997_v18 = vpop.f32.mrb[29].mxu1 }
 0xa2d   :  { %v1998_v20 = vadd.f32 %v1997_v18, %v1996_v55 }
 0xa2f   :  { %v1845_v11 = vadd.f32 %v1998_v20, %v1891_v19  ;;  %v1999_v21 = vpop.f32.mrb[30].mxu1 }
 0xa30   :  { %v2000_v22 = vpop.f32.mrb[31].mxu1 }
 0xa31   :  { %v1863_v0 = vadd.f32 %v1845_v11, %v2845_v14  ;;  %v2001_v24 = vadd.f32 %v2000_v22, %v1999_v21 }
 0xa33   :  { %1867 = vst [vmem:[%s2977_s12] sm:$0xff] %v1863_v0  ;;  %v1850_v16 = vadd.f32 %v2001_v24, %v1891_v19  ;;  %v2002_v23 = vpop.f32.mrb[32].mxu1 }
 0xa34   :  { %v2003_v44 = vpop.f32.mrb[33].mxu1 }
 0xa35   :  { %v1864_v25 = vadd.f32 %v1850_v16, %v2840_v3  ;;  %v2004_v26 = vadd.f32 %v2003_v44, %v2002_v23 }
 0xa37   :  { %1868 = vst [vmem:[%s2977_s12 + $0x8] sm:$0xff] %v1864_v25  ;;  %v1855_v27 = vadd.f32 %v2004_v26, %v1891_v19  ;;  %v2005_v28 = vpop.f32.mrb[34].mxu1 }
 0xa38   :  { %v2006_v29 = vpop.f32.mrb[35].mxu1 }
 0xa39   :  { %v1865_v14 = vadd.f32 %v1855_v27, %v2857_v15  ;;  %v2007_v30 = vadd.f32 %v2006_v29, %v2005_v28 }
 0xa3b   :  { %1869 = vst [vmem:[%s2977_s12 + $0x10] sm:$0xff] %v1865_v14  ;;  %v1860_v51 = vadd.f32 %v2007_v30, %v1891_v19 }
 0xa3d   :  { %v1866_v31 = vadd.f32 %v1860_v51, %v2852_v9 }
 0xa3f   :  { %1870 = vst [vmem:[%s2977_s12 + $0x18] sm:$0xff] %v1866_v31 }
 0xa40   :  { %1875 = vsyncpa [#allocation3], 1 }
 0xa41   :  { %1876 = vsyncpa [#allocation5], 1 }
 0xa42   :  { %1877 = vsyncpa [#allocation8], 1 }

</bundles_post_ra>
